<compile_context>
chip_gen: v5e
topology: v5e:2x2
jax: 0.10.0
libtpu: 0.0.40
codegen_flags: <defaults>
</compile_context>

<pallas_src>
import functools

import jax
import jax.numpy as jnp
from jax.experimental import pallas as pl
from jax.experimental.pallas import tpu as pltpu

# bf16 on the MXU (all three generations are bf16 engines).  Set to
# jnp.float32 to reproduce the f32 PyTorch reference numerics exactly.
MXU_DTYPE = jnp.bfloat16

_NEG_INF = -1e30  # additive pad-key mask value, always f32


def _dot(a, b):
    """a (cast to MXU_DTYPE) @ b (already MXU_DTYPE), f32 accumulation."""
    return jnp.dot(a.astype(MXU_DTYPE), b, preferred_element_type=jnp.float32)


def _layernorm(t, g, b, eps):
    mu = jnp.mean(t, axis=-1, keepdims=True)
    var = jnp.mean(jnp.square(t - mu), axis=-1, keepdims=True)
    return (t - mu) * jax.lax.rsqrt(var + eps) * g + b


# ----------------------------------------------------------------------------
# Kernel #1: patch embed + CLS/pos + encoder layer (streamed over depth)
#            + decoder head.  grid = (B, depth) = ("parallel", "arbitrary").
# Token layout per batch: rows [0, Np) = patch tokens, row Np = CLS,
# rows (Np, Sp) = padding (masked as keys, dropped before the decoder).
# ----------------------------------------------------------------------------
def _vit_kernel(patch_ref, pw_ref, add0_ref,
                wq_ref, wk_ref, wv_ref, bq_ref, bk_ref, bv_ref,
                wo_ref, bo_ref,
                w1_ref, b1_ref, w2_ref, b2_ref,
                g1_ref, be1_ref, g2_ref, be2_ref,
                dw_ref, db_ref, cw_ref, cb_ref,
                out_ref, x_scr,
                *, depth, heads, hd, n_patch, n_real, eps):
    l = pl.program_id(1)
    Sp, D = x_scr.shape

    # ---- once per batch element: patch embed + CLS + positional ----
    @pl.when(l == 0)
    def _init():
        add = add0_ref[...]                                    # (Sp, D) f32
        emb = _dot(patch_ref[...], pw_ref[...])                # (Np, D) f32
        x_scr[pl.ds(0, n_patch), :] = emb + add[:n_patch]
        x_scr[pl.ds(n_patch, Sp - n_patch), :] = add[n_patch:]

    x = x_scr[...]                                             # (Sp, D) f32
    xb = x.astype(MXU_DTYPE)

    # Pad-key mask built in-kernel: key columns >= n_real are padding.
    col = jax.lax.broadcasted_iota(jnp.int32, (1, Sp), 1)
    kmask = jnp.where(col < n_real, 0.0, _NEG_INF).astype(jnp.float32)

    # ---- multi-head self-attention ----
    # Per-head weights are indexed off the Ref (free); accumulating the
    # per-head out-projections is the merged (Sp,D)x(D,D) matmul split over
    # its K blocks.  TODO(synk): at production D (>=256) fuse q/k/v into one
    # 128-aligned wide matmul per the review; at hd=8 the column groups are
    # not tile-aligned so the per-head form is used here.
    scale = 1.0 / float(hd) ** 0.5
    attn = bo_ref[...]                                         # (1, D) f32
    for h in range(heads):
        q = _dot(xb, wq_ref[h]) + bq_ref[h]                    # (Sp, hd)
        k = _dot(xb, wk_ref[h]) + bk_ref[h]
        v = _dot(xb, wv_ref[h]) + bv_ref[h]
        s = jax.lax.dot_general(
            q.astype(MXU_DTYPE), k.astype(MXU_DTYPE),
            (((1,), (1,)), ((), ())),
            preferred_element_type=jnp.float32) * scale + kmask  # (Sp, Sp)
        s = s - jnp.max(s, axis=-1, keepdims=True)
        e = jnp.exp(s)
        p = e * pl.reciprocal(jnp.sum(e, axis=-1, keepdims=True), approx=True)
        ctx = _dot(p, v.astype(MXU_DTYPE))                     # (Sp, hd)
        attn = attn + _dot(ctx, wo_ref[h])                     # (Sp, D)

    # post-norm encoder layer (norm_first=False, ReLU FFN)
    x = _layernorm(x + attn, g1_ref[...], be1_ref[...], eps)
    h1 = jnp.maximum(_dot(x, w1_ref[...]) + b1_ref[...], 0.0)
    x = _layernorm(x + _dot(h1, w2_ref[...]) + b2_ref[...],
                   g2_ref[...], be2_ref[...], eps)
    x_scr[...] = x

    # ---- decoder head after the last layer (patch tokens only) ----
    @pl.when(l == depth - 1)
    def _decode():
        xp = x[:n_patch]                                       # drop CLS / pad rows
        z = jnp.maximum(_dot(xp, dw_ref[...]) + db_ref[...], 0.0)   # (Np, 4*128)
        y = _dot(z, cw_ref[...]) + cb_ref[...]                 # (Np, cout_pad) lane-dense
        out_ref[...] = y.astype(out_ref.dtype)


# ----------------------------------------------------------------------------
# Kernel #2: bilinear resize, channel-blocked, batched dot_generals per block.
# out_c = Ry @ X_c @ RxT for each channel in the block.
# ----------------------------------------------------------------------------
def _bilinear_kernel(ry_ref, rxT_ref, x_ref, o_ref):
    cblk = x_ref.shape[0]
    rx = jnp.broadcast_to(rxT_ref[...], (cblk,) + rxT_ref.shape)     # (C, Win, W)
    t = jax.lax.dot_general(x_ref[...], rx, (((2,), (1,)), ((0,), (0,))),
                            preferred_element_type=jnp.float32)      # (C, Hin, W)
    ry = jnp.broadcast_to(ry_ref[...], (cblk,) + ry_ref.shape)       # (C, H, Hin)
    o_ref[...] = jax.lax.dot_general(
        ry, t, (((2,), (1,)), ((0,), (0,))),
        preferred_element_type=jnp.float32).astype(o_ref.dtype)


def _bilinear_matrix(out_size, in_size):
    # PyTorch align_corners=False source-index rule.
    scale = in_size / out_size
    o = jnp.arange(out_size, dtype=jnp.float32)
    src = jnp.clip((o + 0.5) * scale - 0.5, 0.0, None)
    i0 = jnp.minimum(jnp.floor(src).astype(jnp.int32), in_size - 1)
    i1 = jnp.minimum(i0 + 1, in_size - 1)
    w1 = jnp.clip(src - i0.astype(jnp.float32), 0.0, 1.0)
    w0 = 1.0 - w1
    rows = jnp.arange(out_size)
    R = jnp.zeros((out_size, in_size), jnp.float32)
    R = R.at[rows, i0].add(w0)
    R = R.at[rows, i1].add(w1)
    return R


# ----------------------------------------------------------------------------
# Parameter initialization (deterministic synthetic weights, kernel-packed).
# Matmul weights are stored in MXU_DTYPE (bf16); additive params stay f32.
# ----------------------------------------------------------------------------
def init_params(key, img_size, patch_size, dim, depth, heads, mlp_dim, num_classes):
    C = img_size[2]
    Hp = img_size[0] // patch_size
    Np = Hp * Hp
    hd = dim // heads
    Cpp = C * patch_size * patch_size
    cout_pad = ((4 * num_classes + 127) // 128) * 128
    wdt = MXU_DTYPE

    ks = jax.random.split(key, 8 + depth)

    def nrm(k, shape, std=0.02):
        return std * jax.random.normal(k, shape, dtype=jnp.float32)

    p = {}
    p['pw'] = nrm(ks[0], (Cpp, dim)).astype(wdt)           # Conv2d patch embed as matmul
    p['patch_b'] = jnp.zeros((dim,), jnp.float32)
    p['cls'] = jax.random.normal(ks[1], (dim,), dtype=jnp.float32)
    p['pos'] = jax.random.normal(ks[2], (Np + 1, dim), dtype=jnp.float32)

    def heads_of(w):                                        # (dim, dim) -> (heads, dim, hd)
        return w.reshape(dim, heads, hd).transpose(1, 0, 2)

    wq, wk, wv, bq, bk, bv, wo, bo = [], [], [], [], [], [], [], []
    w1, b1, w2, b2, g1, be1, g2, be2 = [], [], [], [], [], [], [], []
    for l in range(depth):
        lk = jax.random.split(ks[3 + l], 4)
        wqkv = nrm(lk[0], (dim, 3 * dim))                   # cols = [q | k | v]
        wq.append(heads_of(wqkv[:, :dim]))
        wk.append(heads_of(wqkv[:, dim:2 * dim]))
        wv.append(heads_of(wqkv[:, 2 * dim:]))
        bq.append(jnp.zeros((heads, 1, hd), jnp.float32))
        bk.append(jnp.zeros((heads, 1, hd), jnp.float32))
        bv.append(jnp.zeros((heads, 1, hd), jnp.float32))
        wo.append(nrm(lk[1], (dim, dim)).reshape(heads, hd, dim))   # head-merge folded
        bo.append(jnp.zeros((1, dim), jnp.float32))
        w1.append(nrm(lk[2], (dim, mlp_dim)))
        b1.append(jnp.zeros((1, mlp_dim), jnp.float32))
        w2.append(nrm(lk[3], (mlp_dim, dim)))
        b2.append(jnp.zeros((1, dim), jnp.float32))
        g1.append(jnp.ones((1, dim), jnp.float32))
        be1.append(jnp.zeros((1, dim), jnp.float32))
        g2.append(jnp.ones((1, dim), jnp.float32))
        be2.append(jnp.zeros((1, dim), jnp.float32))

    st = lambda xs, dt: jnp.stack(xs, 0).astype(dt)
    p.update(wq=st(wq, wdt), wk=st(wk, wdt), wv=st(wv, wdt),
             bq=st(bq, jnp.float32), bk=st(bk, jnp.float32), bv=st(bv, jnp.float32),
             wo=st(wo, wdt), bo=st(bo, jnp.float32),
             w1=st(w1, wdt), b1=st(b1, jnp.float32),
             w2=st(w2, wdt), b2=st(b2, jnp.float32),
             g1=st(g1, jnp.float32), be1=st(be1, jnp.float32),
             g2=st(g2, jnp.float32), be2=st(be2, jnp.float32))

    # ConvTranspose2d(dim, 128, 2, stride=2): torch weight (dim, 128, 2, 2).
    wd = nrm(ks[3 + depth], (dim, 128, 2, 2))
    p['dw'] = wd.transpose(0, 2, 3, 1).reshape(dim, 4 * 128).astype(wdt)  # cols=(i,j,co)
    bd = nrm(ks[4 + depth], (128,))
    p['db'] = jnp.tile(bd, 4).reshape(1, 4 * 128)
    # Conv2d(128, nc, 1) block-diag over the 4 sub-pixels, columns zero-padded to 128.
    wc = nrm(ks[5 + depth], (num_classes, 128)).T                          # (128, nc)
    cw = jnp.kron(jnp.eye(4, dtype=jnp.float32), wc)                       # (512, 4*nc)
    p['cw'] = jnp.zeros((4 * 128, cout_pad), jnp.float32).at[:, :4 * num_classes].set(cw).astype(wdt)
    p['cb'] = jnp.zeros((1, cout_pad), jnp.float32)
    return p


# ----------------------------------------------------------------------------
# Forward pass.
# ----------------------------------------------------------------------------
def vit_segmentation_forward(kp, x, cfg):
    B, C, H, W = x.shape
    ps, D = cfg['patch_size'], cfg['dim']
    depth, heads, nc, mlp = cfg['depth'], cfg['heads'], cfg['num_classes'], cfg['mlp_dim']
    hd = D // heads
    Hp, Wp = H // ps, W // ps
    Np = Hp * Wp
    S = Np + 1                                   # real tokens (patches + CLS)
    Sp = ((S + 7) // 8) * 8                      # pad token axis to sublane multiple
    Cpp = C * ps * ps
    cout = 4 * nc
    cout_pad = kp['cw'].shape[1]

    # Patch extraction (pure layout; TODO(synk): at production image sizes fold
    # this into an index_map'ed patch-row grid instead of a wrapper copy).
    patches = (x.reshape(B, C, Hp, ps, Wp, ps)
                 .transpose(0, 2, 4, 1, 3, 5)
                 .reshape(B, Np, Cpp))

    # Single (Sp, D) additive term, resident across the whole grid:
    # rows [0,Np) = conv bias + pos[1+i]; row Np = cls + pos[0]; pad rows = 0.
    add0 = jnp.zeros((Sp, D), jnp.float32)
    add0 = add0.at[:Np].set(kp['patch_b'][None, :] + kp['pos'][1:1 + Np])
    add0 = add0.at[Np].set(kp['cls'] + kp['pos'][0])

    kern = functools.partial(_vit_kernel, depth=depth, heads=heads, hd=hd,
                             n_patch=Np, n_real=S, eps=1e-5)

    wspec4 = lambda s: pl.BlockSpec((None,) + s, lambda b, l: (l, 0, 0, 0))
    wspec3 = lambda s: pl.BlockSpec((None,) + s, lambda b, l: (l, 0, 0))
    fix2 = lambda s: pl.BlockSpec(s, lambda b, l: (0, 0))

    y = pl.pallas_call(
        kern,
        grid_spec=pltpu.PrefetchScalarGridSpec(
            num_scalar_prefetch=0,
            grid=(B, depth),
            in_specs=[
                pl.BlockSpec((None, Np, Cpp), lambda b, l: (b, 0, 0)),   # patches
                fix2((Cpp, D)),                                          # patch embed W
                fix2((Sp, D)),                                           # add0
                wspec4((heads, D, hd)), wspec4((heads, D, hd)), wspec4((heads, D, hd)),
                wspec4((heads, 1, hd)), wspec4((heads, 1, hd)), wspec4((heads, 1, hd)),
                wspec4((heads, hd, D)),                                  # wo
                wspec3((1, D)),                                          # bo
                wspec3((D, mlp)), wspec3((1, mlp)),                      # w1, b1
                wspec3((mlp, D)), wspec3((1, D)),                        # w2, b2
                wspec3((1, D)), wspec3((1, D)), wspec3((1, D)), wspec3((1, D)),  # LN params
                fix2((D, 4 * 128)), fix2((1, 4 * 128)),                  # deconv
                fix2((4 * 128, cout_pad)), fix2((1, cout_pad)),          # 1x1 conv (padded)
            ],
            out_specs=pl.BlockSpec((None, Np, cout_pad), lambda b, l: (b, 0, 0)),
            scratch_shapes=[pltpu.VMEM((Sp, D), jnp.float32)],
        ),
        out_shape=jax.ShapeDtypeStruct((B, Np, cout_pad), jnp.float32),
        compiler_params=pltpu.CompilerParams(
            dimension_semantics=("parallel", "arbitrary"),
            vmem_limit_bytes=32 * 1024 * 1024),
    )(patches, kp['pw'], add0,
      kp['wq'], kp['wk'], kp['wv'], kp['bq'], kp['bk'], kp['bv'],
      kp['wo'], kp['bo'],
      kp['w1'], kp['b1'], kp['w2'], kp['b2'],
      kp['g1'], kp['be1'], kp['g2'], kp['be2'],
      kp['dw'], kp['db'], kp['cw'], kp['cb'])

    # Pixel-shuffle the (i, j, class) column groups into (B*nc, Hin, Win).
    Hin, Win = 2 * Hp, 2 * Wp
    d_img = (y[..., :cout]
             .reshape(B, Hp, Wp, 2, 2, nc)
             .transpose(0, 5, 1, 3, 2, 4)
             .reshape(B * nc, Hin, Win))

    Ry = _bilinear_matrix(H, Hin)                # (H, Hin)
    RxT = _bilinear_matrix(W, Win).T             # (Win, W)

    up = pl.pallas_call(
        _bilinear_kernel,
        grid_spec=pltpu.PrefetchScalarGridSpec(
            num_scalar_prefetch=0,
            grid=(B,),
            in_specs=[
                pl.BlockSpec((H, Hin), lambda i: (0, 0)),
                pl.BlockSpec((Win, W), lambda i: (0, 0)),
                pl.BlockSpec((nc, Hin, Win), lambda i: (i, 0, 0)),
            ],
            out_specs=pl.BlockSpec((nc, H, W), lambda i: (i, 0, 0)),
        ),
        out_shape=jax.ShapeDtypeStruct((B * nc, H, W), jnp.float32),
        compiler_params=pltpu.CompilerParams(
            dimension_semantics=("parallel",),
            vmem_limit_bytes=32 * 1024 * 1024),
    )(Ry, RxT, d_img)

    return up.reshape(B, nc, H, W)


if __name__ == "__main__":
    # Small config consistent with the module's structure.
    cfg = dict(img_size=[32, 32, 3], patch_size=8, dim=32, depth=2, heads=4,
               mlp_dim=64, num_classes=3)
    key = jax.random.PRNGKey(0)
    pkey, xkey = jax.random.split(key)
    params = init_params(pkey, **cfg)
    x = jax.random.normal(xkey, (2, 3, 32, 32), dtype=jnp.float32)   # NCHW

    fwd = jax.jit(functools.partial(vit_segmentation_forward, cfg=cfg))
    out = jax.block_until_ready(fwd(params, x))
    assert out.shape == (2, cfg['num_classes'], 32, 32), out.shape
    assert bool(jnp.all(jnp.isfinite(out)))
    print("KERNEL_OK")
</pallas_src>

<mosaic_0001>
module attributes {stable_mosaic.version = 11 : i64} {
  func.func @_bilinear_kernel(%arg0: i32, %arg1: memref<32x8xf32, #tpu.memory_space<vmem>>, %arg2: memref<8x32xf32, #tpu.memory_space<vmem>>, %arg3: memref<3x8x8xf32, #tpu.memory_space<vmem>>, %arg4: memref<3x32x32xf32, #tpu.memory_space<vmem>>) attributes {dimension_semantics = [#tpu.dimension_semantics<parallel>], iteration_bounds = array<i64: 2>, scalar_prefetch = 0 : i64, scratch_operands = 0 : i64, tpu.core_type = #tpu.core_type<tc>, window_params = [{pipeline_mode = #tpu.pipeline_mode<synchronous>, transform_indices = @transform_0, window_bounds = array<i64: 32, 8>}, {pipeline_mode = #tpu.pipeline_mode<synchronous>, transform_indices = @transform_1, window_bounds = array<i64: 8, 32>}, {transform_indices = @transform_2, window_bounds = array<i64: 3, 8, 8>}, {transform_indices = @transform_3, window_bounds = array<i64: 3, 32, 32>}]} {
    %c0 = arith.constant 0 : index
    %c0_0 = arith.constant 0 : index
    %0 = vector.load %arg2[%c0, %c0_0] : memref<8x32xf32, #tpu.memory_space<vmem>>, vector<8x32xf32>
    %1 = vector.shape_cast %0 : vector<8x32xf32> to vector<1x8x32xf32>
    %2 = vector.broadcast %1 : vector<1x8x32xf32> to vector<3x8x32xf32>
    %c0_1 = arith.constant 0 : index
    %c0_2 = arith.constant 0 : index
    %c0_3 = arith.constant 0 : index
    %3 = vector.load %arg3[%c0_1, %c0_2, %c0_3] : memref<3x8x8xf32, #tpu.memory_space<vmem>>, vector<3x8x8xf32>
    %cst = arith.constant dense<0.000000e+00> : vector<3x8x32xf32>
    %4 = tpu.matmul %3, %2, %cst {dimension_numbers = #tpu.dot_dimension_numbers<[2], [1], [1], [2], [0, 0, 0, 1, 1, 2], [0], [0]>} : vector<3x8x8xf32>, vector<3x8x32xf32>, vector<3x8x32xf32> -> vector<3x8x32xf32>
    %c0_4 = arith.constant 0 : index
    %c0_5 = arith.constant 0 : index
    %5 = vector.load %arg1[%c0_4, %c0_5] : memref<32x8xf32, #tpu.memory_space<vmem>>, vector<32x8xf32>
    %6 = vector.shape_cast %5 : vector<32x8xf32> to vector<1x32x8xf32>
    %7 = vector.broadcast %6 : vector<1x32x8xf32> to vector<3x32x8xf32>
    %cst_6 = arith.constant dense<0.000000e+00> : vector<3x32x32xf32>
    %8 = tpu.matmul %7, %4, %cst_6 {dimension_numbers = #tpu.dot_dimension_numbers<[2], [1], [1], [2], [0, 0, 0, 1, 1, 2], [0], [0]>} : vector<3x32x8xf32>, vector<3x8x32xf32>, vector<3x32x32xf32> -> vector<3x32x32xf32>
    %c0_7 = arith.constant 0 : index
    %c0_8 = arith.constant 0 : index
    %c0_9 = arith.constant 0 : index
    %9 = vector.load %arg4[%c0_7, %c0_8, %c0_9] : memref<3x32x32xf32, #tpu.memory_space<vmem>>, vector<3x32x32xf32>
    tpu.vector_store %arg4[%c0_7, %c0_8, %c0_9], %8 {strides = array<i32>} : memref<3x32x32xf32, #tpu.memory_space<vmem>>, vector<3x32x32xf32>,
    return
  }
  func.func @transform_0(%arg0: i32) -> (i32, i32) {
    %c0_i32 = arith.constant 0 : i32
    %c0_i32_0 = arith.constant 0 : i32
    %c0_i32_1 = arith.constant 0 : i32
    return %c0_i32, %c0_i32_0 : i32, i32
  }
  func.func @transform_1(%arg0: i32) -> (i32, i32) {
    %c0_i32 = arith.constant 0 : i32
    %c0_i32_0 = arith.constant 0 : i32
    %c0_i32_1 = arith.constant 0 : i32
    return %c0_i32, %c0_i32_0 : i32, i32
  }
  func.func @transform_2(%arg0: i32) -> (i32, i32, i32) {
    %c0_i32 = arith.constant 0 : i32
    %c0_i32_0 = arith.constant 0 : i32
    %c0_i32_1 = arith.constant 0 : i32
    return %arg0, %c0_i32, %c0_i32_0 : i32, i32, i32
  }
  func.func @transform_3(%arg0: i32) -> (i32, i32, i32) {
    %c0_i32 = arith.constant 0 : i32
    %c0_i32_0 = arith.constant 0 : i32
    %c0_i32_1 = arith.constant 0 : i32
    return %arg0, %c0_i32, %c0_i32_0 : i32, i32, i32
  }
}

module attributes {stable_mosaic.version = 11 : i64} {
  func.func @_vit_kernel(%arg0: i32, %arg1: i32, %arg2: memref<1x16x192xf32, #tpu.memory_space<vmem>>, %arg3: memref<192x32xbf16, #tpu.memory_space<vmem>>, %arg4: memref<24x32xf32, #tpu.memory_space<vmem>>, %arg5: memref<1x4x32x8xbf16, #tpu.memory_space<vmem>>, %arg6: memref<1x4x32x8xbf16, #tpu.memory_space<vmem>>, %arg7: memref<1x4x32x8xbf16, #tpu.memory_space<vmem>>, %arg8: memref<1x4x1x8xf32, #tpu.memory_space<vmem>>, %arg9: memref<1x4x1x8xf32, #tpu.memory_space<vmem>>, %arg10: memref<1x4x1x8xf32, #tpu.memory_space<vmem>>, %arg11: memref<1x4x8x32xbf16, #tpu.memory_space<vmem>>, %arg12: memref<1x1x32xf32, #tpu.memory_space<vmem>>, %arg13: memref<1x32x64xbf16, #tpu.memory_space<vmem>>, %arg14: memref<1x1x64xf32, #tpu.memory_space<vmem>>, %arg15: memref<1x64x32xbf16, #tpu.memory_space<vmem>>, %arg16: memref<1x1x32xf32, #tpu.memory_space<vmem>>, %arg17: memref<1x1x32xf32, #tpu.memory_space<vmem>>, %arg18: memref<1x1x32xf32, #tpu.memory_space<vmem>>, %arg19: memref<1x1x32xf32, #tpu.memory_space<vmem>>, %arg20: memref<1x1x32xf32, #tpu.memory_space<vmem>>, %arg21: memref<32x512xbf16, #tpu.memory_space<vmem>>, %arg22: memref<1x512xf32, #tpu.memory_space<vmem>>, %arg23: memref<512x128xbf16, #tpu.memory_space<vmem>>, %arg24: memref<1x128xf32, #tpu.memory_space<vmem>>, %arg25: memref<1x16x128xf32, #tpu.memory_space<vmem>>, %arg26: memref<24x32xf32, #tpu.memory_space<vmem>>) attributes {dimension_semantics = [#tpu.dimension_semantics<parallel>, #tpu.dimension_semantics<arbitrary>], iteration_bounds = array<i64: 2, 2>, scalar_prefetch = 0 : i64, scratch_operands = 1 : i64, tpu.core_type = #tpu.core_type<tc>, window_params = [{transform_indices = @transform_0, window_bounds = array<i64: 1, 16, 192>}, {pipeline_mode = #tpu.pipeline_mode<synchronous>, transform_indices = @transform_1, window_bounds = array<i64: 192, 32>}, {pipeline_mode = #tpu.pipeline_mode<synchronous>, transform_indices = @transform_2, window_bounds = array<i64: 24, 32>}, {transform_indices = @transform_3, window_bounds = array<i64: 1, 4, 32, 8>}, {transform_indices = @transform_4, window_bounds = array<i64: 1, 4, 32, 8>}, {transform_indices = @transform_5, window_bounds = array<i64: 1, 4, 32, 8>}, {transform_indices = @transform_6, window_bounds = array<i64: 1, 4, 1, 8>}, {transform_indices = @transform_7, window_bounds = array<i64: 1, 4, 1, 8>}, {transform_indices = @transform_8, window_bounds = array<i64: 1, 4, 1, 8>}, {transform_indices = @transform_9, window_bounds = array<i64: 1, 4, 8, 32>}, {transform_indices = @transform_10, window_bounds = array<i64: 1, 1, 32>}, {transform_indices = @transform_11, window_bounds = array<i64: 1, 32, 64>}, {transform_indices = @transform_12, window_bounds = array<i64: 1, 1, 64>}, {transform_indices = @transform_13, window_bounds = array<i64: 1, 64, 32>}, {transform_indices = @transform_14, window_bounds = array<i64: 1, 1, 32>}, {transform_indices = @transform_15, window_bounds = array<i64: 1, 1, 32>}, {transform_indices = @transform_16, window_bounds = array<i64: 1, 1, 32>}, {transform_indices = @transform_17, window_bounds = array<i64: 1, 1, 32>}, {transform_indices = @transform_18, window_bounds = array<i64: 1, 1, 32>}, {pipeline_mode = #tpu.pipeline_mode<synchronous>, transform_indices = @transform_19, window_bounds = array<i64: 32, 512>}, {pipeline_mode = #tpu.pipeline_mode<synchronous>, transform_indices = @transform_20, window_bounds = array<i64: 1, 512>}, {pipeline_mode = #tpu.pipeline_mode<synchronous>, transform_indices = @transform_21, window_bounds = array<i64: 512, 128>}, {pipeline_mode = #tpu.pipeline_mode<synchronous>, transform_indices = @transform_22, window_bounds = array<i64: 1, 128>}, {transform_indices = @transform_23, window_bounds = array<i64: 1, 16, 128>}]} {
    %c0_i32 = arith.constant 0 : i32
    %0 = arith.cmpi eq, %arg1, %c0_i32 : i32
    %1 = arith.extui %0 : i1 to i32
    %c0_i32_0 = arith.constant 0 : i32
    %2 = arith.cmpi ne, %1, %c0_i32_0 : i32
    scf.if %2 {
      %c0_191 = arith.constant 0 : index
      %c0_192 = arith.constant 0 : index
      %274 = vector.load %arg4[%c0_191, %c0_192] : memref<24x32xf32, #tpu.memory_space<vmem>>, vector<24x32xf32>
      %c0_193 = arith.constant 0 : index
      %c0_194 = arith.constant 0 : index
      %c0_195 = arith.constant 0 : index
      %275 = vector.load %arg2[%c0_193, %c0_194, %c0_195] : memref<1x16x192xf32, #tpu.memory_space<vmem>>, vector<1x16x192xf32>
      %276 = vector.shape_cast %275 : vector<1x16x192xf32> to vector<16x192xf32>
      %c0_196 = arith.constant 0 : index
      %c0_197 = arith.constant 0 : index
      %277 = vector.load %arg3[%c0_196, %c0_197] : memref<192x32xbf16, #tpu.memory_space<vmem>>, vector<192x32xbf16>
      %278 = arith.truncf %276 : vector<16x192xf32> to vector<16x192xbf16>
      %cst_198 = arith.constant dense<0.000000e+00> : vector<16x32xf32>
      %279 = tpu.matmul %278, %277, %cst_198 {dimension_numbers = #tpu.dot_dimension_numbers<[1], [0], [0], [1], [0, 0, 1, 1], [], []>} : vector<16x192xbf16>, vector<192x32xbf16>, vector<16x32xf32> -> vector<16x32xf32>
      %280 = vector.extract_strided_slice %274 {offsets = [0, 0], sizes = [16, 32], strides = [1, 1]} : vector<24x32xf32> to vector<16x32xf32>
      %281 = arith.addf %279, %280 : vector<16x32xf32>
      %c0_199 = arith.constant 0 : index
      %c0_200 = arith.constant 0 : index
      %282 = vector.load %arg26[%c0_199, %c0_200] : memref<24x32xf32, #tpu.memory_space<vmem>>, vector<16x32xf32>
      tpu.vector_store %arg26[%c0_199, %c0_200], %281 {strides = array<i32>} : memref<24x32xf32, #tpu.memory_space<vmem>>, vector<16x32xf32>,
      %283 = vector.extract_strided_slice %274 {offsets = [16, 0], sizes = [8, 32], strides = [1, 1]} : vector<24x32xf32> to vector<8x32xf32>
      %c16 = arith.constant 16 : index
      %c0_201 = arith.constant 0 : index
      %284 = vector.load %arg26[%c16, %c0_201] : memref<24x32xf32, #tpu.memory_space<vmem>>, vector<8x32xf32>
      tpu.vector_store %arg26[%c16, %c0_201], %283 {strides = array<i32>} : memref<24x32xf32, #tpu.memory_space<vmem>>, vector<8x32xf32>,
    } else {
    }
    %c0 = arith.constant 0 : index
    %c0_1 = arith.constant 0 : index
    %3 = vector.load %arg26[%c0, %c0_1] : memref<24x32xf32, #tpu.memory_space<vmem>>, vector<24x32xf32>
    %4 = arith.truncf %3 : vector<24x32xf32> to vector<24x32xbf16>
    %5 = tpu.iota {dimensions = array<i32: 1>} : vector<1x24xi32>
    %c17_i32 = arith.constant 17 : i32
    %6 = vector.broadcast %c17_i32 : i32 to vector<1x24xi32>
    %7 = arith.cmpi slt, %5, %6 : vector<1x24xi32>
    %cst = arith.constant 0.000000e+00 : f32
    %cst_2 = arith.constant -1.000000e+30 : f32
    %8 = vector.broadcast %cst : f32 to vector<1x24xf32>
    %9 = vector.broadcast %cst_2 : f32 to vector<1x24xf32>
    %10 = arith.select %7, %8, %9 : vector<1x24xi1>, vector<1x24xf32>
    %c0_3 = arith.constant 0 : index
    %c0_4 = arith.constant 0 : index
    %c0_5 = arith.constant 0 : index
    %11 = vector.load %arg12[%c0_3, %c0_4, %c0_5] : memref<1x1x32xf32, #tpu.memory_space<vmem>>, vector<1x1x32xf32>
    %12 = vector.shape_cast %11 : vector<1x1x32xf32> to vector<1x32xf32>
    %c0_6 = arith.constant 0 : index
    %c0_7 = arith.constant 0 : index
    %c0_8 = arith.constant 0 : index
    %c0_9 = arith.constant 0 : index
    %13 = vector.load %arg5[%c0_6, %c0_7, %c0_8, %c0_9] : memref<1x4x32x8xbf16, #tpu.memory_space<vmem>>, vector<1x1x32x8xbf16>
    %14 = vector.shape_cast %13 : vector<1x1x32x8xbf16> to vector<32x8xbf16>
    %cst_10 = arith.constant dense<0.000000e+00> : vector<24x8xf32>
    %15 = tpu.matmul %4, %14, %cst_10 {dimension_numbers = #tpu.dot_dimension_numbers<[1], [0], [0], [1], [0, 0, 1, 1], [], []>} : vector<24x32xbf16>, vector<32x8xbf16>, vector<24x8xf32> -> vector<24x8xf32>
    %c0_11 = arith.constant 0 : index
    %c0_12 = arith.constant 0 : index
    %c0_13 = arith.constant 0 : index
    %c0_14 = arith.constant 0 : index
    %16 = vector.load %arg8[%c0_11, %c0_12, %c0_13, %c0_14] : memref<1x4x1x8xf32, #tpu.memory_space<vmem>>, vector<1x1x1x8xf32>
    %17 = vector.shape_cast %16 : vector<1x1x1x8xf32> to vector<1x8xf32>
    %18 = vector.broadcast %17 : vector<1x8xf32> to vector<24x8xf32>
    %19 = arith.addf %15, %18 : vector<24x8xf32>
    %c0_15 = arith.constant 0 : index
    %c0_16 = arith.constant 0 : index
    %c0_17 = arith.constant 0 : index
    %c0_18 = arith.constant 0 : index
    %20 = vector.load %arg6[%c0_15, %c0_16, %c0_17, %c0_18] : memref<1x4x32x8xbf16, #tpu.memory_space<vmem>>, vector<1x1x32x8xbf16>
    %21 = vector.shape_cast %20 : vector<1x1x32x8xbf16> to vector<32x8xbf16>
    %cst_19 = arith.constant dense<0.000000e+00> : vector<24x8xf32>
    %22 = tpu.matmul %4, %21, %cst_19 {dimension_numbers = #tpu.dot_dimension_numbers<[1], [0], [0], [1], [0, 0, 1, 1], [], []>} : vector<24x32xbf16>, vector<32x8xbf16>, vector<24x8xf32> -> vector<24x8xf32>
    %c0_20 = arith.constant 0 : index
    %c0_21 = arith.constant 0 : index
    %c0_22 = arith.constant 0 : index
    %c0_23 = arith.constant 0 : index
    %23 = vector.load %arg9[%c0_20, %c0_21, %c0_22, %c0_23] : memref<1x4x1x8xf32, #tpu.memory_space<vmem>>, vector<1x1x1x8xf32>
    %24 = vector.shape_cast %23 : vector<1x1x1x8xf32> to vector<1x8xf32>
    %25 = vector.broadcast %24 : vector<1x8xf32> to vector<24x8xf32>
    %26 = arith.addf %22, %25 : vector<24x8xf32>
    %c0_24 = arith.constant 0 : index
    %c0_25 = arith.constant 0 : index
    %c0_26 = arith.constant 0 : index
    %c0_27 = arith.constant 0 : index
    %27 = vector.load %arg7[%c0_24, %c0_25, %c0_26, %c0_27] : memref<1x4x32x8xbf16, #tpu.memory_space<vmem>>, vector<1x1x32x8xbf16>
    %28 = vector.shape_cast %27 : vector<1x1x32x8xbf16> to vector<32x8xbf16>
    %cst_28 = arith.constant dense<0.000000e+00> : vector<24x8xf32>
    %29 = tpu.matmul %4, %28, %cst_28 {dimension_numbers = #tpu.dot_dimension_numbers<[1], [0], [0], [1], [0, 0, 1, 1], [], []>} : vector<24x32xbf16>, vector<32x8xbf16>, vector<24x8xf32> -> vector<24x8xf32>
    %c0_29 = arith.constant 0 : index
    %c0_30 = arith.constant 0 : index
    %c0_31 = arith.constant 0 : index
    %c0_32 = arith.constant 0 : index
    %30 = vector.load %arg10[%c0_29, %c0_30, %c0_31, %c0_32] : memref<1x4x1x8xf32, #tpu.memory_space<vmem>>, vector<1x1x1x8xf32>
    %31 = vector.shape_cast %30 : vector<1x1x1x8xf32> to vector<1x8xf32>
    %32 = vector.broadcast %31 : vector<1x8xf32> to vector<24x8xf32>
    %33 = arith.addf %29, %32 : vector<24x8xf32>
    %34 = arith.truncf %19 : vector<24x8xf32> to vector<24x8xbf16>
    %35 = arith.truncf %26 : vector<24x8xf32> to vector<24x8xbf16>
    %cst_33 = arith.constant dense<0.000000e+00> : vector<24x24xf32>
    %36 = tpu.matmul %34, %35, %cst_33 {dimension_numbers = #tpu.dot_dimension_numbers<[1], [1], [0], [0], [0, 0, 1, 0], [], []>} : vector<24x8xbf16>, vector<24x8xbf16>, vector<24x24xf32> -> vector<24x24xf32>
    %cst_34 = arith.constant 0.353553385 : f32
    %37 = vector.broadcast %cst_34 : f32 to vector<24x24xf32>
    %38 = arith.mulf %36, %37 : vector<24x24xf32>
    %39 = vector.broadcast %10 : vector<1x24xf32> to vector<24x24xf32>
    %40 = arith.addf %38, %39 : vector<24x24xf32>
    %cst_35 = arith.constant dense<0xFF800000> : vector<24xf32>
    %41 = vector.multi_reduction <maximumf>, %40, %cst_35 [1] : vector<24x24xf32> to vector<24xf32>
    %42 = vector.shape_cast %41 : vector<24xf32> to vector<24x1xf32>
    %43 = vector.broadcast %42 : vector<24x1xf32> to vector<24x24xf32>
    %44 = arith.subf %40, %43 : vector<24x24xf32>
    %45 = math.exp %44 : vector<24x24xf32>
    %cst_36 = arith.constant dense<0.000000e+00> : vector<24xf32>
    %46 = vector.multi_reduction <add>, %45, %cst_36 [1] : vector<24x24xf32> to vector<24xf32>
    %47 = vector.shape_cast %46 : vector<24xf32> to vector<24x1xf32>
    %48 = tpu.reciprocal %47 {approx = true} : vector<24x1xf32> -> vector<24x1xf32>
    %49 = vector.broadcast %48 : vector<24x1xf32> to vector<24x24xf32>
    %50 = arith.mulf %45, %49 : vector<24x24xf32>
    %51 = arith.truncf %33 : vector<24x8xf32> to vector<24x8xbf16>
    %52 = arith.truncf %50 : vector<24x24xf32> to vector<24x24xbf16>
    %cst_37 = arith.constant dense<0.000000e+00> : vector<24x8xf32>
    %53 = tpu.matmul %52, %51, %cst_37 {dimension_numbers = #tpu.dot_dimension_numbers<[1], [0], [0], [1], [0, 0, 1, 1], [], []>} : vector<24x24xbf16>, vector<24x8xbf16>, vector<24x8xf32> -> vector<24x8xf32>
    %c0_38 = arith.constant 0 : index
    %c0_39 = arith.constant 0 : index
    %c0_40 = arith.constant 0 : index
    %c0_41 = arith.constant 0 : index
    %54 = vector.load %arg11[%c0_38, %c0_39, %c0_40, %c0_41] : memref<1x4x8x32xbf16, #tpu.memory_space<vmem>>, vector<1x1x8x32xbf16>
    %55 = vector.shape_cast %54 : vector<1x1x8x32xbf16> to vector<8x32xbf16>
    %56 = arith.truncf %53 : vector<24x8xf32> to vector<24x8xbf16>
    %cst_42 = arith.constant dense<0.000000e+00> : vector<24x32xf32>
    %57 = tpu.matmul %56, %55, %cst_42 {dimension_numbers = #tpu.dot_dimension_numbers<[1], [0], [0], [1], [0, 0, 1, 1], [], []>} : vector<24x8xbf16>, vector<8x32xbf16>, vector<24x32xf32> -> vector<24x32xf32>
    %58 = vector.broadcast %12 : vector<1x32xf32> to vector<24x32xf32>
    %59 = arith.addf %58, %57 : vector<24x32xf32>
    %c0_43 = arith.constant 0 : index
    %c1 = arith.constant 1 : index
    %c0_44 = arith.constant 0 : index
    %c0_45 = arith.constant 0 : index
    %60 = vector.load %arg5[%c0_43, %c1, %c0_44, %c0_45] : memref<1x4x32x8xbf16, #tpu.memory_space<vmem>>, vector<1x1x32x8xbf16>
    %61 = vector.shape_cast %60 : vector<1x1x32x8xbf16> to vector<32x8xbf16>
    %cst_46 = arith.constant dense<0.000000e+00> : vector<24x8xf32>
    %62 = tpu.matmul %4, %61, %cst_46 {dimension_numbers = #tpu.dot_dimension_numbers<[1], [0], [0], [1], [0, 0, 1, 1], [], []>} : vector<24x32xbf16>, vector<32x8xbf16>, vector<24x8xf32> -> vector<24x8xf32>
    %c0_47 = arith.constant 0 : index
    %c1_48 = arith.constant 1 : index
    %c0_49 = arith.constant 0 : index
    %c0_50 = arith.constant 0 : index
    %63 = vector.load %arg8[%c0_47, %c1_48, %c0_49, %c0_50] : memref<1x4x1x8xf32, #tpu.memory_space<vmem>>, vector<1x1x1x8xf32>
    %64 = vector.shape_cast %63 : vector<1x1x1x8xf32> to vector<1x8xf32>
    %65 = vector.broadcast %64 : vector<1x8xf32> to vector<24x8xf32>
    %66 = arith.addf %62, %65 : vector<24x8xf32>
    %c0_51 = arith.constant 0 : index
    %c1_52 = arith.constant 1 : index
    %c0_53 = arith.constant 0 : index
    %c0_54 = arith.constant 0 : index
    %67 = vector.load %arg6[%c0_51, %c1_52, %c0_53, %c0_54] : memref<1x4x32x8xbf16, #tpu.memory_space<vmem>>, vector<1x1x32x8xbf16>
    %68 = vector.shape_cast %67 : vector<1x1x32x8xbf16> to vector<32x8xbf16>
    %cst_55 = arith.constant dense<0.000000e+00> : vector<24x8xf32>
    %69 = tpu.matmul %4, %68, %cst_55 {dimension_numbers = #tpu.dot_dimension_numbers<[1], [0], [0], [1], [0, 0, 1, 1], [], []>} : vector<24x32xbf16>, vector<32x8xbf16>, vector<24x8xf32> -> vector<24x8xf32>
    %c0_56 = arith.constant 0 : index
    %c1_57 = arith.constant 1 : index
    %c0_58 = arith.constant 0 : index
    %c0_59 = arith.constant 0 : index
    %70 = vector.load %arg9[%c0_56, %c1_57, %c0_58, %c0_59] : memref<1x4x1x8xf32, #tpu.memory_space<vmem>>, vector<1x1x1x8xf32>
    %71 = vector.shape_cast %70 : vector<1x1x1x8xf32> to vector<1x8xf32>
    %72 = vector.broadcast %71 : vector<1x8xf32> to vector<24x8xf32>
    %73 = arith.addf %69, %72 : vector<24x8xf32>
    %c0_60 = arith.constant 0 : index
    %c1_61 = arith.constant 1 : index
    %c0_62 = arith.constant 0 : index
    %c0_63 = arith.constant 0 : index
    %74 = vector.load %arg7[%c0_60, %c1_61, %c0_62, %c0_63] : memref<1x4x32x8xbf16, #tpu.memory_space<vmem>>, vector<1x1x32x8xbf16>
    %75 = vector.shape_cast %74 : vector<1x1x32x8xbf16> to vector<32x8xbf16>
    %cst_64 = arith.constant dense<0.000000e+00> : vector<24x8xf32>
    %76 = tpu.matmul %4, %75, %cst_64 {dimension_numbers = #tpu.dot_dimension_numbers<[1], [0], [0], [1], [0, 0, 1, 1], [], []>} : vector<24x32xbf16>, vector<32x8xbf16>, vector<24x8xf32> -> vector<24x8xf32>
    %c0_65 = arith.constant 0 : index
    %c1_66 = arith.constant 1 : index
    %c0_67 = arith.constant 0 : index
    %c0_68 = arith.constant 0 : index
    %77 = vector.load %arg10[%c0_65, %c1_66, %c0_67, %c0_68] : memref<1x4x1x8xf32, #tpu.memory_space<vmem>>, vector<1x1x1x8xf32>
    %78 = vector.shape_cast %77 : vector<1x1x1x8xf32> to vector<1x8xf32>
    %79 = vector.broadcast %78 : vector<1x8xf32> to vector<24x8xf32>
    %80 = arith.addf %76, %79 : vector<24x8xf32>
    %81 = arith.truncf %66 : vector<24x8xf32> to vector<24x8xbf16>
    %82 = arith.truncf %73 : vector<24x8xf32> to vector<24x8xbf16>
    %cst_69 = arith.constant dense<0.000000e+00> : vector<24x24xf32>
    %83 = tpu.matmul %81, %82, %cst_69 {dimension_numbers = #tpu.dot_dimension_numbers<[1], [1], [0], [0], [0, 0, 1, 0], [], []>} : vector<24x8xbf16>, vector<24x8xbf16>, vector<24x24xf32> -> vector<24x24xf32>
    %cst_70 = arith.constant 0.353553385 : f32
    %84 = vector.broadcast %cst_70 : f32 to vector<24x24xf32>
    %85 = arith.mulf %83, %84 : vector<24x24xf32>
    %86 = vector.broadcast %10 : vector<1x24xf32> to vector<24x24xf32>
    %87 = arith.addf %85, %86 : vector<24x24xf32>
    %cst_71 = arith.constant dense<0xFF800000> : vector<24xf32>
    %88 = vector.multi_reduction <maximumf>, %87, %cst_71 [1] : vector<24x24xf32> to vector<24xf32>
    %89 = vector.shape_cast %88 : vector<24xf32> to vector<24x1xf32>
    %90 = vector.broadcast %89 : vector<24x1xf32> to vector<24x24xf32>
    %91 = arith.subf %87, %90 : vector<24x24xf32>
    %92 = math.exp %91 : vector<24x24xf32>
    %cst_72 = arith.constant dense<0.000000e+00> : vector<24xf32>
    %93 = vector.multi_reduction <add>, %92, %cst_72 [1] : vector<24x24xf32> to vector<24xf32>
    %94 = vector.shape_cast %93 : vector<24xf32> to vector<24x1xf32>
    %95 = tpu.reciprocal %94 {approx = true} : vector<24x1xf32> -> vector<24x1xf32>
    %96 = vector.broadcast %95 : vector<24x1xf32> to vector<24x24xf32>
    %97 = arith.mulf %92, %96 : vector<24x24xf32>
    %98 = arith.truncf %80 : vector<24x8xf32> to vector<24x8xbf16>
    %99 = arith.truncf %97 : vector<24x24xf32> to vector<24x24xbf16>
    %cst_73 = arith.constant dense<0.000000e+00> : vector<24x8xf32>
    %100 = tpu.matmul %99, %98, %cst_73 {dimension_numbers = #tpu.dot_dimension_numbers<[1], [0], [0], [1], [0, 0, 1, 1], [], []>} : vector<24x24xbf16>, vector<24x8xbf16>, vector<24x8xf32> -> vector<24x8xf32>
    %c0_74 = arith.constant 0 : index
    %c1_75 = arith.constant 1 : index
    %c0_76 = arith.constant 0 : index
    %c0_77 = arith.constant 0 : index
    %101 = vector.load %arg11[%c0_74, %c1_75, %c0_76, %c0_77] : memref<1x4x8x32xbf16, #tpu.memory_space<vmem>>, vector<1x1x8x32xbf16>
    %102 = vector.shape_cast %101 : vector<1x1x8x32xbf16> to vector<8x32xbf16>
    %103 = arith.truncf %100 : vector<24x8xf32> to vector<24x8xbf16>
    %cst_78 = arith.constant dense<0.000000e+00> : vector<24x32xf32>
    %104 = tpu.matmul %103, %102, %cst_78 {dimension_numbers = #tpu.dot_dimension_numbers<[1], [0], [0], [1], [0, 0, 1, 1], [], []>} : vector<24x8xbf16>, vector<8x32xbf16>, vector<24x32xf32> -> vector<24x32xf32>
    %105 = arith.addf %59, %104 : vector<24x32xf32>
    %c0_79 = arith.constant 0 : index
    %c2 = arith.constant 2 : index
    %c0_80 = arith.constant 0 : index
    %c0_81 = arith.constant 0 : index
    %106 = vector.load %arg5[%c0_79, %c2, %c0_80, %c0_81] : memref<1x4x32x8xbf16, #tpu.memory_space<vmem>>, vector<1x1x32x8xbf16>
    %107 = vector.shape_cast %106 : vector<1x1x32x8xbf16> to vector<32x8xbf16>
    %cst_82 = arith.constant dense<0.000000e+00> : vector<24x8xf32>
    %108 = tpu.matmul %4, %107, %cst_82 {dimension_numbers = #tpu.dot_dimension_numbers<[1], [0], [0], [1], [0, 0, 1, 1], [], []>} : vector<24x32xbf16>, vector<32x8xbf16>, vector<24x8xf32> -> vector<24x8xf32>
    %c0_83 = arith.constant 0 : index
    %c2_84 = arith.constant 2 : index
    %c0_85 = arith.constant 0 : index
    %c0_86 = arith.constant 0 : index
    %109 = vector.load %arg8[%c0_83, %c2_84, %c0_85, %c0_86] : memref<1x4x1x8xf32, #tpu.memory_space<vmem>>, vector<1x1x1x8xf32>
    %110 = vector.shape_cast %109 : vector<1x1x1x8xf32> to vector<1x8xf32>
    %111 = vector.broadcast %110 : vector<1x8xf32> to vector<24x8xf32>
    %112 = arith.addf %108, %111 : vector<24x8xf32>
    %c0_87 = arith.constant 0 : index
    %c2_88 = arith.constant 2 : index
    %c0_89 = arith.constant 0 : index
    %c0_90 = arith.constant 0 : index
    %113 = vector.load %arg6[%c0_87, %c2_88, %c0_89, %c0_90] : memref<1x4x32x8xbf16, #tpu.memory_space<vmem>>, vector<1x1x32x8xbf16>
    %114 = vector.shape_cast %113 : vector<1x1x32x8xbf16> to vector<32x8xbf16>
    %cst_91 = arith.constant dense<0.000000e+00> : vector<24x8xf32>
    %115 = tpu.matmul %4, %114, %cst_91 {dimension_numbers = #tpu.dot_dimension_numbers<[1], [0], [0], [1], [0, 0, 1, 1], [], []>} : vector<24x32xbf16>, vector<32x8xbf16>, vector<24x8xf32> -> vector<24x8xf32>
    %c0_92 = arith.constant 0 : index
    %c2_93 = arith.constant 2 : index
    %c0_94 = arith.constant 0 : index
    %c0_95 = arith.constant 0 : index
    %116 = vector.load %arg9[%c0_92, %c2_93, %c0_94, %c0_95] : memref<1x4x1x8xf32, #tpu.memory_space<vmem>>, vector<1x1x1x8xf32>
    %117 = vector.shape_cast %116 : vector<1x1x1x8xf32> to vector<1x8xf32>
    %118 = vector.broadcast %117 : vector<1x8xf32> to vector<24x8xf32>
    %119 = arith.addf %115, %118 : vector<24x8xf32>
    %c0_96 = arith.constant 0 : index
    %c2_97 = arith.constant 2 : index
    %c0_98 = arith.constant 0 : index
    %c0_99 = arith.constant 0 : index
    %120 = vector.load %arg7[%c0_96, %c2_97, %c0_98, %c0_99] : memref<1x4x32x8xbf16, #tpu.memory_space<vmem>>, vector<1x1x32x8xbf16>
    %121 = vector.shape_cast %120 : vector<1x1x32x8xbf16> to vector<32x8xbf16>
    %cst_100 = arith.constant dense<0.000000e+00> : vector<24x8xf32>
    %122 = tpu.matmul %4, %121, %cst_100 {dimension_numbers = #tpu.dot_dimension_numbers<[1], [0], [0], [1], [0, 0, 1, 1], [], []>} : vector<24x32xbf16>, vector<32x8xbf16>, vector<24x8xf32> -> vector<24x8xf32>
    %c0_101 = arith.constant 0 : index
    %c2_102 = arith.constant 2 : index
    %c0_103 = arith.constant 0 : index
    %c0_104 = arith.constant 0 : index
    %123 = vector.load %arg10[%c0_101, %c2_102, %c0_103, %c0_104] : memref<1x4x1x8xf32, #tpu.memory_space<vmem>>, vector<1x1x1x8xf32>
    %124 = vector.shape_cast %123 : vector<1x1x1x8xf32> to vector<1x8xf32>
    %125 = vector.broadcast %124 : vector<1x8xf32> to vector<24x8xf32>
    %126 = arith.addf %122, %125 : vector<24x8xf32>
    %127 = arith.truncf %112 : vector<24x8xf32> to vector<24x8xbf16>
    %128 = arith.truncf %119 : vector<24x8xf32> to vector<24x8xbf16>
    %cst_105 = arith.constant dense<0.000000e+00> : vector<24x24xf32>
    %129 = tpu.matmul %127, %128, %cst_105 {dimension_numbers = #tpu.dot_dimension_numbers<[1], [1], [0], [0], [0, 0, 1, 0], [], []>} : vector<24x8xbf16>, vector<24x8xbf16>, vector<24x24xf32> -> vector<24x24xf32>
    %cst_106 = arith.constant 0.353553385 : f32
    %130 = vector.broadcast %cst_106 : f32 to vector<24x24xf32>
    %131 = arith.mulf %129, %130 : vector<24x24xf32>
    %132 = vector.broadcast %10 : vector<1x24xf32> to vector<24x24xf32>
    %133 = arith.addf %131, %132 : vector<24x24xf32>
    %cst_107 = arith.constant dense<0xFF800000> : vector<24xf32>
    %134 = vector.multi_reduction <maximumf>, %133, %cst_107 [1] : vector<24x24xf32> to vector<24xf32>
    %135 = vector.shape_cast %134 : vector<24xf32> to vector<24x1xf32>
    %136 = vector.broadcast %135 : vector<24x1xf32> to vector<24x24xf32>
    %137 = arith.subf %133, %136 : vector<24x24xf32>
    %138 = math.exp %137 : vector<24x24xf32>
    %cst_108 = arith.constant dense<0.000000e+00> : vector<24xf32>
    %139 = vector.multi_reduction <add>, %138, %cst_108 [1] : vector<24x24xf32> to vector<24xf32>
    %140 = vector.shape_cast %139 : vector<24xf32> to vector<24x1xf32>
    %141 = tpu.reciprocal %140 {approx = true} : vector<24x1xf32> -> vector<24x1xf32>
    %142 = vector.broadcast %141 : vector<24x1xf32> to vector<24x24xf32>
    %143 = arith.mulf %138, %142 : vector<24x24xf32>
    %144 = arith.truncf %126 : vector<24x8xf32> to vector<24x8xbf16>
    %145 = arith.truncf %143 : vector<24x24xf32> to vector<24x24xbf16>
    %cst_109 = arith.constant dense<0.000000e+00> : vector<24x8xf32>
    %146 = tpu.matmul %145, %144, %cst_109 {dimension_numbers = #tpu.dot_dimension_numbers<[1], [0], [0], [1], [0, 0, 1, 1], [], []>} : vector<24x24xbf16>, vector<24x8xbf16>, vector<24x8xf32> -> vector<24x8xf32>
    %c0_110 = arith.constant 0 : index
    %c2_111 = arith.constant 2 : index
    %c0_112 = arith.constant 0 : index
    %c0_113 = arith.constant 0 : index
    %147 = vector.load %arg11[%c0_110, %c2_111, %c0_112, %c0_113] : memref<1x4x8x32xbf16, #tpu.memory_space<vmem>>, vector<1x1x8x32xbf16>
    %148 = vector.shape_cast %147 : vector<1x1x8x32xbf16> to vector<8x32xbf16>
    %149 = arith.truncf %146 : vector<24x8xf32> to vector<24x8xbf16>
    %cst_114 = arith.constant dense<0.000000e+00> : vector<24x32xf32>
    %150 = tpu.matmul %149, %148, %cst_114 {dimension_numbers = #tpu.dot_dimension_numbers<[1], [0], [0], [1], [0, 0, 1, 1], [], []>} : vector<24x8xbf16>, vector<8x32xbf16>, vector<24x32xf32> -> vector<24x32xf32>
    %151 = arith.addf %105, %150 : vector<24x32xf32>
    %c0_115 = arith.constant 0 : index
    %c3 = arith.constant 3 : index
    %c0_116 = arith.constant 0 : index
    %c0_117 = arith.constant 0 : index
    %152 = vector.load %arg5[%c0_115, %c3, %c0_116, %c0_117] : memref<1x4x32x8xbf16, #tpu.memory_space<vmem>>, vector<1x1x32x8xbf16>
    %153 = vector.shape_cast %152 : vector<1x1x32x8xbf16> to vector<32x8xbf16>
    %cst_118 = arith.constant dense<0.000000e+00> : vector<24x8xf32>
    %154 = tpu.matmul %4, %153, %cst_118 {dimension_numbers = #tpu.dot_dimension_numbers<[1], [0], [0], [1], [0, 0, 1, 1], [], []>} : vector<24x32xbf16>, vector<32x8xbf16>, vector<24x8xf32> -> vector<24x8xf32>
    %c0_119 = arith.constant 0 : index
    %c3_120 = arith.constant 3 : index
    %c0_121 = arith.constant 0 : index
    %c0_122 = arith.constant 0 : index
    %155 = vector.load %arg8[%c0_119, %c3_120, %c0_121, %c0_122] : memref<1x4x1x8xf32, #tpu.memory_space<vmem>>, vector<1x1x1x8xf32>
    %156 = vector.shape_cast %155 : vector<1x1x1x8xf32> to vector<1x8xf32>
    %157 = vector.broadcast %156 : vector<1x8xf32> to vector<24x8xf32>
    %158 = arith.addf %154, %157 : vector<24x8xf32>
    %c0_123 = arith.constant 0 : index
    %c3_124 = arith.constant 3 : index
    %c0_125 = arith.constant 0 : index
    %c0_126 = arith.constant 0 : index
    %159 = vector.load %arg6[%c0_123, %c3_124, %c0_125, %c0_126] : memref<1x4x32x8xbf16, #tpu.memory_space<vmem>>, vector<1x1x32x8xbf16>
    %160 = vector.shape_cast %159 : vector<1x1x32x8xbf16> to vector<32x8xbf16>
    %cst_127 = arith.constant dense<0.000000e+00> : vector<24x8xf32>
    %161 = tpu.matmul %4, %160, %cst_127 {dimension_numbers = #tpu.dot_dimension_numbers<[1], [0], [0], [1], [0, 0, 1, 1], [], []>} : vector<24x32xbf16>, vector<32x8xbf16>, vector<24x8xf32> -> vector<24x8xf32>
    %c0_128 = arith.constant 0 : index
    %c3_129 = arith.constant 3 : index
    %c0_130 = arith.constant 0 : index
    %c0_131 = arith.constant 0 : index
    %162 = vector.load %arg9[%c0_128, %c3_129, %c0_130, %c0_131] : memref<1x4x1x8xf32, #tpu.memory_space<vmem>>, vector<1x1x1x8xf32>
    %163 = vector.shape_cast %162 : vector<1x1x1x8xf32> to vector<1x8xf32>
    %164 = vector.broadcast %163 : vector<1x8xf32> to vector<24x8xf32>
    %165 = arith.addf %161, %164 : vector<24x8xf32>
    %c0_132 = arith.constant 0 : index
    %c3_133 = arith.constant 3 : index
    %c0_134 = arith.constant 0 : index
    %c0_135 = arith.constant 0 : index
    %166 = vector.load %arg7[%c0_132, %c3_133, %c0_134, %c0_135] : memref<1x4x32x8xbf16, #tpu.memory_space<vmem>>, vector<1x1x32x8xbf16>
    %167 = vector.shape_cast %166 : vector<1x1x32x8xbf16> to vector<32x8xbf16>
    %cst_136 = arith.constant dense<0.000000e+00> : vector<24x8xf32>
    %168 = tpu.matmul %4, %167, %cst_136 {dimension_numbers = #tpu.dot_dimension_numbers<[1], [0], [0], [1], [0, 0, 1, 1], [], []>} : vector<24x32xbf16>, vector<32x8xbf16>, vector<24x8xf32> -> vector<24x8xf32>
    %c0_137 = arith.constant 0 : index
    %c3_138 = arith.constant 3 : index
    %c0_139 = arith.constant 0 : index
    %c0_140 = arith.constant 0 : index
    %169 = vector.load %arg10[%c0_137, %c3_138, %c0_139, %c0_140] : memref<1x4x1x8xf32, #tpu.memory_space<vmem>>, vector<1x1x1x8xf32>
    %170 = vector.shape_cast %169 : vector<1x1x1x8xf32> to vector<1x8xf32>
    %171 = vector.broadcast %170 : vector<1x8xf32> to vector<24x8xf32>
    %172 = arith.addf %168, %171 : vector<24x8xf32>
    %173 = arith.truncf %158 : vector<24x8xf32> to vector<24x8xbf16>
    %174 = arith.truncf %165 : vector<24x8xf32> to vector<24x8xbf16>
    %cst_141 = arith.constant dense<0.000000e+00> : vector<24x24xf32>
    %175 = tpu.matmul %173, %174, %cst_141 {dimension_numbers = #tpu.dot_dimension_numbers<[1], [1], [0], [0], [0, 0, 1, 0], [], []>} : vector<24x8xbf16>, vector<24x8xbf16>, vector<24x24xf32> -> vector<24x24xf32>
    %cst_142 = arith.constant 0.353553385 : f32
    %176 = vector.broadcast %cst_142 : f32 to vector<24x24xf32>
    %177 = arith.mulf %175, %176 : vector<24x24xf32>
    %178 = vector.broadcast %10 : vector<1x24xf32> to vector<24x24xf32>
    %179 = arith.addf %177, %178 : vector<24x24xf32>
    %cst_143 = arith.constant dense<0xFF800000> : vector<24xf32>
    %180 = vector.multi_reduction <maximumf>, %179, %cst_143 [1] : vector<24x24xf32> to vector<24xf32>
    %181 = vector.shape_cast %180 : vector<24xf32> to vector<24x1xf32>
    %182 = vector.broadcast %181 : vector<24x1xf32> to vector<24x24xf32>
    %183 = arith.subf %179, %182 : vector<24x24xf32>
    %184 = math.exp %183 : vector<24x24xf32>
    %cst_144 = arith.constant dense<0.000000e+00> : vector<24xf32>
    %185 = vector.multi_reduction <add>, %184, %cst_144 [1] : vector<24x24xf32> to vector<24xf32>
    %186 = vector.shape_cast %185 : vector<24xf32> to vector<24x1xf32>
    %187 = tpu.reciprocal %186 {approx = true} : vector<24x1xf32> -> vector<24x1xf32>
    %188 = vector.broadcast %187 : vector<24x1xf32> to vector<24x24xf32>
    %189 = arith.mulf %184, %188 : vector<24x24xf32>
    %190 = arith.truncf %172 : vector<24x8xf32> to vector<24x8xbf16>
    %191 = arith.truncf %189 : vector<24x24xf32> to vector<24x24xbf16>
    %cst_145 = arith.constant dense<0.000000e+00> : vector<24x8xf32>
    %192 = tpu.matmul %191, %190, %cst_145 {dimension_numbers = #tpu.dot_dimension_numbers<[1], [0], [0], [1], [0, 0, 1, 1], [], []>} : vector<24x24xbf16>, vector<24x8xbf16>, vector<24x8xf32> -> vector<24x8xf32>
    %c0_146 = arith.constant 0 : index
    %c3_147 = arith.constant 3 : index
    %c0_148 = arith.constant 0 : index
    %c0_149 = arith.constant 0 : index
    %193 = vector.load %arg11[%c0_146, %c3_147, %c0_148, %c0_149] : memref<1x4x8x32xbf16, #tpu.memory_space<vmem>>, vector<1x1x8x32xbf16>
    %194 = vector.shape_cast %193 : vector<1x1x8x32xbf16> to vector<8x32xbf16>
    %195 = arith.truncf %192 : vector<24x8xf32> to vector<24x8xbf16>
    %cst_150 = arith.constant dense<0.000000e+00> : vector<24x32xf32>
    %196 = tpu.matmul %195, %194, %cst_150 {dimension_numbers = #tpu.dot_dimension_numbers<[1], [0], [0], [1], [0, 0, 1, 1], [], []>} : vector<24x8xbf16>, vector<8x32xbf16>, vector<24x32xf32> -> vector<24x32xf32>
    %197 = arith.addf %151, %196 : vector<24x32xf32>
    %198 = arith.addf %3, %197 : vector<24x32xf32>
    %c0_151 = arith.constant 0 : index
    %c0_152 = arith.constant 0 : index
    %c0_153 = arith.constant 0 : index
    %199 = vector.load %arg17[%c0_151, %c0_152, %c0_153] : memref<1x1x32xf32, #tpu.memory_space<vmem>>, vector<1x1x32xf32>
    %200 = vector.shape_cast %199 : vector<1x1x32xf32> to vector<1x32xf32>
    %c0_154 = arith.constant 0 : index
    %c0_155 = arith.constant 0 : index
    %c0_156 = arith.constant 0 : index
    %201 = vector.load %arg18[%c0_154, %c0_155, %c0_156] : memref<1x1x32xf32, #tpu.memory_space<vmem>>, vector<1x1x32xf32>
    %202 = vector.shape_cast %201 : vector<1x1x32xf32> to vector<1x32xf32>
    %cst_157 = arith.constant dense<0.000000e+00> : vector<24xf32>
    %203 = vector.multi_reduction <add>, %198, %cst_157 [1] : vector<24x32xf32> to vector<24xf32>
    %204 = vector.shape_cast %203 : vector<24xf32> to vector<24x1xf32>
    %cst_158 = arith.constant 3.200000e+01 : f32
    %205 = vector.broadcast %cst_158 : f32 to vector<24x1xf32>
    %206 = arith.divf %204, %205 : vector<24x1xf32>
    %207 = vector.broadcast %206 : vector<24x1xf32> to vector<24x32xf32>
    %208 = arith.subf %198, %207 : vector<24x32xf32>
    %209 = arith.mulf %208, %208 : vector<24x32xf32>
    %cst_159 = arith.constant dense<0.000000e+00> : vector<24xf32>
    %210 = vector.multi_reduction <add>, %209, %cst_159 [1] : vector<24x32xf32> to vector<24xf32>
    %211 = vector.shape_cast %210 : vector<24xf32> to vector<24x1xf32>
    %cst_160 = arith.constant 3.200000e+01 : f32
    %212 = vector.broadcast %cst_160 : f32 to vector<24x1xf32>
    %213 = arith.divf %211, %212 : vector<24x1xf32>
    %214 = vector.broadcast %206 : vector<24x1xf32> to vector<24x32xf32>
    %215 = arith.subf %198, %214 : vector<24x32xf32>
    %cst_161 = arith.constant 9.99999974E-6 : f32
    %216 = vector.broadcast %cst_161 : f32 to vector<24x1xf32>
    %217 = arith.addf %213, %216 : vector<24x1xf32>
    %218 = math.rsqrt %217 : vector<24x1xf32>
    %219 = vector.broadcast %218 : vector<24x1xf32> to vector<24x32xf32>
    %220 = arith.mulf %215, %219 : vector<24x32xf32>
    %221 = vector.broadcast %200 : vector<1x32xf32> to vector<24x32xf32>
    %222 = arith.mulf %220, %221 : vector<24x32xf32>
    %223 = vector.broadcast %202 : vector<1x32xf32> to vector<24x32xf32>
    %224 = arith.addf %222, %223 : vector<24x32xf32>
    %c0_162 = arith.constant 0 : index
    %c0_163 = arith.constant 0 : index
    %c0_164 = arith.constant 0 : index
    %225 = vector.load %arg13[%c0_162, %c0_163, %c0_164] : memref<1x32x64xbf16, #tpu.memory_space<vmem>>, vector<1x32x64xbf16>
    %226 = vector.shape_cast %225 : vector<1x32x64xbf16> to vector<32x64xbf16>
    %227 = arith.truncf %224 : vector<24x32xf32> to vector<24x32xbf16>
    %cst_165 = arith.constant dense<0.000000e+00> : vector<24x64xf32>
    %228 = tpu.matmul %227, %226, %cst_165 {dimension_numbers = #tpu.dot_dimension_numbers<[1], [0], [0], [1], [0, 0, 1, 1], [], []>} : vector<24x32xbf16>, vector<32x64xbf16>, vector<24x64xf32> -> vector<24x64xf32>
    %c0_166 = arith.constant 0 : index
    %c0_167 = arith.constant 0 : index
    %c0_168 = arith.constant 0 : index
    %229 = vector.load %arg14[%c0_166, %c0_167, %c0_168] : memref<1x1x64xf32, #tpu.memory_space<vmem>>, vector<1x1x64xf32>
    %230 = vector.shape_cast %229 : vector<1x1x64xf32> to vector<1x64xf32>
    %231 = vector.broadcast %230 : vector<1x64xf32> to vector<24x64xf32>
    %232 = arith.addf %228, %231 : vector<24x64xf32>
    %cst_169 = arith.constant 0.000000e+00 : f32
    %233 = vector.broadcast %cst_169 : f32 to vector<24x64xf32>
    %234 = arith.maximumf %232, %233 : vector<24x64xf32>
    %c0_170 = arith.constant 0 : index
    %c0_171 = arith.constant 0 : index
    %c0_172 = arith.constant 0 : index
    %235 = vector.load %arg15[%c0_170, %c0_171, %c0_172] : memref<1x64x32xbf16, #tpu.memory_space<vmem>>, vector<1x64x32xbf16>
    %236 = vector.shape_cast %235 : vector<1x64x32xbf16> to vector<64x32xbf16>
    %237 = arith.truncf %234 : vector<24x64xf32> to vector<24x64xbf16>
    %cst_173 = arith.constant dense<0.000000e+00> : vector<24x32xf32>
    %238 = tpu.matmul %237, %236, %cst_173 {dimension_numbers = #tpu.dot_dimension_numbers<[1], [0], [0], [1], [0, 0, 1, 1], [], []>} : vector<24x64xbf16>, vector<64x32xbf16>, vector<24x32xf32> -> vector<24x32xf32>
    %239 = arith.addf %224, %238 : vector<24x32xf32>
    %c0_174 = arith.constant 0 : index
    %c0_175 = arith.constant 0 : index
    %c0_176 = arith.constant 0 : index
    %240 = vector.load %arg16[%c0_174, %c0_175, %c0_176] : memref<1x1x32xf32, #tpu.memory_space<vmem>>, vector<1x1x32xf32>
    %241 = vector.shape_cast %240 : vector<1x1x32xf32> to vector<1x32xf32>
    %242 = vector.broadcast %241 : vector<1x32xf32> to vector<24x32xf32>
    %243 = arith.addf %239, %242 : vector<24x32xf32>
    %c0_177 = arith.constant 0 : index
    %c0_178 = arith.constant 0 : index
    %c0_179 = arith.constant 0 : index
    %244 = vector.load %arg19[%c0_177, %c0_178, %c0_179] : memref<1x1x32xf32, #tpu.memory_space<vmem>>, vector<1x1x32xf32>
    %245 = vector.shape_cast %244 : vector<1x1x32xf32> to vector<1x32xf32>
    %c0_180 = arith.constant 0 : index
    %c0_181 = arith.constant 0 : index
    %c0_182 = arith.constant 0 : index
    %246 = vector.load %arg20[%c0_180, %c0_181, %c0_182] : memref<1x1x32xf32, #tpu.memory_space<vmem>>, vector<1x1x32xf32>
    %247 = vector.shape_cast %246 : vector<1x1x32xf32> to vector<1x32xf32>
    %cst_183 = arith.constant dense<0.000000e+00> : vector<24xf32>
    %248 = vector.multi_reduction <add>, %243, %cst_183 [1] : vector<24x32xf32> to vector<24xf32>
    %249 = vector.shape_cast %248 : vector<24xf32> to vector<24x1xf32>
    %cst_184 = arith.constant 3.200000e+01 : f32
    %250 = vector.broadcast %cst_184 : f32 to vector<24x1xf32>
    %251 = arith.divf %249, %250 : vector<24x1xf32>
    %252 = vector.broadcast %251 : vector<24x1xf32> to vector<24x32xf32>
    %253 = arith.subf %243, %252 : vector<24x32xf32>
    %254 = arith.mulf %253, %253 : vector<24x32xf32>
    %cst_185 = arith.constant dense<0.000000e+00> : vector<24xf32>
    %255 = vector.multi_reduction <add>, %254, %cst_185 [1] : vector<24x32xf32> to vector<24xf32>
    %256 = vector.shape_cast %255 : vector<24xf32> to vector<24x1xf32>
    %cst_186 = arith.constant 3.200000e+01 : f32
    %257 = vector.broadcast %cst_186 : f32 to vector<24x1xf32>
    %258 = arith.divf %256, %257 : vector<24x1xf32>
    %259 = vector.broadcast %251 : vector<24x1xf32> to vector<24x32xf32>
    %260 = arith.subf %243, %259 : vector<24x32xf32>
    %cst_187 = arith.constant 9.99999974E-6 : f32
    %261 = vector.broadcast %cst_187 : f32 to vector<24x1xf32>
    %262 = arith.addf %258, %261 : vector<24x1xf32>
    %263 = math.rsqrt %262 : vector<24x1xf32>
    %264 = vector.broadcast %263 : vector<24x1xf32> to vector<24x32xf32>
    %265 = arith.mulf %260, %264 : vector<24x32xf32>
    %266 = vector.broadcast %245 : vector<1x32xf32> to vector<24x32xf32>
    %267 = arith.mulf %265, %266 : vector<24x32xf32>
    %268 = vector.broadcast %247 : vector<1x32xf32> to vector<24x32xf32>
    %269 = arith.addf %267, %268 : vector<24x32xf32>
    %c0_188 = arith.constant 0 : index
    %c0_189 = arith.constant 0 : index
    %270 = vector.load %arg26[%c0_188, %c0_189] : memref<24x32xf32, #tpu.memory_space<vmem>>, vector<24x32xf32>
    tpu.vector_store %arg26[%c0_188, %c0_189], %269 {strides = array<i32>} : memref<24x32xf32, #tpu.memory_space<vmem>>, vector<24x32xf32>,
    %c1_i32 = arith.constant 1 : i32
    %271 = arith.cmpi eq, %arg1, %c1_i32 : i32
    %272 = arith.extui %271 : i1 to i32
    %c0_i32_190 = arith.constant 0 : i32
    %273 = arith.cmpi ne, %272, %c0_i32_190 : i32
    scf.if %273 {
      %274 = vector.extract_strided_slice %269 {offsets = [0, 0], sizes = [16, 32], strides = [1, 1]} : vector<24x32xf32> to vector<16x32xf32>
      %c0_191 = arith.constant 0 : index
      %c0_192 = arith.constant 0 : index
      %275 = vector.load %arg21[%c0_191, %c0_192] : memref<32x512xbf16, #tpu.memory_space<vmem>>, vector<32x512xbf16>
      %276 = arith.truncf %274 : vector<16x32xf32> to vector<16x32xbf16>
      %cst_193 = arith.constant dense<0.000000e+00> : vector<16x512xf32>
      %277 = tpu.matmul %276, %275, %cst_193 {dimension_numbers = #tpu.dot_dimension_numbers<[1], [0], [0], [1], [0, 0, 1, 1], [], []>} : vector<16x32xbf16>, vector<32x512xbf16>, vector<16x512xf32> -> vector<16x512xf32>
      %c0_194 = arith.constant 0 : index
      %c0_195 = arith.constant 0 : index
      %278 = vector.load %arg22[%c0_194, %c0_195] : memref<1x512xf32, #tpu.memory_space<vmem>>, vector<1x512xf32>
      %279 = vector.broadcast %278 : vector<1x512xf32> to vector<16x512xf32>
      %280 = arith.addf %277, %279 : vector<16x512xf32>
      %cst_196 = arith.constant 0.000000e+00 : f32
      %281 = vector.broadcast %cst_196 : f32 to vector<16x512xf32>
      %282 = arith.maximumf %280, %281 : vector<16x512xf32>
      %c0_197 = arith.constant 0 : index
      %c0_198 = arith.constant 0 : index
      %283 = vector.load %arg23[%c0_197, %c0_198] : memref<512x128xbf16, #tpu.memory_space<vmem>>, vector<512x128xbf16>
      %284 = arith.truncf %282 : vector<16x512xf32> to vector<16x512xbf16>
      %cst_199 = arith.constant dense<0.000000e+00> : vector<16x128xf32>
      %285 = tpu.matmul %284, %283, %cst_199 {dimension_numbers = #tpu.dot_dimension_numbers<[1], [0], [0], [1], [0, 0, 1, 1], [], []>} : vector<16x512xbf16>, vector<512x128xbf16>, vector<16x128xf32> -> vector<16x128xf32>
      %c0_200 = arith.constant 0 : index
      %c0_201 = arith.constant 0 : index
      %286 = vector.load %arg24[%c0_200, %c0_201] : memref<1x128xf32, #tpu.memory_space<vmem>>, vector<1x128xf32>
      %287 = vector.broadcast %286 : vector<1x128xf32> to vector<16x128xf32>
      %288 = arith.addf %285, %287 : vector<16x128xf32>
      %c0_202 = arith.constant 0 : index
      %c0_203 = arith.constant 0 : index
      %c0_204 = arith.constant 0 : index
      %289 = vector.load %arg25[%c0_202, %c0_203, %c0_204] : memref<1x16x128xf32, #tpu.memory_space<vmem>>, vector<1x16x128xf32>
      %290 = vector.shape_cast %289 : vector<1x16x128xf32> to vector<16x128xf32>
      %291 = vector.shape_cast %288 : vector<16x128xf32> to vector<1x16x128xf32>
      tpu.vector_store %arg25[%c0_202, %c0_203, %c0_204], %291 {strides = array<i32>} : memref<1x16x128xf32, #tpu.memory_space<vmem>>, vector<1x16x128xf32>,
    } else {
    }
    return
  }
  func.func @transform_0(%arg0: i32, %arg1: i32) -> (i32, i32, i32) {
    %c0_i32 = arith.constant 0 : i32
    %c0_i32_0 = arith.constant 0 : i32
    %c0_i32_1 = arith.constant 0 : i32
    return %arg0, %c0_i32, %c0_i32_0 : i32, i32, i32
  }
  func.func @transform_1(%arg0: i32, %arg1: i32) -> (i32, i32) {
    %c0_i32 = arith.constant 0 : i32
    %c0_i32_0 = arith.constant 0 : i32
    %c0_i32_1 = arith.constant 0 : i32
    return %c0_i32, %c0_i32_0 : i32, i32
  }
  func.func @transform_2(%arg0: i32, %arg1: i32) -> (i32, i32) {
    %c0_i32 = arith.constant 0 : i32
    %c0_i32_0 = arith.constant 0 : i32
    %c0_i32_1 = arith.constant 0 : i32
    return %c0_i32, %c0_i32_0 : i32, i32
  }
  func.func @transform_3(%arg0: i32, %arg1: i32) -> (i32, i32, i32, i32) {
    %c0_i32 = arith.constant 0 : i32
    %c0_i32_0 = arith.constant 0 : i32
    %c0_i32_1 = arith.constant 0 : i32
    %c0_i32_2 = arith.constant 0 : i32
    return %arg1, %c0_i32, %c0_i32_0, %c0_i32_1 : i32, i32, i32, i32
  }
  func.func @transform_4(%arg0: i32, %arg1: i32) -> (i32, i32, i32, i32) {
    %c0_i32 = arith.constant 0 : i32
    %c0_i32_0 = arith.constant 0 : i32
    %c0_i32_1 = arith.constant 0 : i32
    %c0_i32_2 = arith.constant 0 : i32
    return %arg1, %c0_i32, %c0_i32_0, %c0_i32_1 : i32, i32, i32, i32
  }
  func.func @transform_5(%arg0: i32, %arg1: i32) -> (i32, i32, i32, i32) {
    %c0_i32 = arith.constant 0 : i32
    %c0_i32_0 = arith.constant 0 : i32
    %c0_i32_1 = arith.constant 0 : i32
    %c0_i32_2 = arith.constant 0 : i32
    return %arg1, %c0_i32, %c0_i32_0, %c0_i32_1 : i32, i32, i32, i32
  }
  func.func @transform_6(%arg0: i32, %arg1: i32) -> (i32, i32, i32, i32) {
    %c0_i32 = arith.constant 0 : i32
    %c0_i32_0 = arith.constant 0 : i32
    %c0_i32_1 = arith.constant 0 : i32
    %c0_i32_2 = arith.constant 0 : i32
    return %arg1, %c0_i32, %c0_i32_0, %c0_i32_1 : i32, i32, i32, i32
  }
  func.func @transform_7(%arg0: i32, %arg1: i32) -> (i32, i32, i32, i32) {
    %c0_i32 = arith.constant 0 : i32
    %c0_i32_0 = arith.constant 0 : i32
    %c0_i32_1 = arith.constant 0 : i32
    %c0_i32_2 = arith.constant 0 : i32
    return %arg1, %c0_i32, %c0_i32_0, %c0_i32_1 : i32, i32, i32, i32
  }
  func.func @transform_8(%arg0: i32, %arg1: i32) -> (i32, i32, i32, i32) {
    %c0_i32 = arith.constant 0 : i32
    %c0_i32_0 = arith.constant 0 : i32
    %c0_i32_1 = arith.constant 0 : i32
    %c0_i32_2 = arith.constant 0 : i32
    return %arg1, %c0_i32, %c0_i32_0, %c0_i32_1 : i32, i32, i32, i32
  }
  func.func @transform_9(%arg0: i32, %arg1: i32) -> (i32, i32, i32, i32) {
    %c0_i32 = arith.constant 0 : i32
    %c0_i32_0 = arith.constant 0 : i32
    %c0_i32_1 = arith.constant 0 : i32
    %c0_i32_2 = arith.constant 0 : i32
    return %arg1, %c0_i32, %c0_i32_0, %c0_i32_1 : i32, i32, i32, i32
  }
  func.func @transform_10(%arg0: i32, %arg1: i32) -> (i32, i32, i32) {
    %c0_i32 = arith.constant 0 : i32
    %c0_i32_0 = arith.constant 0 : i32
    %c0_i32_1 = arith.constant 0 : i32
    return %arg1, %c0_i32, %c0_i32_0 : i32, i32, i32
  }
  func.func @transform_11(%arg0: i32, %arg1: i32) -> (i32, i32, i32) {
    %c0_i32 = arith.constant 0 : i32
    %c0_i32_0 = arith.constant 0 : i32
    %c0_i32_1 = arith.constant 0 : i32
    return %arg1, %c0_i32, %c0_i32_0 : i32, i32, i32
  }
  func.func @transform_12(%arg0: i32, %arg1: i32) -> (i32, i32, i32) {
    %c0_i32 = arith.constant 0 : i32
    %c0_i32_0 = arith.constant 0 : i32
    %c0_i32_1 = arith.constant 0 : i32
    return %arg1, %c0_i32, %c0_i32_0 : i32, i32, i32
  }
  func.func @transform_13(%arg0: i32, %arg1: i32) -> (i32, i32, i32) {
    %c0_i32 = arith.constant 0 : i32
    %c0_i32_0 = arith.constant 0 : i32
    %c0_i32_1 = arith.constant 0 : i32
    return %arg1, %c0_i32, %c0_i32_0 : i32, i32, i32
  }
  func.func @transform_14(%arg0: i32, %arg1: i32) -> (i32, i32, i32) {
    %c0_i32 = arith.constant 0 : i32
    %c0_i32_0 = arith.constant 0 : i32
    %c0_i32_1 = arith.constant 0 : i32
    return %arg1, %c0_i32, %c0_i32_0 : i32, i32, i32
  }
  func.func @transform_15(%arg0: i32, %arg1: i32) -> (i32, i32, i32) {
    %c0_i32 = arith.constant 0 : i32
    %c0_i32_0 = arith.constant 0 : i32
    %c0_i32_1 = arith.constant 0 : i32
    return %arg1, %c0_i32, %c0_i32_0 : i32, i32, i32
  }
  func.func @transform_16(%arg0: i32, %arg1: i32) -> (i32, i32, i32) {
    %c0_i32 = arith.constant 0 : i32
    %c0_i32_0 = arith.constant 0 : i32
    %c0_i32_1 = arith.constant 0 : i32
    return %arg1, %c0_i32, %c0_i32_0 : i32, i32, i32
  }
  func.func @transform_17(%arg0: i32, %arg1: i32) -> (i32, i32, i32) {
    %c0_i32 = arith.constant 0 : i32
    %c0_i32_0 = arith.constant 0 : i32
    %c0_i32_1 = arith.constant 0 : i32
    return %arg1, %c0_i32, %c0_i32_0 : i32, i32, i32
  }
  func.func @transform_18(%arg0: i32, %arg1: i32) -> (i32, i32, i32) {
    %c0_i32 = arith.constant 0 : i32
    %c0_i32_0 = arith.constant 0 : i32
    %c0_i32_1 = arith.constant 0 : i32
    return %arg1, %c0_i32, %c0_i32_0 : i32, i32, i32
  }
  func.func @transform_19(%arg0: i32, %arg1: i32) -> (i32, i32) {
    %c0_i32 = arith.constant 0 : i32
    %c0_i32_0 = arith.constant 0 : i32
    %c0_i32_1 = arith.constant 0 : i32
    return %c0_i32, %c0_i32_0 : i32, i32
  }
  func.func @transform_20(%arg0: i32, %arg1: i32) -> (i32, i32) {
    %c0_i32 = arith.constant 0 : i32
    %c0_i32_0 = arith.constant 0 : i32
    %c0_i32_1 = arith.constant 0 : i32
    return %c0_i32, %c0_i32_0 : i32, i32
  }
  func.func @transform_21(%arg0: i32, %arg1: i32) -> (i32, i32) {
    %c0_i32 = arith.constant 0 : i32
    %c0_i32_0 = arith.constant 0 : i32
    %c0_i32_1 = arith.constant 0 : i32
    return %c0_i32, %c0_i32_0 : i32, i32
  }
  func.func @transform_22(%arg0: i32, %arg1: i32) -> (i32, i32) {
    %c0_i32 = arith.constant 0 : i32
    %c0_i32_0 = arith.constant 0 : i32
    %c0_i32_1 = arith.constant 0 : i32
    return %c0_i32, %c0_i32_0 : i32, i32
  }
  func.func @transform_23(%arg0: i32, %arg1: i32) -> (i32, i32, i32) {
    %c0_i32 = arith.constant 0 : i32
    %c0_i32_0 = arith.constant 0 : i32
    %c0_i32_1 = arith.constant 0 : i32
    return %arg0, %c0_i32, %c0_i32_0 : i32, i32, i32
  }
}

</mosaic_0001>

<bundles_post_ra>
// kernel: vit_segmentation_forward.3
= control target key start
LH: loop header
LB: loop body
LE: loop exit
PB: predicated region body
PF: predicated region fallthrough
CT: control target
= control target key end

     0   :  { %8 = vsyncpa [#allocation3], 0  ;;  %s726_s0 = inlined_call_operand.vmem [shape: f32[32,8], index: 0, kind: input, shape index: {}]   ;;  %s727_s1 = inlined_call_operand.vmem [shape: f32[8,32], index: 1, kind: input, shape index: {}]   ;;  %s728_s2 = inlined_call_operand.vmem [shape: f32[6,8,8], index: 2, kind: input, shape index: {}]   ;;  %s729_s3 = inlined_call_operand.hbm [shape: f32[6,32,32], index: 3, kind: output, shape index: {}]  }
   0x1   :  { %10 = vsyncpa [#allocation3 + $0x1], 0  ;;  %s596_s12 = smov 0   ;;  %s598_s13 = smov 0  }
   0x2   :  { %s600_s14 = smov 0   ;;  %s602_s15 = smov 0  }
   0x3 LB: > { %s617_s16 = sadd.s32 4294967295, %s572_s15   ;;  %s441_s17 = sadd.s32 4294967294, %s572_s15   ;;  %s572_s15 = sphi %s602_s15, %s735_s15   ;;  %s568_s14 = sphi %s600_s14, %s734_s14   ;;  %s564_s13 = sphi %s598_s13, %s733_s13   ;;  %s560_s12 = sphi %s596_s12, %s732_s12  }
   0x4   : > { %s621_s18 = sadd.s32 1, %s572_s15   ;;  %s91_s19 = sadd.s32 1, %s568_s14 }
   0x5   : > { %s88_s20 = ssub.s32 %s572_s15, %s621_s18  ;;  %p101_p0 = scmp.ne.s32.totalorder %s568_s14, %s564_s13 }
   0x6   : > { %p89_p1 = scmp.eq.s32.totalorder %s88_s20, 0  ;;  %p102_p2 = scmp.eq.s32.totalorder %s617_s16, 1 }
   0x7   : > { %p107_p3 = scmp.ne.s32.totalorder %s564_s13, %s560_s12  ;;  %p108_p4 = scmp.eq.s32.totalorder %s441_s17, 1 }
   0x8   : > { %s632_s21 = scalar_select %p89_p1, %s568_s14, %s91_s19  }
   0x9   : > { %p634_p5 = por %p102_p2, %p101_p0  ;;  %p638_p6 = por %p108_p4, %p107_p3 }
   0xa   : > { %p444_p7 = scmp.ge.s32.totalorder %s572_s15, 1  ;;  %p141_p8 = scmp.lt.s32.totalorder %s572_s15, 3 }
   0xc   : > { %p142_p9 = pnand %p444_p7, %p141_p8 }
   0xd   : > { %s165_s26 = smul.u32 (!%p142_p9), 3, %s617_s16  ;;  %s162_s17 = sand.u32 (!%p142_p9), 1, %s564_s13  }
   0xe   : > { %145 = sbr.rel (%p142_p9) target bundleno = 326 (0x146), region = 32  ;;  %s530_s7 = scalar_lea.hbm (!%p142_p9), %s729_s3, 192 }
   0xf   : > { %p166_p10 = scmp.lt.s32.totalorder (!%p142_p9), %s165_s26, 5  ;;  %s468_s19 = smul.u32 (!%p142_p9), 96, %s162_s17 }
  0x10   : > { %s467_s24 = smul.u32 (!%p142_p9), 96, %s617_s16  ;;  %s363_s16 = scalar_lea.sflag (!%p142_p9), [#allocation3], %s162_s17 }
  0x11   : > { %s164_s20 = scalar_lea.vmem (!%p142_p9), [#allocation2], %s468_s19 }
  0x12   : > { %s376_s28 = sshll.u32 (!%p142_p9), %s164_s20, 4  ;;  %s377_s28 = int_to_ptr.vmem [resolvable:$true] %s376_s28 }
  0x13   : > { %v172_v0 = vld [vmem:[%s727_s1] sm:$0xff]  ;;  %s737_s26 = smov (!%p166_p10, %s165_s26), 5  ;;  %vm176_vm0 = vcmask 64512   ;;  %v247_v6 = vld [vmem:[%s726_s0 + $0x8] sm:$0xff]  ;;  %v248_v9 = vld [vmem:[%s726_s0 + $0x10] sm:$0xff]  ;;  %vm349_vm1 = vcmask 261120  }
  0x14   : > { %195 = vmatpush.msra.mxu2 %v172_v0  ;;  %s445_s27 = sshll.u32 %s737_s26, 3  ;;  %v246_v4 = vld [vmem:[%s726_s0] sm:$0xff]  ;;  %v249_v10 = vld [vmem:[%s726_s0 + $0x18] sm:$0xff] }
  0x15   : > { %s169_s30 = scalar_lea.vmem %s728_s2, %s445_s27  ;;  %s375_s27 = scalar_lea.hbm %s729_s3, %s467_s24 }
  0x16   : > { %218 = vmatpush.msrb.mxu2 %v172_v0  ;;  %v173_v1 = vld [vmem:[%s169_s30] sm:$0xff]  ;;  %v174_v2 = vld [vmem:[%s169_s30 + $0x8] sm:$0xff]  ;;  %v175_v3 = vld [vmem:[%s169_s30 + $0x10] sm:$0xff]  ;;  %s378_s29 = sshll.u32 %s375_s27, 4  ;;  %s379_s29 = int_to_ptr.hbm [resolvable:$true] %s378_s29 }
  0x17   : > { %446 = vmatmul.msk.f32.vlgmr.msra.gmra.mxu2 %vm176_vm0, %v173_v1  ;;  %s524_s30 = sshra.s32 %s379_s29, 4  ;;  %s525_s30 = int_to_ptr.hbm [resolvable:$true] %s524_s30 }
  0x18   : > { %241 = vmatpush.msra.mxu2 %v172_v0  ;;  %s526_s4 = scalar_lea.hbm %s525_s30, 96  ;;  %p531_p0 = scmp.lt.s32.totalorder %s525_s30, %s729_s3 }
  0x19   : > { %p527_p11 = scmp.ne.s32.totalorder %s525_s30, %s526_s4  ;;  %p532_p1 = scmp.lt.s32.totalorder %s530_s7, %s526_s4 }
  0x1b   : > { %p528_p12 = pnand %p527_p11, %p634_p5  ;;  %p533_p2 = por %p532_p1, %p531_p0 }
  0x1d   : > { %p529_p13 = pneg %p528_p12 }
  0x1f   : > { %447 = vmatmul.msk.f32.vlgmr.msrb.gmra.mxu2 %vm176_vm0, %v174_v2  ;;  %p534_p3 = pnand %p533_p2, %p529_p13 }
  0x27   : > { %448 = vmatmul.msk.f32.vlgmr.msra.gmra.mxu2 %vm176_vm0, %v175_v3 }
  0x9a   : > { %v197_v5 = vpop.f32.mrf.mxu2 }
  0x9b   : > { %277 = vmatpush.msra.mxu3 %v197_v5 }
  0x9c   : > { %449 = vmatmul.msk.f32.vlgmr.msra.gmra.mxu3 %vm176_vm0, %v246_v4 }
  0xa2   : > { %v220_v7 = vpop.f32.mrf.mxu2 }
  0xa3   : > { %306 = vmatpush.msra.mxu0 %v220_v7 }
  0xa4   : > { %453 = vmatmul.msk.f32.vlgmr.msra.gmra.mxu0 %vm176_vm0, %v246_v4  ;;  %450 = vmatmul.msk.f32.gmra.mxu3 %vm176_vm0, %v247_v6 }
  0xaa   : > { %v243_v8 = vpop.f32.mrf.mxu2 }
  0xab   : > { %335 = vmatpush.msra.mxu1 %v243_v8 }
  0xac   : > { %457 = vmatmul.msk.f32.vlgmr.msra.gmra.mxu1 %vm176_vm0, %v246_v4  ;;  %454 = vmatmul.msk.f32.gmra.mxu0 %vm176_vm0, %v247_v6 }
  0xad   : > { %451 = vmatmul.msk.f32.gmra.mxu3 %vm176_vm0, %v248_v9 }
  0xb4   : > { %458 = vmatmul.msk.f32.gmra.mxu1 %vm176_vm0, %v247_v6  ;;  %455 = vmatmul.msk.f32.gmra.mxu0 %vm176_vm0, %v248_v9 }
  0xb5   : > { %452 = vmatmul.msk.f32.gmra.mxu3 %vm176_vm0, %v249_v10 }
  0xbc   : > { %459 = vmatmul.msk.f32.gmra.mxu1 %vm176_vm0, %v248_v9  ;;  %456 = vmatmul.msk.f32.gmra.mxu0 %vm176_vm0, %v249_v10 }
  0xc4   : > { %460 = vmatmul.msk.f32.gmra.mxu1 %vm176_vm0, %v249_v10 }
 0x11f   : > { %v279_v11 = vpop.f32.mrf.mxu3 }
 0x120   : > { %350 = vst.msk [vmem:[%s164_s20] sm:$0xff] %vm349_vm1, %v279_v11 }
 0x121   : > { %v308_v12 = vpop.f32.mrf.mxu0 }
 0x122   : > { %354 = vst.msk [vmem:[%s164_s20 + $0x20] sm:$0xff] %vm349_vm1, %v308_v12 }
 0x127   : > { %v282_v13 = vpop.f32.mrf.mxu3 }
 0x128   : > { %351 = vst.msk [vmem:[%s164_s20 + $0x8] sm:$0xff] %vm349_vm1, %v282_v13 }
 0x129   : > { %v337_v14 = vpop.f32.mrf.mxu1  ;;  %v311_v15 = vpop.f32.mrf.mxu0 }
 0x12a   : > { %358 = vst.msk [vmem:[%s164_s20 + $0x40] sm:$0xff] %vm349_vm1, %v337_v14 }
 0x12b   : > { %355 = vst.msk [vmem:[%s164_s20 + $0x28] sm:$0xff] %vm349_vm1, %v311_v15 }
 0x130   : > { %v285_v16 = vpop.f32.mrf.mxu3 }
 0x131   : > { %v340_v17 = vpop.f32.mrf.mxu1  ;;  %352 = vst.msk [vmem:[%s164_s20 + $0x10] sm:$0xff] %vm349_vm1, %v285_v16  ;;  %v314_v18 = vpop.f32.mrf.mxu0 }
 0x132   : > { %359 = vst.msk [vmem:[%s164_s20 + $0x48] sm:$0xff] %vm349_vm1, %v340_v17 }
 0x133   : > { %356 = vst.msk [vmem:[%s164_s20 + $0x30] sm:$0xff] %vm349_vm1, %v314_v18 }
 0x138   : > { %v288_v19 = vpop.f32.mrf.mxu3 }
 0x139   : > { %v343_v20 = vpop.f32.mrf.mxu1  ;;  %353 = vst.msk [vmem:[%s164_s20 + $0x18] sm:$0xff] %vm349_vm1, %v288_v19  ;;  %v317_v21 = vpop.f32.mrf.mxu0 }
 0x13a   : > { %360 = vst.msk [vmem:[%s164_s20 + $0x50] sm:$0xff] %vm349_vm1, %v343_v20 }
 0x13b   : > { %357 = vst.msk [vmem:[%s164_s20 + $0x38] sm:$0xff] %vm349_vm1, %v317_v21 }
 0x141   : > { %v346_v22 = vpop.f32.mrf.mxu1 }
 0x142   : > { %361 = vst.msk [vmem:[%s164_s20 + $0x58] sm:$0xff] %vm349_vm1, %v346_v22 }
 0x143   : > { %537 = shalt.err (!%p534_p3)
}
 0x144   : > { %s574_s10 = smov 128   ;;  %s575_s11 = smov 8  }
 0x145   : > { %469 = dma.vmem_to_hbm [thread:$0]  (%p634_p5), %s377_s28, 1536, %s379_s29, %s363_s16, %s574_s10, %s574_s10, %s575_s11  }
 0x146 PF: > { %p475_p4 = scmp.ge.s32.totalorder %s572_s15, 2  ;;  %s393_s17 = sand.u32 1, %s560_s12  }
 0x147   : > { %s394_s19 = scalar_lea.sflag [#allocation3], %s393_s17 }
 0x148   : > { %p472_p7 = pnand %p475_p4, %p638_p6 }
 0x14a   : > { %p473_p8 = pneg %p472_p7 }
 0x14c   : > { %555 = dma.done.wait (%p473_p8), %s394_s19, 1536  }
 0x14d   : > { %557 = vsyncadd (%p473_p8), %s394_s19, 4294965760  ;;  %p13_p9 = scmp.ge.s32.totalorder %s621_s18, 4   ;;  %s732_s12 = smov %s564_s13 }
 0x14e   : > { %s733_s13 = smov %s568_s14  ;;  %s734_s14 = smov %s632_s21 }
 0x14f   : > { %s735_s15 = smov %s621_s18  ;;  %15 = sbr.rel (!%p13_p9) target bundleno = 3 (0x3), region = 67 }
 0x154   :  { %400 = vsyncpa [#allocation3], 1 }
 0x155   :  { %402 = vsyncpa [#allocation3 + $0x1], 1 }

// kernel: vit_segmentation_forward.2
= control target key start
LH: loop header
LB: loop body
LE: loop exit
PB: predicated region body
PF: predicated region fallthrough
CT: control target
= control target key end

     0   :  { %s4012_s30 = smov 0   ;;  %s4014_s24 = smov 0   ;;  %s4629_s0 = inlined_call_operand.vmem [shape: f32[2,16,192], index: 0, kind: input, shape index: {}]   ;;  %s4630_s1 = inlined_call_operand.vmem [shape: bf16[192,32], index: 1, kind: input, shape index: {}]   ;;  %s4631_s2 = inlined_call_operand.vmem [shape: f32[24,32], index: 2, kind: input, shape index: {}]   ;;  %s4632_s3 = inlined_call_operand.vmem [shape: bf16[2,4,32,8], index: 3, kind: input, shape index: {}]   ;;  %s4633_s4 = inlined_call_operand.vmem [shape: bf16[2,4,32,8], index: 4, kind: input, shape index: {}]   ;;  %s4634_s5 = inlined_call_operand.vmem [shape: bf16[2,4,32,8], index: 5, kind: input, shape index: {}]   ;;  %s4635_s6 = inlined_call_operand.vmem [shape: f32[2,4,1,8], index: 6, kind: input, shape index: {}]   ;;  %s4636_s7 = inlined_call_operand.vmem [shape: f32[2,4,1,8], index: 7, kind: input, shape index: {}]   ;;  %s4637_s8 = inlined_call_operand.vmem [shape: f32[2,4,1,8], index: 8, kind: input, shape index: {}]   ;;  %s4638_s9 = inlined_call_operand.vmem [shape: bf16[2,4,8,32], index: 9, kind: input, shape index: {}]   ;;  %s4639_s10 = inlined_call_operand.vmem [shape: f32[2,1,32], index: 10, kind: input, shape index: {}]   ;;  %s4640_s11 = inlined_call_operand.vmem [shape: bf16[2,32,64], index: 11, kind: input, shape index: {}]   ;;  %s4641_s12 = inlined_call_operand.vmem [shape: f32[2,1,64], index: 12, kind: input, shape index: {}]   ;;  %s4642_s13 = inlined_call_operand.vmem [shape: bf16[2,64,32], index: 13, kind: input, shape index: {}]   ;;  %s4643_s14 = inlined_call_operand.vmem [shape: f32[2,1,32], index: 14, kind: input, shape index: {}]   ;;  %s4644_s15 = inlined_call_operand.vmem [shape: f32[2,1,32], index: 15, kind: input, shape index: {}]   ;;  %s4645_s16 = inlined_call_operand.vmem [shape: f32[2,1,32], index: 16, kind: input, shape index: {}]   ;;  %s4646_s17 = inlined_call_operand.vmem [shape: f32[2,1,32], index: 17, kind: input, shape index: {}]   ;;  %s4647_s18 = inlined_call_operand.vmem [shape: f32[2,1,32], index: 18, kind: input, shape index: {}]   ;;  %s4648_s19 = inlined_call_operand.vmem [shape: bf16[32,512], index: 19, kind: input, shape index: {}]   ;;  %s4649_s20 = inlined_call_operand.vmem [shape: f32[1,512], index: 20, kind: input, shape index: {}]   ;;  %s4650_s21 = inlined_call_operand.vmem [shape: bf16[512,128], index: 21, kind: input, shape index: {}]   ;;  %s4651_s22 = inlined_call_operand.vmem [shape: f32[1,128], index: 22, kind: input, shape index: {}]   ;;  %s4652_s23 = inlined_call_operand.vmem [shape: f32[2,16,128], index: 23, kind: output, shape index: {}]  }
   0x1   :  { %4667 = sst [smem:[#allocation15_spill]] %s4629_s0  ;;  %s4016_s25 = smov 0  }
   0x2   :  { %4668 = sst [smem:[#allocation16_spill]] %s4630_s1 }
   0x3   :  { %4669 = sst [smem:[#allocation17_spill]] %s4631_s2 }
   0x4   :  { %4670 = sst [smem:[#allocation18_spill]] %s4632_s3 }
   0x5   :  { %4671 = sst [smem:[#allocation19_spill]] %s4633_s4  ;;  %s4010_s4 = smov 0  }
   0x6   :  { %4672 = sst [smem:[#allocation20_spill]] %s4634_s5  ;;  %s4018_s5 = smov 0  }
   0x7   :  { %4673 = sst [smem:[#allocation21_spill]] %s4635_s6 }
   0x8   :  { %4674 = sst [smem:[#allocation22_spill]] %s4636_s7 }
   0x9   :  { %4675 = sst [smem:[#allocation23_spill]] %s4637_s8 }
   0xa   :  { %4676 = sst [smem:[#allocation24_spill]] %s4638_s9 }
   0xb   :  { %4677 = sst [smem:[#allocation25_spill]] %s4640_s11 }
   0xc   :  { %4678 = sst [smem:[#allocation26_spill]] %s4648_s19 }
   0xd   :  { %4679 = sst [smem:[#allocation27_spill]] %s4649_s20 }
   0xe   :  { %4680 = sst [smem:[#allocation28_spill]] %s4650_s21 }
   0xf   :  { %4681 = sst [smem:[#allocation29_spill]] %s4651_s22 }
  0x10 LB: > { %4682 = sst [smem:[#allocation3_spill]] %s3870_s4  ;;  %s42_s1 = sadd.s32 1, %s3878_s24  ;;  %s3886_s5 = sphi %s4018_s5, %s33_s5   ;;  %s3882_s25 = sphi %s4016_s25, %s4725_s25   ;;  %s3878_s24 = sphi %s4014_s24, %s4724_s24   ;;  %s3874_s30 = sphi %s4012_s30, %s4723_s30   ;;  %s3870_s4 = sphi %s4010_s4, %s4722_s4  }
  0x11   : > { %4683 = sst [smem:[#allocation4_spill]] %s3878_s24  ;;  %s45_s26 = sadd.s32 1, %s3882_s25 }
  0x12   : > { %4684 = sst [smem:[#allocation5_spill]] %s3882_s25  ;;  %p43_p0 = scmp.ge.s32.totalorder %s42_s1, 2 }
  0x13   : > { %4685 = sst [smem:[#allocation6_spill]] %s3886_s5  ;;  %p3170_p1 = scmp.ge.s32.totalorder %s3886_s5, 1 }
  0x14   : > { %p792_p2 = scmp.lt.s32.totalorder %s3886_s5, 5  ;;  %s4727_s1 = smov (%p43_p0, %s42_s1), 0 }
  0x15   : > { %4686 = sst [smem:[#allocation7_spill]] %s4727_s1  ;;  %s4729_s26 = smov (!%p43_p0, %s45_s26), %s3882_s25 }
  0x16   : > { %p793_p3 = pnand %p3170_p1, %p792_p2  ;;  %p47_p4 = scmp.ge.s32.totalorder %s4729_s26, 2 }
  0x18   : > { %s4731_s26 = smov (%p47_p4, %s4729_s26), 0  ;;  %796 = sbr.rel (%p793_p3) target bundleno = 3909 (0xf45), region = 112 }
  0x19   : > { %4687 = sst [smem:[#allocation8_spill]] %s4731_s26 }
  0x1d   : > { %p919_p5 = scmp.lt.s32.totalorder %s3874_s30, 1  ;;  %p924_p6 = scmp.lt.s32.totalorder %s3870_s4, 1 }
  0x1e   : > { %s4688_s29 = sld [smem:[#allocation15_spill]] }
  0x1f   : > { %s4733_s30 = smov (!%p919_p5, %s3874_s30), 1  ;;  %s4690_s25 = sld [smem:[#allocation18_spill]] }
  0x20   : > { %s4044_s2 = scalar_select %p924_p6, %s3870_s4, 1 }
  0x21   : > { %s3627_s6 = sshll.u32 %s4733_s30, 5  ;;  %s3634_s27 = sshll.u32 %s4733_s30, 4 }
  0x22   : > { %s3628_s0 = sshll.u32 %s4044_s2, 6  ;;  %s4692_s20 = sld [smem:[#allocation19_spill]] }
  0x23   : > { %s4694_s4 = sld [smem:[#allocation20_spill]]  ;;  %s3631_s19 = sshll.u32 %s4044_s2, 4 }
  0x24   : > { %s4049_s3 = scalar_lea.vmem %s4688_s29, %s3627_s6  ;;  %s3179_s6 = sshll.u32 %s4044_s2, 2 }
  0x25   : > { %4689 = sst [smem:[#allocation9_spill]] %s4049_s3  ;;  %s4055_s24 = scalar_lea.vmem %s4690_s25, %s3628_s0 }
  0x26   : > { %4691 = sst [smem:[#allocation10_spill]] %s4055_s24  ;;  %s980_s29 = scalar_lea.vmem %s4645_s16, %s4044_s2 }
  0x27   : > { %s4696_s1 = sld [smem:[#allocation21_spill]]  ;;  %s986_s5 = scalar_lea.vmem %s4647_s18, %s4044_s2 }
  0x28   : > { %s4060_s21 = scalar_lea.vmem %s4692_s20, %s3628_s0  ;;  %s4698_s3 = sld [smem:[#allocation22_spill]] }
  0x29   : > { %4693 = sst [smem:[#allocation11_spill]] %s4060_s21  ;;  %s4065_s7 = scalar_lea.vmem %s4694_s4, %s3628_s0 }
  0x2a   : > { %4695 = sst [smem:[#allocation12_spill]] %s4065_s7  ;;  %s3633_s20 = sshll.u32 %s4044_s2, 5 }
  0x2b   : > { %s4699_s8 = sld [smem:[#allocation23_spill]] }
  0x2c   : > { %s4700_s9 = sld [smem:[#allocation24_spill]] }
  0x2d   : > { %s4071_s26 = scalar_lea.vmem %s4696_s1, %s3179_s6  ;;  %s4702_s11 = sld [smem:[#allocation25_spill]] }
  0x2e   : > { %4697 = sst [smem:[#allocation13_spill]] %s4071_s26  ;;  %s4076_s22 = scalar_lea.vmem %s4698_s3, %s3179_s6 }
  0x2f   : > { %s977_s26 = scalar_lea.vmem %s4644_s15, %s4044_s2  ;;  %s4703_s0 = sld [smem:[#allocation3_spill]] }
  0x31   : > { %s4081_s21 = scalar_lea.vmem %s4699_s8, %s3179_s6  ;;  %s983_s6 = scalar_lea.vmem %s4646_s17, %s4044_s2 }
  0x32   : > { %s4087_s30 = scalar_lea.vmem %s4700_s9, %s3631_s19 }
  0x33   : > { %4701 = sst [smem:[#allocation14_spill]] %s4087_s30  ;;  %s4096_s24 = scalar_lea.vmem %s4702_s11, %s3631_s19 }
  0x34   : > { %s4110_s30 = scalar_lea.vmem %s4642_s13, %s3633_s20  ;;  %s4131_s20 = scalar_lea.vmem %s4652_s23, %s3634_s27 }
  0x35   : > { %p3190_p7 = scmp.ne.s32.totalorder %s4703_s0, 0 }
  0x36   : > { %s4704_s19 = sld [smem:[#allocation16_spill]] (!%p3190_p7) }
  0x37   : > { %996 = sbr.rel (%p3190_p7) target bundleno = 231 (0xe7), region = 116  ;;  %s4705_s1 = sld [smem:[#allocation9_spill]] (!%p3190_p7) }
  0x38   : > { %s4706_s27 = sld [smem:[#allocation17_spill]] (!%p3190_p7) }
  0x3c   : > { %v3642_v0 = vld [vmem:[%s4704_s19 + $0x38] sm:$0xff]  ;;  %v3641_v2 = vld [vmem:[%s4704_s19 + $0x30] sm:$0xff]  ;;  %v3640_v4 = vld [vmem:[%s4704_s19 + $0x28] sm:$0xff]  ;;  %vm1102_vm0 = vcmask 523264   ;;  %vm1134_vm1 = vcmask 261120  }
  0x3d   : > { %v3646_v1 = vld [vmem:[%s4704_s19 + $0x58] sm:$0xff]  ;;  %1106 = vmatpush.bf16.msra.mxu0 %v3642_v0  ;;  %v3645_v3 = vld [vmem:[%s4704_s19 + $0x50] sm:$0xff]  ;;  %v3644_v5 = vld [vmem:[%s4704_s19 + $0x48] sm:$0xff] }
  0x3e   : > { %1124 = vmatpush.bf16.msra.mxu1 %v3646_v1  ;;  %v3639_v6 = vld [vmem:[%s4704_s19 + $0x20] sm:$0xff]  ;;  %v1001_v8 = vld [vmem:[%s4705_s1 + $0x8] sm:$0xff]  ;;  %v1003_v9 = vld [vmem:[%s4705_s1 + $0x18] sm:$0xff] }
  0x3f   : > { %v3643_v7 = vld [vmem:[%s4704_s19 + $0x40] sm:$0xff]  ;;  %v3638_v10 = vld [vmem:[%s4704_s19 + $0x18] sm:$0xff]  ;;  %v1029_v11 = vpack.c.bf16 %v1003_v9, %v1001_v8  ;;  %v3637_v12 = vld [vmem:[%s4704_s19 + $0x10] sm:$0xff] }
  0x40   : > { %v3636_v13 = vld [vmem:[%s4704_s19 + $0x8] sm:$0xff]  ;;  %v3635_v14 = vld [vmem:[%s4704_s19] sm:$0xff]  ;;  %v1002_v16 = vld [vmem:[%s4705_s1 + $0x10] sm:$0xff] }
  0x41   : > { %1107 = vmatpush.bf16.msra.mxu0 %v3641_v2  ;;  %v1000_v15 = vld [vmem:[%s4705_s1] sm:$0xff]  ;;  %v999_v18 = vld [vmem:[%s4706_s27 + $0x10] sm:$0xff]  ;;  %v998_v24 = vld [vmem:[%s4706_s27 + $0x8] sm:$0xff] }
  0x42   : > { %1125 = vmatpush.bf16.msra.mxu1 %v3645_v3  ;;  %v1028_v17 = vpack.c.bf16 %v1002_v16, %v1000_v15  ;;  %1137 = vst.msk [vmem:[#allocation2 + $0x10] sm:$0xff] %vm1134_vm1, %v999_v18  ;;  %v997_v19 = vld [vmem:[%s4706_s27] sm:$0xff] }
  0x45   : > { %1108 = vmatpush.bf16.msra.mxu0 %v3640_v4 }
  0x46   : > { %1126 = vmatpush.bf16.msra.mxu1 %v3644_v5 }
  0x49   : > { %1109 = vmatpush.bf16.msra.mxu0 %v3639_v6 }
  0x4a   : > { %1127 = vmatpush.bf16.msra.mxu1 %v3643_v7 }
  0x4d   : > { %1110 = vmatpush.bf16.msra.mxu0 %v3638_v10  ;;  %3239 = vmatmul.msk.bf16.vlgmr.msra.gmra.mxu1 %vm1102_vm0, %v1029_v11 }
  0x51   : > { %1111 = vmatpush.bf16.msra.mxu0 %v3637_v12 }
  0x55   : > { %1112 = vmatpush.bf16.msra.mxu0 %v3636_v13 }
  0x59   : > { %1113 = vmatpush.bf16.msra.mxu0 %v3635_v14 }
  0x5c   : > { %1114 = vmatmul.bf16.vlgmr.msra.gmra.mxu0 %v1028_v17 }
  0xca   : > { %v1129_v20 = vpop.f32.mrf.mxu1 }
  0xd2   : > { %v1131_v27 = vpop.f32.mrf.mxu1 }
  0xd9   : > { %v1115_v21 = vpop.f32.mrf.mxu0 }
  0xda   : > { %v1116_v22 = vadd.f32 %v1115_v21, %v997_v19 }
  0xdc   : > { %v1130_v23 = vadd.f32 %v1129_v20, %v1116_v22 }
  0xde   : > { %1135 = vst.msk [vmem:[#allocation2] sm:$0xff] %vm1134_vm1, %v1130_v23 }
  0xe1   : > { %v1117_v25 = vpop.f32.mrf.mxu0 }
  0xe2   : > { %v1118_v26 = vadd.f32 %v1117_v25, %v998_v24 }
  0xe4   : > { %v1132_v28 = vadd.f32 %v1131_v27, %v1118_v26 }
  0xe6   : > { %1136 = vst.msk [vmem:[#allocation2 + $0x8] sm:$0xff] %vm1134_vm1, %v1132_v28 }
  0xe7 PF: > { %s4707_s7 = sld [smem:[#allocation11_spill]]  ;;  %v1138_v32 = vld [vmem:[#allocation2] sm:$0xff]  ;;  %vm1168_vm2 = vcmask 261120   ;;  %v1140_v34 = vld [vmem:[#allocation2 + $0x10] sm:$0xff]  ;;  %vm1273_vm3 = vcmask 64512   ;;  %v1143_v60 = vlaneseq  ;;  %vm1310_vm5 = vcmask 195584   ;;  %s4712_s9 = scalar_lea.vmem %s4639_s10, %s4044_s2 }
  0xe8   : > { %s4708_s28 = sld [smem:[#allocation10_spill]]  ;;  %v4189_v37 = vpack.c.bf16 %v1140_v34, %v1140_v34  ;;  %v3763_v39 = vld [vmem:[%s4076_s22] ss:$0 sm:$0xff]  ;;  %v3888_v1 = vmov -1e+30   ;;  %vm1354_vm6 = vcmask 1043456   ;;  %s4713_s1 = scalar_lea.vmem %s4641_s12, %s4044_s2 }
  0xe9   : > { %s4709_s3 = sld [smem:[#allocation13_spill]]  ;;  %v1144_v62 = vand.u32 127, %v1143_v60  ;;  %vm2359_vm1 = vcmask 523264  }
  0xea   : > { %s4710_s25 = sld [smem:[#allocation12_spill]] }
  0xeb   : > { %vm1145_vm4 = vcmp.lt.s32.totalorder %v1144_v62, 17  ;;  %s4711_s11 = sld [smem:[#allocation14_spill]] }
  0xec   : > { %v4207_v2 = vsel %vm1145_vm4, 0.0, %v3888_v1 }
  0xed   : > { %v3650_v29 = vld [vmem:[%s4707_s7 + $0x8] sm:$0xff]  ;;  %v3649_v31 = vld [vmem:[%s4707_s7] sm:$0xff]  ;;  %v3656_v15 = vld [vmem:[%s4707_s7 + $0x18] sm:$0xff] }
  0xee   : > { %v3648_v30 = vld [vmem:[%s4708_s28 + $0x8] sm:$0xff]  ;;  %1219 = vmatpush.bf16.msra.mxu1 %v3650_v29  ;;  %3719 = vmatpush.bf16.msra.mxu3 %v3650_v29  ;;  %v3647_v35 = vld [vmem:[%s4708_s28] sm:$0xff]  ;;  %v3655_v16 = vld [vmem:[%s4707_s7 + $0x10] sm:$0xff] }
  0xef   : > { %v1139_v33 = vld [vmem:[#allocation2 + $0x8] sm:$0xff]  ;;  %1181 = vmatpush.bf16.msra.mxu0 %v3648_v30  ;;  %3717 = vmatpush.bf16.msra.mxu2 %v3648_v30  ;;  %v3764_v52 = vld [vmem:[%s4709_s3] ss:$0 sm:$0xff] }
  0xf0   : > { %v4187_v36 = vpack.c.bf16 %v1139_v33, %v1138_v32  ;;  %v3652_v61 = vld [vmem:[%s4710_s25 + $0x8] sm:$0xff]  ;;  %v3651_v63 = vld [vmem:[%s4710_s25] sm:$0xff] }
  0xf1   : > { %v3765_v32 = vld [vmem:[%s4081_s21] ss:$0 sm:$0xff] }
  0xf2   : > { %1220 = vmatpush.bf16.msra.mxu1 %v3649_v31  ;;  %3720 = vmatpush.bf16.msra.mxu3 %v3649_v31 }
  0xf3   : > { %1182 = vmatpush.bf16.msra.mxu0 %v3647_v35  ;;  %3718 = vmatpush.bf16.msra.mxu2 %v3647_v35 }
  0xf5   : > { %3258 = vmatmul.msk.bf16.vlgmr.msra.gmra.mxu1 %vm1168_vm2, %v4187_v36  ;;  %3259 = vmatmul.msk.bf16.vlgmr.msra.gmra.mxu3 %vm1168_vm2, %v4189_v37 }
  0xf6   : > { %3248 = vmatmul.msk.bf16.vlgmr.msra.gmra.mxu0 %vm1168_vm2, %v4187_v36  ;;  %3249 = vmatmul.msk.bf16.vlgmr.msra.gmra.mxu2 %vm1168_vm2, %v4189_v37 }
  0xf7   : > { %1257 = vmatpush.bf16.msrb.mxu2 %v3652_v61 }
  0xfb   : > { %1258 = vmatpush.bf16.msrb.mxu2 %v3651_v63 }
 0x106   : > { %3268 = vmatmul.msk.bf16.vlgmr.msrb.gmra.mxu2 %vm1168_vm2, %v4187_v36 }
 0x116   : > { %3269 = vmatmul.msk.bf16.gmra.mxu2 %vm1168_vm2, %v4189_v37 }
 0x172   : > { %v1222_v38 = vpop.f32.mrf.mxu1 }
 0x173   : > { %v1184_v43 = vpop.f32.mrf.mxu0  ;;  %v1223_v48 = vadd.f32 %v3763_v39, %v1222_v38 }
 0x174   : > { %v1185_v55 = vadd.f32 %v3764_v52, %v1184_v43 }
 0x178   : > { %v1227_v40 = vpop.f32.mrf.mxu3 }
 0x179   : > { %v1228_v41 = vadd.f32 %v3763_v39, %v1227_v40  ;;  %v1189_v42 = vpop.f32.mrf.mxu2 }
 0x17a   : > { %v1224_v44 = vpop.f32.mrf.mxu1  ;;  %v1190_v58 = vadd.f32 %v3764_v52, %v1189_v42 }
 0x17b   : > { %v1272_v45 = vpack.c.bf16 %v1228_v41, %v1228_v41  ;;  %v1225_v46 = vadd.f32 %v3763_v39, %v1224_v44  ;;  %v1186_v53 = vpop.f32.mrf.mxu0 }
 0x17c   : > { %v1187_v56 = vadd.f32 %v3764_v52, %v1186_v53  ;;  %v1270_v59 = vpack.c.bf16 %v1190_v58, %v1190_v58 }
 0x17d   : > { %v1284_v47 = vsel %vm1273_vm3, %v1272_v45, 0  ;;  %v1271_v50 = vpack.c.bf16 %v1225_v46, %v1223_v48  ;;  %v3654_v45 = vld [vmem:[%s4708_s28 + $0x18] sm:$0xff]  ;;  %v3653_v46 = vld [vmem:[%s4708_s28 + $0x10] sm:$0xff]  ;;  %v1376_v48 = vld [vmem:[%s4711_s11] sm:$0xf] }
 0x17e   : > { %1292 = vmatpush.bf16.xpose.msrb.mxu3 %v1284_v47  ;;  %v1269_v57 = vpack.c.bf16 %v1187_v56, %v1185_v55  ;;  %1440 = vmatpush.bf16.msra.mxu2 %v3654_v45 }
 0x17f   : > { %v1281_v54 = vsel %vm1273_vm3, %v1271_v50, 0 }
 0x180   : > { %v1229_v49 = vpop.f32.mrf.mxu3 }
 0x181   : > { %v1191_v51 = vpop.f32.mrf.mxu2  ;;  %v1386_v49 = vsel %vm1354_vm6, %v1376_v48, 0 }
 0x182   : > { %1441 = vmatpush.bf16.msra.mxu2 %v3653_v46  ;;  %1395 = vmatpush.bf16.msrb.mxu1 %v1386_v49  ;;  %v3662_v46 = vld [vmem:[%s4707_s7 + $0x28] sm:$0xff]  ;;  %v3661_v49 = vld [vmem:[%s4707_s7 + $0x20] sm:$0xff] }
 0x185   : > { %3289 = vmatmul.msk.bf16.vlgmr.msra.gmra.mxu2 %vm1168_vm2, %v4187_v36 }
 0x186   : > { %1293 = vmatpush.bf16.xpose.msrb.mxu3 %v1281_v54 }
 0x189   : > { %v1260_v24 = vpop.f32.mrf.mxu2 }
 0x18a   : > { %v1261_v39 = vadd.f32 %v3765_v32, %v1260_v24 }
 0x18d   : > { %3270 = vmatmul.msk.bf16.vlgmr.msrb.gmra.mxu3 %vm1273_vm3, %v1269_v57 }
 0x18e   : > { %1480 = vmatpush.bf16.msra.mxu3 %v3656_v15 }
 0x191   : > { %v1262_v30 = vpop.f32.mrf.mxu2 }
 0x192   : > { %1481 = vmatpush.bf16.msra.mxu3 %v3655_v16  ;;  %v1263_v40 = vadd.f32 %v3765_v32, %v1262_v30  ;;  %v3657_v30 = vld [vmem:[%s4710_s25 + $0x10] sm:$0xff] }
 0x194   : > { %v1344_v43 = vpack.c.bf16 %v1263_v40, %v1261_v39 }
 0x195   : > { %3290 = vmatmul.msk.bf16.gmra.mxu2 %vm1168_vm2, %v4189_v37 }
 0x199   : > { %v1265_v34 = vpop.f32.mrf.mxu2 }
 0x19a   : > { %v1266_v38 = vadd.f32 %v3765_v32, %v1265_v34 }
 0x19c   : > { %v1345_v41 = vpack.c.bf16 %v1266_v38, %v1266_v38 }
 0x19d   : > { %3271 = vmatmul.msk.bf16.gmra.mxu3 %vm1273_vm3, %v1270_v59  ;;  %v3766_v59 = vld [vmem:[%s4076_s22 + $0x1] ss:$0 sm:$0xff] }
 0x19e   : > { %v1356_v42 = vsel %vm1354_vm6, %v1345_v41, 0 }
 0x19f   : > { %1364 = vmatpush.bf16.msrb.mxu0 %v1356_v42 }
 0x1a1   : > { %v1267_v44 = vpop.f32.mrf.mxu2 }
 0x1a3   : > { %1365 = vmatpush.bf16.msrb.mxu0 %v1344_v43 }
 0x1ad   : > { %3304 = vmatmul.msk.bf16.vlgmr.msra.gmra.mxu3 %vm1168_vm2, %v4187_v36 }
 0x1bd   : > { %3305 = vmatmul.msk.bf16.gmra.mxu3 %vm1168_vm2, %v4189_v37 }
 0x210   : > { %v1295_v0 = vpop.f32.mrf.mxu3 }
 0x211   : > { %v1304_v3 = vmul.f32 0.35355338, %v1295_v0 }
 0x213   : > { %v1307_v4 = vadd.f32 %v1304_v3, %v4207_v2 }
 0x215   : > { %v1311_v5 = vsel %vm1310_vm5, %v1307_v4, -inf }
 0x216   : > { %1312 = vmax.xlane.f32.xlu0 %v1311_v5 }
 0x218   : > { %v1297_v6 = vpop.f32.mrf.mxu3 }
 0x219   : > { %v1305_v7 = vmul.f32 0.35355338, %v1297_v6 }
 0x21b   : > { %v1308_v8 = vadd.f32 %v1305_v7, %v4207_v2 }
 0x21d   : > { %v1314_v9 = vsel %vm1310_vm5, %v1308_v8, -inf }
 0x21e   : > { %1315 = vmax.xlane.f32.xlu0 %v1314_v9  ;;  %v1443_v9 = vpop.f32.mrf.mxu2 }
 0x220   : > { %v1300_v10 = vpop.f32.mrf.mxu3 }
 0x221   : > { %v1306_v11 = vmul.f32 0.35355338, %v1300_v10 }
 0x223   : > { %v1309_v12 = vadd.f32 %v1306_v11, %v4207_v2 }
 0x225   : > { %v1317_v13 = vsel %vm1310_vm5, %v1309_v12, -inf }
 0x226   : > { %1318 = vmax.xlane.f32.xlu1 %v1317_v13  ;;  %v1445_v11 = vpop.f32.mrf.mxu2 }
 0x228   : > { %v1302_v14 = vpop.f32.mrf.mxu3 }
 0x22e   : > { %v1448_v14 = vpop.f32.mrf.mxu2 }
 0x230   : > { %v1483_v51 = vpop.f32.mrf.mxu3 }
 0x231   : > { %v1484_v63 = vadd.f32 %v3766_v59, %v1483_v51 }
 0x236   : > { %v1450_v16 = vpop.f32.mrf.mxu2 }
 0x238   : > { %v1485_v56 = vpop.f32.mrf.mxu3 }
 0x239   : > { %v1486_v0 = vadd.f32 %v3766_v59, %v1485_v56 }
 0x23b   : > { %v1534_v5 = vpack.c.bf16 %v1486_v0, %v1484_v63 }
 0x240   : > { %v1488_v60 = vpop.f32.mrf.mxu3 }
 0x241   : > { %v1489_v61 = vadd.f32 %v3766_v59, %v1488_v60  ;;  %v3769_v60 = vld [vmem:[%s4081_s21 + $0x1] ss:$0 sm:$0xff] }
 0x243   : > { %v1535_v1 = vpack.c.bf16 %v1489_v61, %v1489_v61 }
 0x248   : > { %v1490_v6 = vpop.f32.mrf.mxu3 }
 0x289   : > { %v1313_v17 = vpop.xlane.xlu0 %1312 }
 0x28a   : > { %v1320_v18 = vsub.f32 %v1307_v4, %v1313_v17  ;;  %v1546_v4 = vsel %vm1273_vm3, %v1535_v1, 0 }
 0x28b   : > { %1554 = vmatpush.bf16.xpose.msra.mxu1 %v1546_v4 }
 0x28c   : > { %v1323_v19 = vmul.f32 1.442695, %v1320_v18 }
 0x28e   : > { %3782 = vpow2.f32 %v1323_v19  ;;  %v3767_v19 = vld [vmem:[%s4709_s3 + $0x1] ss:$0 sm:$0xff] }
 0x291   : > { %v1316_v20 = vpop.xlane.xlu0 %1315 }
 0x292   : > { %v1321_v21 = vsub.f32 %v1308_v8, %v1316_v20  ;;  %v1543_v8 = vsel %vm1273_vm3, %v1534_v5, 0  ;;  %v1444_v20 = vadd.f32 %v3767_v19, %v1443_v9 }
 0x293   : > { %1555 = vmatpush.bf16.xpose.msra.mxu1 %v1543_v8 }
 0x294   : > { %v3783_v22 = vpop.eup %3782  ;;  %v1325_v23 = vmul.f32 1.442695, %v1321_v21  ;;  %v1446_v21 = vadd.f32 %v3767_v19, %v1445_v11  ;;  %v3660_v11 = vld [vmem:[%s4708_s28 + $0x28] sm:$0xff] }
 0x295   : > { %v1329_v25 = vsel %vm1310_vm5, %v3783_v22, 0.0 }
 0x296   : > { %3784 = vpow2.f32 %v1325_v23  ;;  %1330 = vadd.xlane.f32.xlu1 %v1329_v25  ;;  %v1449_v23 = vadd.f32 %v3767_v19, %v1448_v14  ;;  %v3325_v14 = vld [vmem:[%s4711_s11 + $0x4] sm:$0xf] }
 0x297   : > { %v1647_v16 = vsel %vm1354_vm6, %v3325_v14, 0 }
 0x298   : > { %v1533_v24 = vpack.c.bf16 %v1449_v23, %v1449_v23  ;;  %1656 = vmatpush.bf16.msrb.mxu3 %v1647_v16 }
 0x299   : > { %v1319_v26 = vpop.xlane.xlu1 %1318 }
 0x29a   : > { %v1322_v27 = vsub.f32 %v1309_v12, %v1319_v26 }
 0x29c   : > { %v3785_v28 = vpop.eup %3784  ;;  %v1327_v29 = vmul.f32 1.442695, %v1322_v27 }
 0x29d   : > { %v1332_v31 = vsel %vm1310_vm5, %v3785_v28, 0.0 }
 0x29e   : > { %3786 = vpow2.f32 %v1327_v29  ;;  %1333 = vadd.xlane.f32.xlu2 %v1332_v31  ;;  %v3658_v29 = vld [vmem:[%s4710_s25 + $0x18] sm:$0xff] }
 0x29f   : > { %1520 = vmatpush.bf16.msra.mxu0 %v3658_v29 }
 0x2a3   : > { %1521 = vmatpush.bf16.msra.mxu0 %v3657_v30 }
 0x2a4   : > { %v3787_v33 = vpop.eup %3786 }
 0x2a5   : > { %v1335_v35 = vsel %vm1310_vm5, %v3787_v33, 0.0 }
 0x2a6   : > { %1336 = vadd.xlane.f32.xlu2 %v1335_v35 }
 0x309   : > { %v1331_v47 = vpop.xlane.xlu1 %1330 }
 0x30a   : > { %3788 = vrcp.f32 %v1331_v47 }
 0x310   : > { %v3789_v52 = vpop.eup %3788 }
 0x311   : > { %v1334_v50 = vpop.xlane.xlu2 %1333  ;;  %v1341_v54 = vmul.f32 %v3789_v52, %v3783_v22  ;;  %v1532_v22 = vpack.c.bf16 %v1446_v21, %v1444_v20 }
 0x312   : > { %3790 = vrcp.f32 %v1334_v50 }
 0x318   : > { %v3791_v53 = vpop.eup %3790 }
 0x319   : > { %v1342_v55 = vmul.f32 %v3791_v53, %v3785_v28  ;;  %v1337_v57 = vpop.xlane.xlu2 %1336 }
 0x31a   : > { %3792 = vrcp.f32 %v1337_v57 }
 0x31b   : > { %v1346_v58 = vpack.c.bf16 %v1342_v55, %v1341_v54 }
 0x31d   : > { %3272 = vmatmul.msk.bf16.vlgmr.msrb.gmra.mxu0 %vm1310_vm5, %v1346_v58 }
 0x31e   : > { %1698 = vmatpush.bf16.msrb.mxu0 %v3660_v11 }
 0x320   : > { %v3793_v62 = vpop.eup %3792 }
 0x321   : > { %v1343_v3 = vmul.f32 %v3793_v62, %v3787_v33 }
 0x323   : > { %v1347_v7 = vpack.c.bf16 %v1343_v3, %v1343_v3 }
 0x32d   : > { %3273 = vmatmul.msk.bf16.gmra.mxu0 %vm1310_vm5, %v1347_v7 }
 0x33d   : > { %3319 = vmatmul.msk.bf16.vlgmr.msra.gmra.mxu0 %vm1168_vm2, %v4187_v36 }
 0x34d   : > { %3320 = vmatmul.msk.bf16.gmra.mxu0 %vm1168_vm2, %v4189_v37 }
 0x39a   : > { %v1367_v10 = vpop.f32.mrf.mxu0 }
 0x3a2   : > { %v1369_v12 = vpop.f32.mrf.mxu0 }
 0x3a3   : > { %v1377_v13 = vpack.c.bf16 %v1369_v12, %v1367_v10 }
 0x3a5   : > { %3274 = vmatmul.msk.bf16.vlgmr.msrb.gmra.mxu1 %vm1273_vm3, %v1377_v13  ;;  %v3659_v13 = vld [vmem:[%s4708_s28 + $0x20] sm:$0xff] }
 0x3a6   : > { %1738 = vmatpush.bf16.msrb.mxu1 %v3662_v46  ;;  %1699 = vmatpush.bf16.msrb.mxu0 %v3659_v13 }
 0x3a9   : > { %3341 = vmatmul.msk.bf16.vlgmr.msrb.gmra.mxu0 %vm1168_vm2, %v4187_v36 }
 0x3aa   : > { %v1372_v15 = vpop.f32.mrf.mxu0  ;;  %1739 = vmatpush.bf16.msrb.mxu1 %v3661_v49 }
 0x3ab   : > { %v1378_v18 = vpack.c.bf16 %v1372_v15, %v1372_v15 }
 0x3b2   : > { %v1374_v17 = vpop.f32.mrf.mxu0 }
 0x3b5   : > { %3275 = vmatmul.msk.bf16.gmra.mxu1 %vm1273_vm3, %v1378_v18 }
 0x3b9   : > { %3342 = vmatmul.msk.bf16.gmra.mxu0 %vm1168_vm2, %v4189_v37 }
 0x3ba   : > { %v1523_v51 = vpop.f32.mrf.mxu0 }
 0x3bb   : > { %v1524_v3 = vadd.f32 %v3769_v60, %v1523_v51 }
 0x3c2   : > { %v1525_v57 = vpop.f32.mrf.mxu0 }
 0x3c3   : > { %v1526_v4 = vadd.f32 %v3769_v60, %v1525_v57 }
 0x3c5   : > { %3321 = vmatmul.msk.bf16.vlgmr.msra.gmra.mxu1 %vm1273_vm3, %v1532_v22  ;;  %v1605_v8 = vpack.c.bf16 %v1526_v4, %v1524_v3 }
 0x3ca   : > { %v1528_v0 = vpop.f32.mrf.mxu0 }
 0x3cb   : > { %v1529_v1 = vadd.f32 %v3769_v60, %v1528_v0 }
 0x3cd   : > { %v1606_v5 = vpack.c.bf16 %v1529_v1, %v1529_v1 }
 0x3cf   : > { %v1616_v6 = vsel %vm1354_vm6, %v1606_v5, 0 }
 0x3d0   : > { %1624 = vmatpush.bf16.msrb.mxu2 %v1616_v6 }
 0x3d2   : > { %v1530_v10 = vpop.f32.mrf.mxu0 }
 0x3d4   : > { %1625 = vmatpush.bf16.msrb.mxu2 %v1605_v8  ;;  %v3663_v8 = vld [vmem:[%s4710_s25 + $0x20] sm:$0xff] }
 0x3d5   : > { %3322 = vmatmul.msk.bf16.gmra.mxu1 %vm1273_vm3, %v1533_v24 }
 0x3e5   : > { %3356 = vmatmul.msk.bf16.vlgmr.msrb.gmra.mxu1 %vm1168_vm2, %v4187_v36 }
 0x3f5   : > { %3357 = vmatmul.msk.bf16.gmra.mxu1 %vm1168_vm2, %v4189_v37 }
 0x422   : > { %v4248_v25 = vpop.f32.mrf.mxu1 }
 0x42a   : > { %v4250_v26 = vpop.f32.mrf.mxu1 }
 0x432   : > { %v4252_v27 = vpop.f32.mrf.mxu1 }
 0x43a   : > { %v1404_v28 = vpop.f32.mrf.mxu1 }
 0x43b   : > { %v3770_v28 = vld [vmem:[%s4076_s22 + $0x2] ss:$0 sm:$0xff] }
 0x442   : > { %v1557_v31 = vpop.f32.mrf.mxu1 }
 0x443   : > { %v1566_v32 = vmul.f32 0.35355338, %v1557_v31 }
 0x445   : > { %v1569_v33 = vadd.f32 %v1566_v32, %v4207_v2 }
 0x447   : > { %v1572_v34 = vsel %vm1310_vm5, %v1569_v33, -inf }
 0x448   : > { %1573 = vmax.xlane.f32.xlu0 %v1572_v34 }
 0x44a   : > { %v1559_v35 = vpop.f32.mrf.mxu1 }
 0x44b   : > { %v1567_v38 = vmul.f32 0.35355338, %v1559_v35 }
 0x44d   : > { %v1570_v39 = vadd.f32 %v1567_v38, %v4207_v2 }
 0x44f   : > { %v1575_v40 = vsel %vm1310_vm5, %v1570_v39, -inf }
 0x450   : > { %1576 = vmax.xlane.f32.xlu1 %v1575_v40 }
 0x452   : > { %v1562_v41 = vpop.f32.mrf.mxu1 }
 0x453   : > { %v1568_v42 = vmul.f32 0.35355338, %v1562_v41 }
 0x455   : > { %v1571_v43 = vadd.f32 %v1568_v42, %v4207_v2 }
 0x457   : > { %v1578_v44 = vsel %vm1310_vm5, %v1571_v43, -inf }
 0x458   : > { %1579 = vmax.xlane.f32.xlu2 %v1578_v44 }
 0x45a   : > { %v1564_v45 = vpop.f32.mrf.mxu1 }
 0x462   : > { %v1741_v15 = vpop.f32.mrf.mxu1 }
 0x463   : > { %v1742_v31 = vadd.f32 %v3770_v28, %v1741_v15 }
 0x46a   : > { %v1743_v19 = vpop.f32.mrf.mxu1 }
 0x46b   : > { %v1744_v32 = vadd.f32 %v3770_v28, %v1743_v19 }
 0x46d   : > { %v1792_v38 = vpack.c.bf16 %v1744_v32, %v1742_v31 }
 0x46f   : > { %v1801_v41 = vsel %vm1273_vm3, %v1792_v38, 0 }
 0x472   : > { %v1746_v29 = vpop.f32.mrf.mxu1 }
 0x473   : > { %v1747_v30 = vadd.f32 %v3770_v28, %v1746_v29 }
 0x4bb   : > { %v1574_v47 = vpop.xlane.xlu0 %1573 }
 0x4bc   : > { %v1581_v48 = vsub.f32 %v1569_v33, %v1574_v47  ;;  %v1793_v33 = vpack.c.bf16 %v1747_v30, %v1747_v30 }
 0x4be   : > { %v1584_v50 = vmul.f32 1.442695, %v1581_v48  ;;  %v1804_v34 = vsel %vm1273_vm3, %v1793_v33, 0 }
 0x4bf   : > { %1812 = vmatpush.bf16.xpose.msra.mxu3 %v1804_v34 }
 0x4c0   : > { %3794 = vpow2.f32 %v1584_v50 }
 0x4c3   : > { %v1577_v52 = vpop.xlane.xlu1 %1576 }
 0x4c4   : > { %v1582_v53 = vsub.f32 %v1570_v39, %v1577_v52  ;;  %v1748_v39 = vpop.f32.mrf.mxu1 }
 0x4c6   : > { %v3795_v54 = vpop.eup %3794  ;;  %v1586_v55 = vmul.f32 1.442695, %v1582_v53  ;;  %v3771_v53 = vld [vmem:[%s4709_s3 + $0x2] ss:$0 sm:$0xff] }
 0x4c7   : > { %v1590_v56 = vsel %vm1310_vm5, %v3795_v54, 0.0  ;;  %1813 = vmatpush.bf16.xpose.msra.mxu3 %v1801_v41  ;;  %v3772_v41 = vld [vmem:[%s4081_s21 + $0x2] ss:$0 sm:$0xff] }
 0x4c8   : > { %3796 = vpow2.f32 %v1586_v55  ;;  %1591 = vadd.xlane.f32.xlu0 %v1590_v56 }
 0x4cb   : > { %v1580_v58 = vpop.xlane.xlu2 %1579 }
 0x4cc   : > { %v1583_v59 = vsub.f32 %v1571_v43, %v1580_v58  ;;  %v1701_v43 = vpop.f32.mrf.mxu0 }
 0x4ce   : > { %v3797_v61 = vpop.eup %3796  ;;  %v1588_v62 = vmul.f32 1.442695, %v1583_v59  ;;  %v3768_v59 = vld [vmem:[%s4712_s9] ss:$0 sm:$0xff] }
 0x4cf   : > { %v1593_v63 = vsel %vm1310_vm5, %v3797_v61, 0.0  ;;  %v1409_v60 = vadd.f32 %v3768_v59, %v4248_v25  ;;  %v1411_v3 = vadd.f32 %v3768_v59, %v4252_v27 }
 0x4d0   : > { %3798 = vpow2.f32 %v1588_v62  ;;  %1594 = vadd.xlane.f32.xlu1 %v1593_v63  ;;  %v1410_v63 = vadd.f32 %v3768_v59, %v4250_v26 }
 0x4d4   : > { %v1703_v45 = vpop.f32.mrf.mxu0 }
 0x4d5   : > { %v1704_v55 = vadd.f32 %v3771_v53, %v1703_v45 }
 0x4d6   : > { %v3799_v7 = vpop.eup %3798 }
 0x4d7   : > { %v1596_v9 = vsel %vm1310_vm5, %v3799_v7, 0.0 }
 0x4d8   : > { %1597 = vadd.xlane.f32.xlu2 %v1596_v9 }
 0x4dc   : > { %v1706_v48 = vpop.f32.mrf.mxu0 }
 0x4dd   : > { %v1707_v57 = vadd.f32 %v3771_v53, %v1706_v48 }
 0x4df   : > { %v1791_v58 = vpack.c.bf16 %v1707_v57, %v1707_v57 }
 0x4e4   : > { %v1708_v50 = vpop.f32.mrf.mxu0 }
 0x53b   : > { %v1592_v12 = vpop.xlane.xlu0 %1591 }
 0x53c   : > { %3800 = vrcp.f32 %v1592_v12 }
 0x542   : > { %v3801_v18 = vpop.eup %3800 }
 0x543   : > { %v1595_v17 = vpop.xlane.xlu1 %1594  ;;  %v1602_v21 = vmul.f32 %v3801_v18, %v3795_v54  ;;  %v1702_v54 = vadd.f32 %v3771_v53, %v1701_v43  ;;  %v3665_v53 = vld [vmem:[%s4708_s28 + $0x30] sm:$0xff] }
 0x544   : > { %3802 = vrcp.f32 %v1595_v17 }
 0x545   : > { %v1790_v56 = vpack.c.bf16 %v1704_v55, %v1702_v54  ;;  %v3377_v55 = vld [vmem:[%s4711_s11 + $0x8] sm:$0xf] }
 0x54a   : > { %v3803_v20 = vpop.eup %3802 }
 0x54b   : > { %v1603_v22 = vmul.f32 %v3803_v20, %v3797_v61  ;;  %v1598_v24 = vpop.xlane.xlu2 %1597 }
 0x54c   : > { %3804 = vrcp.f32 %v1598_v24 }
 0x54d   : > { %v1607_v23 = vpack.c.bf16 %v1603_v22, %v1602_v21  ;;  %v3668_v22 = vld [vmem:[%s4707_s7 + $0x38] sm:$0xff] }
 0x54f   : > { %3323 = vmatmul.msk.bf16.vlgmr.msrb.gmra.mxu2 %vm1310_vm5, %v1607_v23  ;;  %v3667_v23 = vld [vmem:[%s4707_s7 + $0x30] sm:$0xff] }
 0x552   : > { %v3805_v35 = vpop.eup %3804 }
 0x553   : > { %v1604_v40 = vmul.f32 %v3805_v35, %v3799_v7  ;;  %v3664_v7 = vld [vmem:[%s4710_s25 + $0x28] sm:$0xff] }
 0x554   : > { %1778 = vmatpush.bf16.msra.mxu2 %v3664_v7 }
 0x555   : > { %v1608_v42 = vpack.c.bf16 %v1604_v40, %v1604_v40 }
 0x558   : > { %1779 = vmatpush.bf16.msra.mxu2 %v3663_v8  ;;  %v3773_v8 = vld [vmem:[%s4076_s22 + $0x3] ss:$0 sm:$0xff] }
 0x55f   : > { %3324 = vmatmul.msk.bf16.gmra.mxu2 %vm1310_vm5, %v1608_v42 }
 0x56f   : > { %3371 = vmatmul.msk.bf16.vlgmr.msra.gmra.mxu2 %vm1168_vm2, %v4187_v36 }
 0x57f   : > { %3372 = vmatmul.msk.bf16.gmra.mxu2 %vm1168_vm2, %v4189_v37 }
 0x5d2   : > { %v1627_v44 = vpop.f32.mrf.mxu2 }
 0x5da   : > { %v1629_v46 = vpop.f32.mrf.mxu2 }
 0x5db   : > { %v1638_v47 = vpack.c.bf16 %v1629_v46, %v1627_v44 }
 0x5dd   : > { %3326 = vmatmul.msk.bf16.vlgmr.msrb.gmra.mxu3 %vm1273_vm3, %v1638_v47 }
 0x5de   : > { %1996 = vmatpush.bf16.msrb.mxu3 %v3668_v22 }
 0x5e2   : > { %v1632_v49 = vpop.f32.mrf.mxu2  ;;  %1997 = vmatpush.bf16.msrb.mxu3 %v3667_v23 }
 0x5e3   : > { %v1639_v52 = vpack.c.bf16 %v1632_v49, %v1632_v49 }
 0x5ea   : > { %v1634_v51 = vpop.f32.mrf.mxu2 }
 0x5ed   : > { %3327 = vmatmul.msk.bf16.gmra.mxu3 %vm1273_vm3, %v1639_v52  ;;  %v3666_v52 = vld [vmem:[%s4708_s28 + $0x38] sm:$0xff]  ;;  %s4714_s28 = scalar_lea.vmem %s4643_s14, %s4044_s2  ;;  %s4715_s2 = sld [smem:[#allocation3_spill]] }
 0x5ee   : > { %1956 = vmatpush.bf16.msrb.mxu2 %v3666_v52 }
 0x5f2   : > { %v1781_v31 = vpop.f32.mrf.mxu2  ;;  %1957 = vmatpush.bf16.msrb.mxu2 %v3665_v53 }
 0x5f3   : > { %v1782_v46 = vadd.f32 %v3772_v41, %v1781_v31  ;;  %p3460_p8 = scmp.ne.s32.totalorder %s4715_s2, 1 }
 0x5f4   : > { %s4716_s4 = sld [smem:[#allocation26_spill]] (!%p3460_p8) }
 0x5f5   : > { %3393 = vmatmul.msk.bf16.vlgmr.msrb.gmra.mxu2 %vm1168_vm2, %v4187_v36  ;;  %s4718_s2 = sld [smem:[#allocation28_spill]] (!%p3460_p8) }
 0x5f6   : > { %s4720_s8 = sld [smem:[#allocation29_spill]] (!%p3460_p8) }
 0x5fa   : > { %v1783_v39 = vpop.f32.mrf.mxu2  ;;  %s4717_s9 = smov (!%p3460_p8), %s4716_s4 }
 0x5fb   : > { %v1784_v47 = vadd.f32 %v3772_v41, %v1783_v39 }
 0x5fd   : > { %3373 = vmatmul.msk.bf16.vlgmr.msra.gmra.mxu3 %vm1273_vm3, %v1790_v56  ;;  %v1863_v50 = vpack.c.bf16 %v1784_v47, %v1782_v46  ;;  %v1905_v56 = vsel %vm1354_vm6, %v3377_v55, 0 }
 0x5fe   : > { %1914 = vmatpush.bf16.msra.mxu1 %v1905_v56 }
 0x602   : > { %v1786_v43 = vpop.f32.mrf.mxu2 }
 0x603   : > { %v1787_v45 = vadd.f32 %v3772_v41, %v1786_v43 }
 0x605   : > { %v1864_v48 = vpack.c.bf16 %v1787_v45, %v1787_v45  ;;  %3394 = vmatmul.msk.bf16.gmra.mxu2 %vm1168_vm2, %v4189_v37  ;;  %v3669_v45 = vld [vmem:[%s4710_s25 + $0x30] sm:$0xff] }
 0x607   : > { %v1874_v49 = vsel %vm1354_vm6, %v1864_v48, 0 }
 0x608   : > { %1882 = vmatpush.bf16.msra.mxu0 %v1874_v49 }
 0x60a   : > { %v1788_v51 = vpop.f32.mrf.mxu2 }
 0x60c   : > { %1883 = vmatpush.bf16.msra.mxu0 %v1863_v50 }
 0x60d   : > { %3374 = vmatmul.msk.bf16.gmra.mxu3 %vm1273_vm3, %v1791_v58 }
 0x61d   : > { %3408 = vmatmul.msk.bf16.vlgmr.msrb.gmra.mxu3 %vm1168_vm2, %v4187_v36 }
 0x62d   : > { %3409 = vmatmul.msk.bf16.gmra.mxu3 %vm1168_vm2, %v4189_v37 }
 0x660   : > { %v1658_v61 = vpop.f32.mrf.mxu3 }
 0x661   : > { %v4301_v62 = vadd.f32 %v1658_v61, %v1409_v60 }
 0x668   : > { %v1660_v0 = vpop.f32.mrf.mxu3 }
 0x669   : > { %v4304_v1 = vadd.f32 %v1660_v0, %v1410_v63 }
 0x670   : > { %v1663_v4 = vpop.f32.mrf.mxu3 }
 0x671   : > { %v4307_v5 = vadd.f32 %v1663_v4, %v1411_v3 }
 0x678   : > { %v1665_v6 = vpop.f32.mrf.mxu3 }
 0x680   : > { %v1815_v9 = vpop.f32.mrf.mxu3 }
 0x681   : > { %v1824_v25 = vmul.f32 0.35355338, %v1815_v9 }
 0x683   : > { %v1827_v26 = vadd.f32 %v1824_v25, %v4207_v2 }
 0x685   : > { %v1830_v10 = vsel %vm1310_vm5, %v1827_v26, -inf }
 0x686   : > { %1831 = vmax.xlane.f32.xlu0 %v1830_v10 }
 0x688   : > { %v1817_v11 = vpop.f32.mrf.mxu3 }
 0x689   : > { %v1825_v27 = vmul.f32 0.35355338, %v1817_v11 }
 0x68b   : > { %v1828_v12 = vadd.f32 %v1825_v27, %v4207_v2 }
 0x68d   : > { %v1833_v13 = vsel %vm1310_vm5, %v1828_v12, -inf }
 0x68e   : > { %1834 = vmax.xlane.f32.xlu1 %v1833_v13 }
 0x690   : > { %v1820_v14 = vpop.f32.mrf.mxu3 }
 0x691   : > { %v1826_v15 = vmul.f32 0.35355338, %v1820_v14 }
 0x693   : > { %v1829_v16 = vadd.f32 %v1826_v15, %v4207_v2 }
 0x695   : > { %v1836_v17 = vsel %vm1310_vm5, %v1829_v16, -inf }
 0x696   : > { %1837 = vmax.xlane.f32.xlu2 %v1836_v17 }
 0x698   : > { %v1822_v18 = vpop.f32.mrf.mxu3 }
 0x6a0   : > { %v1999_v63 = vpop.f32.mrf.mxu3 }
 0x6a1   : > { %v2000_v10 = vadd.f32 %v3773_v8, %v1999_v63 }
 0x6a8   : > { %v2001_v4 = vpop.f32.mrf.mxu3 }
 0x6a9   : > { %v2002_v11 = vadd.f32 %v3773_v8, %v2001_v4  ;;  %v3775_v4 = vld [vmem:[%s4081_s21 + $0x3] ss:$0 sm:$0xff] }
 0x6ab   : > { %v2050_v13 = vpack.c.bf16 %v2002_v11, %v2000_v10 }
 0x6ad   : > { %v2059_v15 = vsel %vm1273_vm3, %v2050_v13, 0 }
 0x6b0   : > { %v2004_v9 = vpop.f32.mrf.mxu3 }
 0x6b8   : > { %v2006_v14 = vpop.f32.mrf.mxu3 }
 0x6f9   : > { %v1832_v19 = vpop.xlane.xlu0 %1831 }
 0x6fa   : > { %v1839_v20 = vsub.f32 %v1827_v26, %v1832_v19  ;;  %v2005_v26 = vadd.f32 %v3773_v8, %v2004_v9 }
 0x6fc   : > { %v1842_v21 = vmul.f32 1.442695, %v1839_v20  ;;  %v2051_v27 = vpack.c.bf16 %v2005_v26, %v2005_v26 }
 0x6fe   : > { %3806 = vpow2.f32 %v1842_v21 }
 0x701   : > { %v1835_v24 = vpop.xlane.xlu1 %1834 }
 0x702   : > { %v1840_v28 = vsub.f32 %v1828_v12, %v1835_v24  ;;  %v2062_v12 = vsel %vm1273_vm3, %v2051_v27, 0 }
 0x703   : > { %2070 = vmatpush.bf16.xpose.msrb.mxu1 %v2062_v12 }
 0x704   : > { %v3807_v29 = vpop.eup %3806  ;;  %v1844_v30 = vmul.f32 1.442695, %v1840_v28 }
 0x705   : > { %v1848_v32 = vsel %vm1310_vm5, %v3807_v29, 0.0 }
 0x706   : > { %3808 = vpow2.f32 %v1844_v30  ;;  %1849 = vadd.xlane.f32.xlu0 %v1848_v32 }
 0x709   : > { %v1838_v33 = vpop.xlane.xlu2 %1837 }
 0x70a   : > { %v1841_v34 = vsub.f32 %v1829_v16, %v1838_v33  ;;  %v1959_v16 = vpop.f32.mrf.mxu2 }
 0x70b   : > { %2071 = vmatpush.bf16.xpose.msrb.mxu1 %v2059_v15 }
 0x70c   : > { %v3809_v35 = vpop.eup %3808  ;;  %v1846_v38 = vmul.f32 1.442695, %v1841_v34 }
 0x70d   : > { %v1851_v40 = vsel %vm1310_vm5, %v3809_v35, 0.0 }
 0x70e   : > { %3810 = vpow2.f32 %v1846_v38  ;;  %1852 = vadd.xlane.f32.xlu1 %v1851_v40 }
 0x712   : > { %v1961_v18 = vpop.f32.mrf.mxu2 }
 0x714   : > { %v3811_v42 = vpop.eup %3810 }
 0x715   : > { %v1854_v44 = vsel %vm1310_vm5, %v3811_v42, 0.0 }
 0x716   : > { %1855 = vadd.xlane.f32.xlu2 %v1854_v44  ;;  %v3670_v44 = vld [vmem:[%s4710_s25 + $0x38] sm:$0xff] }
 0x717   : > { %2036 = vmatpush.bf16.msrb.mxu0 %v3670_v44 }
 0x71a   : > { %v1964_v21 = vpop.f32.mrf.mxu2 }
 0x71b   : > { %2037 = vmatpush.bf16.msrb.mxu0 %v3669_v45  ;;  %v3844_v45 = vld [vmem:[#allocation2] sm:$0xff] }
 0x722   : > { %v1966_v23 = vpop.f32.mrf.mxu2 }
 0x779   : > { %v1850_v54 = vpop.xlane.xlu0 %1849 }
 0x77a   : > { %3812 = vrcp.f32 %v1850_v54 }
 0x780   : > { %v3813_v58 = vpop.eup %3812 }
 0x781   : > { %v1853_v57 = vpop.xlane.xlu1 %1852  ;;  %v1860_v60 = vmul.f32 %v3813_v58, %v3807_v29  ;;  %v3774_v29 = vld [vmem:[%s4709_s3 + $0x3] ss:$0 sm:$0xff]  ;;  %s4719_s3 = sld [smem:[#allocation27_spill]] (!%p3460_p8) }
 0x782   : > { %3814 = vrcp.f32 %v1853_v57  ;;  %v1960_v30 = vadd.f32 %v3774_v29, %v1959_v16  ;;  %v1962_v31 = vadd.f32 %v3774_v29, %v1961_v18  ;;  %v1965_v33 = vadd.f32 %v3774_v29, %v1964_v21 }
 0x784   : > { %v2048_v32 = vpack.c.bf16 %v1962_v31, %v1960_v30  ;;  %v2049_v34 = vpack.c.bf16 %v1965_v33, %v1965_v33 }
 0x788   : > { %v3815_v59 = vpop.eup %3814 }
 0x789   : > { %v1861_v61 = vmul.f32 %v3815_v59, %v3809_v35  ;;  %v1856_v3 = vpop.xlane.xlu2 %1855 }
 0x78a   : > { %3816 = vrcp.f32 %v1856_v3 }
 0x78b   : > { %v1865_v0 = vpack.c.bf16 %v1861_v61, %v1860_v60 }
 0x78d   : > { %3375 = vmatmul.msk.bf16.vlgmr.msra.gmra.mxu0 %vm1310_vm5, %v1865_v0 }
 0x790   : > { %v3817_v6 = vpop.eup %3816 }
 0x791   : > { %v1862_v7 = vmul.f32 %v3817_v6, %v3811_v42 }
 0x793   : > { %v1866_v25 = vpack.c.bf16 %v1862_v7, %v1862_v7 }
 0x79d   : > { %3376 = vmatmul.msk.bf16.gmra.mxu0 %vm1310_vm5, %v1866_v25 }
 0x7ad   : > { %3423 = vmatmul.msk.bf16.vlgmr.msrb.gmra.mxu0 %vm1168_vm2, %v4187_v36 }
 0x7bd   : > { %3424 = vmatmul.msk.bf16.gmra.mxu0 %vm1168_vm2, %v4189_v37 }
 0x80a   : > { %v1885_v17 = vpop.f32.mrf.mxu0 }
 0x812   : > { %v1887_v19 = vpop.f32.mrf.mxu0 }
 0x813   : > { %v1896_v20 = vpack.c.bf16 %v1887_v19, %v1885_v17  ;;  %v3429_v17 = vld [vmem:[%s4711_s11 + $0xc] sm:$0xf] }
 0x814   : > { %v2163_v18 = vsel %vm1354_vm6, %v3429_v17, 0 }
 0x815   : > { %3378 = vmatmul.msk.bf16.vlgmr.msra.gmra.mxu1 %vm1273_vm3, %v1896_v20  ;;  %2172 = vmatpush.bf16.msra.mxu3 %v2163_v18 }
 0x81a   : > { %v1890_v22 = vpop.f32.mrf.mxu0 }
 0x81b   : > { %v1897_v28 = vpack.c.bf16 %v1890_v22, %v1890_v22 }
 0x822   : > { %v1892_v24 = vpop.f32.mrf.mxu0 }
 0x825   : > { %3379 = vmatmul.msk.bf16.gmra.mxu1 %vm1273_vm3, %v1897_v28 }
 0x82a   : > { %v2039_v58 = vpop.f32.mrf.mxu0 }
 0x82b   : > { %v2040_v26 = vadd.f32 %v3775_v4, %v2039_v58 }
 0x832   : > { %v2041_v37 = vpop.f32.mrf.mxu0 }
 0x833   : > { %v2042_v10 = vadd.f32 %v3775_v4, %v2041_v37 }
 0x835   : > { %3425 = vmatmul.msk.bf16.vlgmr.msrb.gmra.mxu1 %vm1273_vm3, %v2048_v32  ;;  %v2121_v13 = vpack.c.bf16 %v2042_v10, %v2040_v26  ;;  %v3672_v10 = vld [vmem:[%s4096_s24 + $0x8] sm:$0xff] }
 0x836   : > { %2310 = vmatpush.bf16.msra.mxu0 %v3672_v10 }
 0x83a   : > { %v2044_v9 = vpop.f32.mrf.mxu0 }
 0x83b   : > { %v2045_v25 = vadd.f32 %v3775_v4, %v2044_v9 }
 0x83d   : > { %v2122_v11 = vpack.c.bf16 %v2045_v25, %v2045_v25 }
 0x83f   : > { %v2132_v27 = vsel %vm1354_vm6, %v2122_v11, 0 }
 0x840   : > { %2140 = vmatpush.bf16.msra.mxu2 %v2132_v27 }
 0x842   : > { %v2046_v15 = vpop.f32.mrf.mxu0 }
 0x844   : > { %2141 = vmatpush.bf16.msra.mxu2 %v2121_v13 }
 0x845   : > { %3426 = vmatmul.msk.bf16.gmra.mxu1 %vm1273_vm3, %v2049_v34 }
 0x892   : > { %v1916_v35 = vpop.f32.mrf.mxu1 }
 0x893   : > { %v4351_v38 = vadd.f32 %v1916_v35, %v4301_v62 }
 0x89a   : > { %v1918_v39 = vpop.f32.mrf.mxu1 }
 0x89b   : > { %v4354_v40 = vadd.f32 %v1918_v39, %v4304_v1 }
 0x8a2   : > { %v1921_v41 = vpop.f32.mrf.mxu1 }
 0x8a3   : > { %v4357_v42 = vadd.f32 %v1921_v41, %v4307_v5 }
 0x8aa   : > { %v1923_v43 = vpop.f32.mrf.mxu1 }
 0x8b2   : > { %v2073_v46 = vpop.f32.mrf.mxu1 }
 0x8b3   : > { %v2082_v47 = vmul.f32 0.35355338, %v2073_v46 }
 0x8b5   : > { %v2085_v62 = vadd.f32 %v2082_v47, %v4207_v2 }
 0x8b7   : > { %v2088_v48 = vsel %vm1310_vm5, %v2085_v62, -inf }
 0x8b8   : > { %2089 = vmax.xlane.f32.xlu0 %v2088_v48 }
 0x8ba   : > { %v2075_v1 = vpop.f32.mrf.mxu1 }
 0x8bb   : > { %v2083_v49 = vmul.f32 0.35355338, %v2075_v1  ;;  %v3845_v1 = vld [vmem:[#allocation2 + $0x8] sm:$0xff] }
 0x8bd   : > { %v2086_v5 = vadd.f32 %v2083_v49, %v4207_v2 }
 0x8bf   : > { %v2091_v50 = vsel %vm1310_vm5, %v2086_v5, -inf }
 0x8c0   : > { %2092 = vmax.xlane.f32.xlu1 %v2091_v50 }
 0x8c2   : > { %v2078_v51 = vpop.f32.mrf.mxu1 }
 0x8c3   : > { %v2084_v52 = vmul.f32 0.35355338, %v2078_v51 }
 0x8c5   : > { %v2087_v53 = vadd.f32 %v2084_v52, %v4207_v2  ;;  %v3846_v52 = vld [vmem:[#allocation2 + $0x10] sm:$0xff] }
 0x8c7   : > { %v2094_v36 = vsel %vm1310_vm5, %v2087_v53, -inf }
 0x8c8   : > { %2095 = vmax.xlane.f32.xlu2 %v2094_v36 }
 0x8ca   : > { %v2080_v54 = vpop.f32.mrf.mxu1 }
 0x8cb   : > { %v3889_v54 = vmov 32.0  }
 0x92b   : > { %v2090_v55 = vpop.xlane.xlu0 %2089 }
 0x92c   : > { %v2097_v56 = vsub.f32 %v2085_v62, %v2090_v55 }
 0x92e   : > { %v2100_v57 = vmul.f32 1.442695, %v2097_v56 }
 0x930   : > { %3818 = vpow2.f32 %v2100_v57 }
 0x933   : > { %v2093_v59 = vpop.xlane.xlu1 %2092 }
 0x934   : > { %v2098_v60 = vsub.f32 %v2086_v5, %v2093_v59 }
 0x936   : > { %v3819_v61 = vpop.eup %3818  ;;  %v2102_v63 = vmul.f32 1.442695, %v2098_v60 }
 0x937   : > { %v2106_v0 = vsel %vm1310_vm5, %v3819_v61, 0.0 }
 0x938   : > { %3820 = vpow2.f32 %v2102_v63  ;;  %2107 = vadd.xlane.f32.xlu0 %v2106_v0 }
 0x93b   : > { %v2096_v2 = vpop.xlane.xlu2 %2095 }
 0x93c   : > { %v2099_v3 = vsub.f32 %v2087_v53, %v2096_v2 }
 0x93e   : > { %v3821_v6 = vpop.eup %3820  ;;  %v2104_v7 = vmul.f32 1.442695, %v2099_v3 }
 0x93f   : > { %v2109_v8 = vsel %vm1310_vm5, %v3821_v6, 0.0 }
 0x940   : > { %3822 = vpow2.f32 %v2104_v7  ;;  %2110 = vadd.xlane.f32.xlu1 %v2109_v8 }
 0x946   : > { %v3823_v12 = vpop.eup %3822 }
 0x947   : > { %v2112_v14 = vsel %vm1310_vm5, %v3823_v12, 0.0 }
 0x948   : > { %2113 = vadd.xlane.f32.xlu2 %v2112_v14 }
 0x9ab   : > { %v2108_v16 = vpop.xlane.xlu0 %2107 }
 0x9ac   : > { %3824 = vrcp.f32 %v2108_v16 }
 0x9b2   : > { %v3825_v20 = vpop.eup %3824 }
 0x9b3   : > { %v2111_v19 = vpop.xlane.xlu1 %2110  ;;  %v2118_v22 = vmul.f32 %v3825_v20, %v3819_v61 }
 0x9b4   : > { %3826 = vrcp.f32 %v2111_v19 }
 0x9ba   : > { %v3827_v21 = vpop.eup %3826 }
 0x9bb   : > { %v2119_v23 = vmul.f32 %v3827_v21, %v3821_v6  ;;  %v2114_v28 = vpop.xlane.xlu2 %2113 }
 0x9bc   : > { %3828 = vrcp.f32 %v2114_v28 }
 0x9bd   : > { %v2123_v24 = vpack.c.bf16 %v2119_v23, %v2118_v22  ;;  %3830 = vrcp.f32 %v3889_v54 }
 0x9bf   : > { %3427 = vmatmul.msk.bf16.vlgmr.msra.gmra.mxu2 %vm1310_vm5, %v2123_v24 }
 0x9c2   : > { %v3829_v29 = vpop.eup %3828 }
 0x9c3   : > { %v2120_v30 = vmul.f32 %v3829_v29, %v3823_v12  ;;  %v3831_v55 = vpop.eup %3830  ;;  %v3671_v12 = vld [vmem:[%s4096_s24] sm:$0xff] }
 0x9c4   : > { %v2201_v56 = vmul.f32 32.0, %v3831_v55  ;;  %vm2205_vm7 = vweird.f32 %v3831_v55  ;;  %2311 = vmatpush.bf16.msra.mxu0 %v3671_v12 }
 0x9c5   : > { %v2124_v31 = vpack.c.bf16 %v2120_v30, %v2120_v30 }
 0x9c6   : > { %v2202_v57 = vsub.f32 1.0, %v2201_v56 }
 0x9cf   : > { %3428 = vmatmul.msk.bf16.gmra.mxu2 %vm1310_vm5, %v2124_v31 }
 0xa42   : > { %v2143_v32 = vpop.f32.mrf.mxu2 }
 0xa4a   : > { %v2145_v33 = vpop.f32.mrf.mxu2 }
 0xa4b   : > { %v2154_v34 = vpack.c.bf16 %v2145_v33, %v2143_v32  ;;  %v3676_v32 = vld [vmem:[%s4110_s30 + $0x18] sm:$0xff] }
 0xa4c   : > { %2370 = vmatpush.bf16.msra.mxu1 %v3676_v32 }
 0xa4d   : > { %3430 = vmatmul.msk.bf16.vlgmr.msra.gmra.mxu3 %vm1273_vm3, %v2154_v34 }
 0xa52   : > { %v2148_v35 = vpop.f32.mrf.mxu2 }
 0xa53   : > { %v2155_v41 = vpack.c.bf16 %v2148_v35, %v2148_v35  ;;  %v3675_v35 = vld [vmem:[%s4110_s30 + $0x10] sm:$0xff] }
 0xa54   : > { %2371 = vmatpush.bf16.msra.mxu1 %v3675_v35 }
 0xa5a   : > { %v2150_v39 = vpop.f32.mrf.mxu2 }
 0xa5d   : > { %3431 = vmatmul.msk.bf16.gmra.mxu3 %vm1273_vm3, %v2155_v41 }
 0xad0   : > { %v2174_v43 = vpop.f32.mrf.mxu3 }
 0xad1   : > { %v2183_v44 = vadd.f32 %v2174_v43, %v4351_v38  ;;  %v3776_v43 = vld [vmem:[%s977_s26] ss:$0 sm:$0xff] }
 0xad3   : > { %v2186_v46 = vadd.f32 %v3844_v45, %v2183_v44 }
 0xad5   : > { %v2191_v47 = vsel %vm1168_vm2, %v2186_v46, 0.0 }
 0xad6   : > { %2192 = vadd.xlane.f32.xlu0 %v2191_v47 }
 0xad8   : > { %v2176_v62 = vpop.f32.mrf.mxu3 }
 0xad9   : > { %v2184_v48 = vadd.f32 %v2176_v62, %v4354_v40  ;;  %v2203_v40 = vmul.f32 %v3831_v55, %v2202_v57 }
 0xadb   : > { %v2187_v49 = vadd.f32 %v3845_v1, %v2184_v48  ;;  %v2204_v58 = vadd.f32 %v3831_v55, %v2203_v40  ;;  %v3777_v48 = vld [vmem:[%s980_s29] ss:$0 sm:$0xff] }
 0xadd   : > { %v2194_v5 = vsel %vm1168_vm2, %v2187_v49, 0.0  ;;  %v4388_v59 = vsel %vm2205_vm7, %v3831_v55, %v2204_v58  ;;  %v3674_v58 = vld [vmem:[%s4110_s30 + $0x8] sm:$0xff] }
 0xade   : > { %2195 = vadd.xlane.f32.xlu1 %v2194_v5  ;;  %2372 = vmatpush.bf16.msra.mxu1 %v3674_v58 }
 0xae0   : > { %v2179_v50 = vpop.f32.mrf.mxu3 }
 0xae1   : > { %v2185_v51 = vadd.f32 %v2179_v50, %v4357_v42 }
 0xae3   : > { %v2188_v53 = vadd.f32 %v3846_v52, %v2185_v51 }
 0xae5   : > { %v2197_v38 = vsel %vm1168_vm2, %v2188_v53, 0.0 }
 0xae6   : > { %2198 = vadd.xlane.f32.xlu2 %v2197_v38 }
 0xae8   : > { %v2181_v36 = vpop.f32.mrf.mxu3 }
 0xb49   : > { %v2193_v60 = vpop.xlane.xlu0 %2192 }
 0xb4a   : > { %v2207_v61 = vmul.f32 %v4388_v59, %v2193_v60  ;;  %v3673_v60 = vld [vmem:[%s4110_s30] sm:$0xff] }
 0xb4b   : > { %2373 = vmatpush.bf16.msra.mxu1 %v3673_v60 }
 0xb4c   : > { %v2210_v42 = vsub.f32 %v2186_v46, %v2207_v61 }
 0xb4e   : > { %v2213_v63 = vmul.f32 %v2210_v42, %v2210_v42 }
 0xb50   : > { %v2216_v0 = vsel %vm1168_vm2, %v2213_v63, 0.0 }
 0xb51   : > { %2217 = vadd.xlane.f32.xlu0 %v2216_v0  ;;  %v2196_v37 = vpop.xlane.xlu1 %2195 }
 0xb52   : > { %v2208_v2 = vmul.f32 %v4388_v59, %v2196_v37 }
 0xb54   : > { %v2211_v3 = vsub.f32 %v2187_v49, %v2208_v2 }
 0xb56   : > { %v2214_v4 = vmul.f32 %v2211_v3, %v2211_v3 }
 0xb58   : > { %v2219_v6 = vsel %vm1168_vm2, %v2214_v4, 0.0 }
 0xb59   : > { %2220 = vadd.xlane.f32.xlu1 %v2219_v6  ;;  %v2199_v7 = vpop.xlane.xlu2 %2198 }
 0xb5a   : > { %v2209_v8 = vmul.f32 %v4388_v59, %v2199_v7 }
 0xb5c   : > { %v4395_v9 = vsub.f32 %v2188_v53, %v2209_v8 }
 0xb5e   : > { %v2215_v25 = vmul.f32 %v4395_v9, %v4395_v9 }
 0xb60   : > { %v2222_v26 = vsel %vm1168_vm2, %v2215_v25, 0.0 }
 0xb61   : > { %2223 = vadd.xlane.f32.xlu2 %v2222_v26  ;;  %v3779_v26 = vld [vmem:[%s4714_s28] ss:$0 sm:$0xff] }
 0xbc4   : > { %v2218_v11 = vpop.xlane.xlu0 %2217 }
 0xbc5   : > { %v2225_v27 = vmul.f32 %v2218_v11, %v4388_v59 }
 0xbc7   : > { %v2228_v13 = vadd.f32 1e-05, %v2225_v27 }
 0xbc9   : > { %3832 = vrsqrt.f32 %v2228_v13  ;;  %vm2237_vm9 = vweird.f32 %v2228_v13 }
 0xbcc   : > { %v2221_v14 = vpop.xlane.xlu1 %2220 }
 0xbcd   : > { %v2226_v15 = vmul.f32 %v2221_v14, %v4388_v59 }
 0xbcf   : > { %v3833_v16 = vpop.eup %3832  ;;  %v2229_v17 = vadd.f32 1e-05, %v2226_v15 }
 0xbd0   : > { %v2232_v18 = vmul.f32 %v3833_v16, %v2228_v13  ;;  %vm2238_vm8 = vweird.f32 %v3833_v16 }
 0xbd1   : > { %3834 = vrsqrt.f32 %v2229_v17  ;;  %vm2239_vm10 = vmor %vm2237_vm9, %vm2238_vm8  ;;  %vm2247_vm12 = vweird.f32 %v2229_v17 }
 0xbd2   : > { %v2233_v19 = vmul.f32 %v3833_v16, %v2232_v18 }
 0xbd4   : > { %v2234_v20 = vmul.f32 0.5, %v2233_v19  ;;  %v2224_v21 = vpop.xlane.xlu2 %2223 }
 0xbd5   : > { %v2227_v22 = vmul.f32 %v2224_v21, %v4388_v59 }
 0xbd6   : > { %v2235_v23 = vsub.f32 1.5, %v2234_v20 }
 0xbd7   : > { %v3835_v24 = vpop.eup %3834  ;;  %v2230_v28 = vadd.f32 1e-05, %v2227_v22 }
 0xbd8   : > { %v2236_v29 = vmul.f32 %v3833_v16, %v2235_v23  ;;  %v2242_v30 = vmul.f32 %v3835_v24, %v2229_v17  ;;  %vm2248_vm11 = vweird.f32 %v3835_v24 }
 0xbd9   : > { %3836 = vrsqrt.f32 %v2230_v28  ;;  %vm2249_vm13 = vmor %vm2247_vm12, %vm2248_vm11  ;;  %vm2257_vm15 = vweird.f32 %v2230_v28 }
 0xbda   : > { %v2243_v31 = vmul.f32 %v3835_v24, %v2242_v30  ;;  %v2240_v33 = vsel %vm2239_vm10, %v3833_v16, %v2236_v29 }
 0xbdb   : > { %v2261_v44 = vmul.f32 %v2240_v33, %v2210_v42  ;;  %v3778_v42 = vld [vmem:[%s4713_s1] ss:$0 sm:$0xff] }
 0xbdc   : > { %v2244_v34 = vmul.f32 0.5, %v2243_v31 }
 0xbdd   : > { %v2267_v1 = vmul.f32 %v3776_v43, %v2261_v44 }
 0xbde   : > { %v2245_v39 = vsub.f32 1.5, %v2244_v34 }
 0xbdf   : > { %v3837_v41 = vpop.eup %3836  ;;  %v2273_v52 = vadd.f32 %v3777_v48, %v2267_v1 }
 0xbe0   : > { %v2246_v45 = vmul.f32 %v3835_v24, %v2245_v39  ;;  %v2252_v46 = vmul.f32 %v3837_v41, %v2230_v28  ;;  %vm2258_vm14 = vweird.f32 %v3837_v41 }
 0xbe1   : > { %vm2259_vm0 = vmor %vm2257_vm15, %vm2258_vm14 }
 0xbe2   : > { %v2250_v47 = vsel %vm2249_vm13, %v3835_v24, %v2246_v45  ;;  %v2253_v62 = vmul.f32 %v3837_v41, %v2252_v46 }
 0xbe3   : > { %v2262_v49 = vmul.f32 %v2250_v47, %v2211_v3 }
 0xbe4   : > { %v2254_v5 = vmul.f32 0.5, %v2253_v62 }
 0xbe5   : > { %v2268_v50 = vmul.f32 %v3776_v43, %v2262_v49 }
 0xbe6   : > { %v2255_v51 = vsub.f32 1.5, %v2254_v5 }
 0xbe7   : > { %v2274_v53 = vadd.f32 %v3777_v48, %v2268_v50 }
 0xbe8   : > { %v2256_v38 = vmul.f32 %v3837_v41, %v2255_v51 }
 0xbe9   : > { %v2280_v36 = vpack.c.bf16 %v2274_v53, %v2273_v52 }
 0xbea   : > { %v2260_v54 = vsel %vm2259_vm0, %v3837_v41, %v2256_v38 }
 0xbeb   : > { %3440 = vmatmul.msk.bf16.vlgmr.msra.gmra.mxu0 %vm1168_vm2, %v2280_v36  ;;  %v2263_v55 = vmul.f32 %v2260_v54, %v4395_v9 }
 0xbed   : > { %v2269_v56 = vmul.f32 %v3776_v43, %v2263_v55 }
 0xbef   : > { %v2275_v57 = vadd.f32 %v3777_v48, %v2269_v56 }
 0xbf1   : > { %v2281_v40 = vpack.c.bf16 %v2275_v57, %v2275_v57 }
 0xbfb   : > { %3441 = vmatmul.msk.bf16.gmra.mxu0 %vm1168_vm2, %v2281_v40 }
 0xc68   : > { %v2313_v61 = vpop.f32.mrf.mxu0 }
 0xc69   : > { %v2314_v63 = vadd.f32 %v3778_v42, %v2313_v61 }
 0xc6b   : > { %v2322_v2 = vmax.f32 %v2314_v63, 0.0 }
 0xc70   : > { %v2315_v0 = vpop.f32.mrf.mxu0 }
 0xc71   : > { %v2316_v37 = vadd.f32 %v3778_v42, %v2315_v0 }
 0xc73   : > { %v2323_v3 = vmax.f32 %v2316_v37, 0.0 }
 0xc75   : > { %v2333_v4 = vpack.c.bf16 %v2323_v3, %v2322_v2 }
 0xc77   : > { %3458 = vmatmul.msk.bf16.vlgmr.msra.gmra.mxu1 %vm2359_vm1, %v2333_v4 }
 0xc78   : > { %v2318_v6 = vpop.f32.mrf.mxu0 }
 0xc79   : > { %v2319_v7 = vadd.f32 %v3778_v42, %v2318_v6 }
 0xc7b   : > { %v2324_v9 = vmax.f32 %v2319_v7, 0.0 }
 0xc7d   : > { %v2334_v25 = vpack.c.bf16 %v2324_v9, %v2324_v9 }
 0xc80   : > { %v2320_v8 = vpop.f32.mrf.mxu0 }
 0xc87   : > { %3459 = vmatmul.msk.bf16.gmra.mxu1 %vm2359_vm1, %v2334_v25 }
 0xcf4   : > { %v2375_v10 = vpop.f32.mrf.mxu1 }
 0xcf5   : > { %v2384_v11 = vadd.f32 %v2375_v10, %v2273_v52 }
 0xcf7   : > { %v2391_v27 = vadd.f32 %v3779_v26, %v2384_v11 }
 0xcf9   : > { %v2396_v12 = vsel %vm1168_vm2, %v2391_v27, 0.0 }
 0xcfa   : > { %2397 = vadd.xlane.f32.xlu0 %v2396_v12 }
 0xcfc   : > { %v2377_v13 = vpop.f32.mrf.mxu1 }
 0xcfd   : > { %v2385_v14 = vadd.f32 %v2377_v13, %v2274_v53 }
 0xcff   : > { %v2392_v15 = vadd.f32 %v3779_v26, %v2385_v14 }
 0xd01   : > { %v2399_v16 = vsel %vm1168_vm2, %v2392_v15, 0.0 }
 0xd02   : > { %2400 = vadd.xlane.f32.xlu1 %v2399_v16 }
 0xd04   : > { %v2380_v17 = vpop.f32.mrf.mxu1 }
 0xd05   : > { %v2386_v18 = vadd.f32 %v2380_v17, %v2275_v57  ;;  %v3780_v57 = vld [vmem:[%s983_s6] ss:$0 sm:$0xff] }
 0xd07   : > { %v2393_v19 = vadd.f32 %v3779_v26, %v2386_v18 }
 0xd09   : > { %v2402_v20 = vsel %vm1168_vm2, %v2393_v19, 0.0 }
 0xd0a   : > { %2403 = vadd.xlane.f32.xlu2 %v2402_v20 }
 0xd0c   : > { %v2382_v21 = vpop.f32.mrf.mxu1 }
 0xd6d   : > { %v2398_v22 = vpop.xlane.xlu0 %2397 }
 0xd6e   : > { %v2405_v23 = vmul.f32 %v2398_v22, %v4388_v59 }
 0xd70   : > { %v2408_v24 = vsub.f32 %v2391_v27, %v2405_v23 }
 0xd72   : > { %v2411_v28 = vmul.f32 %v2408_v24, %v2408_v24 }
 0xd74   : > { %v2414_v29 = vsel %vm1168_vm2, %v2411_v28, 0.0 }
 0xd75   : > { %2415 = vadd.xlane.f32.xlu0 %v2414_v29  ;;  %v2401_v30 = vpop.xlane.xlu1 %2400 }
 0xd76   : > { %v2406_v31 = vmul.f32 %v2401_v30, %v4388_v59 }
 0xd78   : > { %v2409_v32 = vsub.f32 %v2392_v15, %v2406_v31 }
 0xd7a   : > { %v2412_v33 = vmul.f32 %v2409_v32, %v2409_v32 }
 0xd7c   : > { %v2417_v34 = vsel %vm1168_vm2, %v2412_v33, 0.0 }
 0xd7d   : > { %2418 = vadd.xlane.f32.xlu1 %v2417_v34  ;;  %v2404_v35 = vpop.xlane.xlu2 %2403 }
 0xd7e   : > { %v2407_v39 = vmul.f32 %v2404_v35, %v4388_v59 }
 0xd80   : > { %v2410_v41 = vsub.f32 %v2393_v19, %v2407_v39 }
 0xd82   : > { %v2413_v43 = vmul.f32 %v2410_v41, %v2410_v41 }
 0xd84   : > { %v2420_v44 = vsel %vm1168_vm2, %v2413_v43, 0.0 }
 0xd85   : > { %2421 = vadd.xlane.f32.xlu2 %v2420_v44 }
 0xde8   : > { %v2416_v45 = vpop.xlane.xlu0 %2415 }
 0xde9   : > { %v2423_v46 = vmul.f32 %v2416_v45, %v4388_v59 }
 0xdeb   : > { %v2426_v47 = vadd.f32 1e-05, %v2423_v46 }
 0xded   : > { %3838 = vrsqrt.f32 %v2426_v47  ;;  %vm2435_vm4 = vweird.f32 %v2426_v47 }
 0xdf0   : > { %v2419_v62 = vpop.xlane.xlu1 %2418 }
 0xdf1   : > { %v2424_v48 = vmul.f32 %v2419_v62, %v4388_v59 }
 0xdf3   : > { %v3839_v1 = vpop.eup %3838  ;;  %v2427_v49 = vadd.f32 1e-05, %v2424_v48 }
 0xdf4   : > { %v2430_v5 = vmul.f32 %v3839_v1, %v2426_v47  ;;  %vm2436_vm3 = vweird.f32 %v3839_v1 }
 0xdf5   : > { %3840 = vrsqrt.f32 %v2427_v49  ;;  %vm2437_vm5 = vmor %vm2435_vm4, %vm2436_vm3  ;;  %vm2445_vm7 = vweird.f32 %v2427_v49 }
 0xdf6   : > { %v2431_v50 = vmul.f32 %v3839_v1, %v2430_v5 }
 0xdf8   : > { %v2432_v51 = vmul.f32 0.5, %v2431_v50  ;;  %v2422_v52 = vpop.xlane.xlu2 %2421 }
 0xdf9   : > { %v2425_v53 = vmul.f32 %v2422_v52, %v4388_v59  ;;  %v3781_v59 = vld [vmem:[%s986_s5] ss:$0 sm:$0xff] }
 0xdfa   : > { %v2433_v38 = vsub.f32 1.5, %v2432_v51 }
 0xdfb   : > { %v3841_v36 = vpop.eup %3840  ;;  %v2428_v54 = vadd.f32 1e-05, %v2425_v53 }
 0xdfc   : > { %v2434_v55 = vmul.f32 %v3839_v1, %v2433_v38  ;;  %v2440_v56 = vmul.f32 %v3841_v36, %v2427_v49  ;;  %vm2446_vm6 = vweird.f32 %v3841_v36 }
 0xdfd   : > { %3842 = vrsqrt.f32 %v2428_v54  ;;  %vm2447_vm8 = vmor %vm2445_vm7, %vm2446_vm6  ;;  %vm2455_vm10 = vweird.f32 %v2428_v54 }
 0xdfe   : > { %v2438_v40 = vsel %vm2437_vm5, %v3839_v1, %v2434_v55  ;;  %v2441_v58 = vmul.f32 %v3841_v36, %v2440_v56 }
 0xdff   : > { %v2459_v60 = vmul.f32 %v2438_v40, %v2408_v24 }
 0xe00   : > { %v2442_v61 = vmul.f32 0.5, %v2441_v58 }
 0xe01   : > { %v2465_v42 = vmul.f32 %v3780_v57, %v2459_v60 }
 0xe02   : > { %v2443_v63 = vsub.f32 1.5, %v2442_v61 }
 0xe03   : > { %v3843_v0 = vpop.eup %3842  ;;  %v2471_v37 = vadd.f32 %v3781_v59, %v2465_v42 }
 0xe04   : > { %v2444_v2 = vmul.f32 %v3841_v36, %v2443_v63  ;;  %v2450_v3 = vmul.f32 %v3843_v0, %v2428_v54  ;;  %vm2456_vm9 = vweird.f32 %v3843_v0 }
 0xe05   : > { %2474 = vst.msk [vmem:[#allocation2] sm:$0xff] %vm1168_vm2, %v2471_v37  ;;  %vm2457_vm11 = vmor %vm2455_vm10, %vm2456_vm9 }
 0xe06   : > { %v2448_v4 = vsel %vm2447_vm8, %v3841_v36, %v2444_v2  ;;  %v2451_v6 = vmul.f32 %v3843_v0, %v2450_v3 }
 0xe07   : > { %v2460_v7 = vmul.f32 %v2448_v4, %v2409_v32 }
 0xe08   : > { %v2452_v8 = vmul.f32 0.5, %v2451_v6 }
 0xe09   : > { %v2466_v9 = vmul.f32 %v3780_v57, %v2460_v7 }
 0xe0a   : > { %v2453_v25 = vsub.f32 1.5, %v2452_v8 }
 0xe0b   : > { %v2472_v26 = vadd.f32 %v3781_v59, %v2466_v9 }
 0xe0c   : > { %v2454_v10 = vmul.f32 %v3843_v0, %v2453_v25 }
 0xe0d   : > { %2475 = vst.msk [vmem:[#allocation2 + $0x8] sm:$0xff] %vm1168_vm2, %v2472_v26 }
 0xe0e   : > { %v2458_v11 = vsel %vm2457_vm11, %v3843_v0, %v2454_v10 }
 0xe0f   : > { %v2461_v27 = vmul.f32 %v2458_v11, %v2410_v41 }
 0xe11   : > { %v2467_v12 = vmul.f32 %v3780_v57, %v2461_v27  ;;  %2480 = sbr.rel (%p3460_p8) target bundleno = 3909 (0xf45), region = 120 }
 0xe13   : > { %v2473_v13 = vadd.f32 %v3781_v59, %v2467_v12 }
 0xe15   : > { %2476 = vst.msk [vmem:[#allocation2 + $0x10] sm:$0xff] %vm1168_vm2, %v2473_v13 }
 0xe16   : > { %v3479_v14 = vld [vmem:[%s4716_s4 + $0x20] sm:$0xf]  ;;  %v3683_v15 = vld [vmem:[%s4717_s9 + $0x2c] sm:$0xf0]  ;;  %v3681_v16 = vld [vmem:[%s4717_s9 + $0x24] sm:$0xf]  ;;  %v2489_v47 = vpack.c.bf16 %v2472_v26, %v2471_v37 }
 0xe17   : > { %v3480_v17 = vor.u32 %v3683_v15, %v3479_v14  ;;  %v3481_v18 = vld [vmem:[%s4717_s9 + $0x30] sm:$0xf0]  ;;  %v3487_v19 = vld [vmem:[%s4717_s9 + $0x28] sm:$0xf]  ;;  %v3684_v20 = vld [vmem:[%s4717_s9 + $0x34] sm:$0xf0] }
 0xe18   : > { %v3484_v21 = vor.u32 %v3681_v16, %v3481_v18  ;;  %v3488_v22 = vor.u32 %v3684_v20, %v3487_v19  ;;  %v3682_v23 = vld [vmem:[%s4717_s9 + $0x2c] sm:$0xf]  ;;  %v3489_v24 = vld [vmem:[%s4717_s9 + $0x38] sm:$0xf0]  ;;  %v3463_v28 = vld [vmem:[%s4717_s9] sm:$0xf] }
 0xe19   : > { %2549 = vmatpush.bf16.msra.mxu0 %v3480_v17  ;;  %v3492_v29 = vor.u32 %v3682_v23, %v3489_v24  ;;  %v3679_v30 = vld [vmem:[%s4717_s9 + $0xc] sm:$0xf0]  ;;  %v3677_v31 = vld [vmem:[%s4717_s9 + $0x4] sm:$0xf]  ;;  %v3465_v32 = vld [vmem:[%s4717_s9 + $0x10] sm:$0xf0] }
 0xe1a   : > { %2563 = vmatpush.bf16.msra.mxu1 %v3484_v21  ;;  %2577 = vmatpush.bf16.msra.mxu2 %v3488_v22  ;;  %v3464_v33 = vor.u32 %v3679_v30, %v3463_v28  ;;  %v3468_v34 = vor.u32 %v3677_v31, %v3465_v32  ;;  %v3471_v35 = vld [vmem:[%s4717_s9 + $0x8] sm:$0xf]  ;;  %v3680_v39 = vld [vmem:[%s4717_s9 + $0x14] sm:$0xf0]  ;;  %v3678_v41 = vld [vmem:[%s4717_s9 + $0xc] sm:$0xf] }
 0xe1b   : > { %2591 = vmatpush.bf16.msra.mxu3 %v3492_v29  ;;  %v3472_v43 = vor.u32 %v3680_v39, %v3471_v35  ;;  %v3473_v44 = vld [vmem:[%s4717_s9 + $0x18] sm:$0xf0]  ;;  %v3691_v1 = vld [vmem:[%s4718_s2 + $0x30] sm:$0xff]  ;;  %v3690_v51 = vld [vmem:[%s4718_s2 + $0x28] sm:$0xff] }
 0xe1c   : > { %v3692_v45 = vld [vmem:[%s4718_s2 + $0x38] sm:$0xff]  ;;  %v3476_v46 = vor.u32 %v3678_v41, %v3473_v44  ;;  %v3699_v5 = vld [vmem:[%s4718_s2 + $0x70] sm:$0xff]  ;;  %v3698_v53 = vld [vmem:[%s4718_s2 + $0x68] sm:$0xff] }
 0xe1d   : > { %v3700_v62 = vld [vmem:[%s4718_s2 + $0x78] sm:$0xff]  ;;  %2550 = vmatpush.bf16.msra.mxu0 %v3464_v33  ;;  %v3707_v50 = vld [vmem:[%s4718_s2 + $0xb0] sm:$0xff]  ;;  %v3706_v38 = vld [vmem:[%s4718_s2 + $0xa8] sm:$0xff] }
 0xe1e   : > { %2564 = vmatpush.bf16.msra.mxu1 %v3468_v34  ;;  %2578 = vmatpush.bf16.msra.mxu2 %v3472_v43  ;;  %v3708_v48 = vld [vmem:[%s4718_s2 + $0xb8] sm:$0xff]  ;;  %v3715_v52 = vld [vmem:[%s4718_s2 + $0xf0] sm:$0xff]  ;;  %v3689_v36 = vld [vmem:[%s4718_s2 + $0x20] sm:$0xff] }
 0xe1f   : > { %2592 = vmatpush.bf16.msra.mxu3 %v3476_v46  ;;  %v3716_v49 = vld [vmem:[%s4718_s2 + $0xf8] sm:$0xff]  ;;  %v3714_v54 = vld [vmem:[%s4718_s2 + $0xe8] sm:$0xff]  ;;  %v3697_v55 = vld [vmem:[%s4718_s2 + $0x60] sm:$0xff] }
 0xe20   : > { %3493 = vmatmul.msk.bf16.vlgmr.msra.gmra.mxu0 %vm1168_vm2, %v2489_v47  ;;  %v3688_v56 = vld [vmem:[%s4718_s2 + $0x18] sm:$0xff]  ;;  %v3705_v40 = vld [vmem:[%s4718_s2 + $0xa0] sm:$0xff]  ;;  %v3687_v59 = vld [vmem:[%s4718_s2 + $0x10] sm:$0xff] }
 0xe21   : > { %2871 = vmatpush.bf16.msrb.mxu0 %v3692_v45  ;;  %3494 = vmatmul.msk.bf16.vlgmr.msra.gmra.mxu1 %vm1168_vm2, %v2489_v47  ;;  %v3696_v57 = vld [vmem:[%s4718_s2 + $0x58] sm:$0xff]  ;;  %v3713_v58 = vld [vmem:[%s4718_s2 + $0xe0] sm:$0xff]  ;;  %v3695_v60 = vld [vmem:[%s4718_s2 + $0x50] sm:$0xff] }
 0xe22   : > { %2885 = vmatpush.bf16.msrb.mxu1 %v3700_v62  ;;  %3495 = vmatmul.msk.bf16.vlgmr.msra.gmra.mxu2 %vm1168_vm2, %v2489_v47  ;;  %v3704_v61 = vld [vmem:[%s4718_s2 + $0x98] sm:$0xff]  ;;  %v3686_v63 = vld [vmem:[%s4718_s2 + $0x8] sm:$0xff]  ;;  %v3703_v37 = vld [vmem:[%s4718_s2 + $0x90] sm:$0xff] }
 0xe23   : > { %3496 = vmatmul.msk.bf16.vlgmr.msra.gmra.mxu3 %vm1168_vm2, %v2489_v47  ;;  %2899 = vmatpush.bf16.msrb.mxu2 %v3708_v48  ;;  %v3712_v42 = vld [vmem:[%s4718_s2 + $0xd8] sm:$0xff]  ;;  %v3694_v0 = vld [vmem:[%s4718_s2 + $0x48] sm:$0xff]  ;;  %v3711_v2 = vld [vmem:[%s4718_s2 + $0xd0] sm:$0xff] }
 0xe24   : > { %2913 = vmatpush.bf16.msrb.mxu3 %v3716_v49  ;;  %v3685_v3 = vld [vmem:[%s4718_s2] sm:$0xff]  ;;  %v3702_v6 = vld [vmem:[%s4718_s2 + $0x88] sm:$0xff] }
 0xe25   : > { %2872 = vmatpush.bf16.msrb.mxu0 %v3691_v1  ;;  %v3693_v4 = vld [vmem:[%s4718_s2 + $0x40] sm:$0xff]  ;;  %v3710_v7 = vld [vmem:[%s4718_s2 + $0xc8] sm:$0xff] }
 0xe26   : > { %2886 = vmatpush.bf16.msrb.mxu1 %v3699_v5  ;;  %v3701_v8 = vld [vmem:[%s4718_s2 + $0x80] sm:$0xff] }
 0xe27   : > { %2900 = vmatpush.bf16.msrb.mxu2 %v3707_v50  ;;  %v3709_v9 = vld [vmem:[%s4718_s2 + $0xc0] sm:$0xff] }
 0xe28   : > { %2914 = vmatpush.bf16.msrb.mxu3 %v3715_v52  ;;  %v2490_v25 = vld [vmem:[%s4719_s3] sm:$0xf] }
 0xe29   : > { %2873 = vmatpush.bf16.msrb.mxu0 %v3690_v51  ;;  %v2492_v10 = vperm.slane %v2490_v25, 0  ;;  %v2493_v27 = vperm.slane %v2490_v25, 1  ;;  %v2494_v21 = vperm.slane %v2490_v25, 2  ;;  %v2495_v23 = vperm.slane %v2490_v25, 3  ;;  %v3847_v48 = vld [vmem:[%s4720_s8] ss:$0 sm:$0xff] }
 0xe2a   : > { %2887 = vmatpush.bf16.msrb.mxu1 %v3698_v53 }
 0xe2b   : > { %2901 = vmatpush.bf16.msrb.mxu2 %v3706_v38 }
 0xe2c   : > { %2915 = vmatpush.bf16.msrb.mxu3 %v3714_v54 }
 0xe2d   : > { %2874 = vmatpush.bf16.msrb.mxu0 %v3689_v36 }
 0xe2e   : > { %2888 = vmatpush.bf16.msrb.mxu1 %v3697_v55 }
 0xe2f   : > { %2902 = vmatpush.bf16.msrb.mxu2 %v3705_v40 }
 0xe30   : > { %2916 = vmatpush.bf16.msrb.mxu3 %v3713_v58 }
 0xe31   : > { %2875 = vmatpush.bf16.msrb.mxu0 %v3688_v56 }
 0xe32   : > { %2889 = vmatpush.bf16.msrb.mxu1 %v3696_v57 }
 0xe33   : > { %2903 = vmatpush.bf16.msrb.mxu2 %v3704_v61 }
 0xe34   : > { %2917 = vmatpush.bf16.msrb.mxu3 %v3712_v42 }
 0xe35   : > { %2876 = vmatpush.bf16.msrb.mxu0 %v3687_v59 }
 0xe36   : > { %2890 = vmatpush.bf16.msrb.mxu1 %v3695_v60 }
 0xe37   : > { %2904 = vmatpush.bf16.msrb.mxu2 %v3703_v37 }
 0xe38   : > { %2918 = vmatpush.bf16.msrb.mxu3 %v3711_v2 }
 0xe39   : > { %2877 = vmatpush.bf16.msrb.mxu0 %v3686_v63 }
 0xe3a   : > { %2891 = vmatpush.bf16.msrb.mxu1 %v3694_v0 }
 0xe3b   : > { %2905 = vmatpush.bf16.msrb.mxu2 %v3702_v6 }
 0xe3c   : > { %2919 = vmatpush.bf16.msrb.mxu3 %v3710_v7 }
 0xe3d   : > { %2878 = vmatpush.bf16.msrb.mxu0 %v3685_v3 }
 0xe3e   : > { %2892 = vmatpush.bf16.msrb.mxu1 %v3693_v4 }
 0xe3f   : > { %2906 = vmatpush.bf16.msrb.mxu2 %v3701_v8 }
 0xe40   : > { %2920 = vmatpush.bf16.msrb.mxu3 %v3709_v9 }
 0xe9d   : > { %v2552_v26 = vpop.f32.mrf.mxu0 }
 0xe9e   : > { %v2566_v11 = vpop.f32.mrf.mxu1  ;;  %v2553_v12 = vadd.f32 %v2552_v26, %v2492_v10 }
 0xe9f   : > { %v2567_v13 = vadd.f32 %v2566_v11, %v2493_v27 }
 0xea0   : > { %v2599_v17 = vmax.f32 %v2553_v12, 0.0 }
 0xea1   : > { %v2600_v20 = vmax.f32 %v2567_v13, 0.0 }
 0xea5   : > { %v2580_v14 = vpop.f32.mrf.mxu2  ;;  %v2554_v16 = vpop.f32.mrf.mxu0 }
 0xea6   : > { %v2594_v15 = vpop.f32.mrf.mxu3  ;;  %v2555_v18 = vadd.f32 %v2554_v16, %v2492_v10  ;;  %v2568_v19 = vpop.f32.mrf.mxu1  ;;  %v2581_v30 = vadd.f32 %v2580_v14, %v2494_v21 }
 0xea7   : > { %v2569_v22 = vadd.f32 %v2568_v19, %v2493_v27  ;;  %v2595_v32 = vadd.f32 %v2594_v15, %v2495_v23 }
 0xea8   : > { %v2603_v24 = vmax.f32 %v2555_v18, 0.0  ;;  %v2601_v41 = vmax.f32 %v2581_v30, 0.0 }
 0xea9   : > { %v2604_v28 = vmax.f32 %v2569_v22, 0.0  ;;  %v2602_v44 = vmax.f32 %v2595_v32, 0.0 }
 0xeaa   : > { %v2671_v29 = vpack.c.bf16 %v2603_v24, %v2599_v17 }
 0xeab   : > { %v2672_v31 = vpack.c.bf16 %v2604_v28, %v2600_v20 }
 0xeac   : > { %2879 = vmatmul.bf16.vlgmr.msrb.gmra.mxu0 %v2671_v29 }
 0xead   : > { %v2582_v33 = vpop.f32.mrf.mxu2  ;;  %2893 = vmatmul.bf16.vlgmr.msrb.gmra.mxu1 %v2672_v31 }
 0xeae   : > { %v2583_v34 = vadd.f32 %v2582_v33, %v2494_v21  ;;  %v2596_v35 = vpop.f32.mrf.mxu3 }
 0xeaf   : > { %v2597_v39 = vadd.f32 %v2596_v35, %v2495_v23 }
 0xeb0   : > { %v2605_v43 = vmax.f32 %v2583_v34, 0.0 }
 0xeb1   : > { %v2606_v45 = vmax.f32 %v2597_v39, 0.0 }
 0xeb2   : > { %v2673_v46 = vpack.c.bf16 %v2605_v43, %v2601_v41 }
 0xeb3   : > { %v2674_v47 = vpack.c.bf16 %v2606_v45, %v2602_v44 }
 0xeb4   : > { %2907 = vmatmul.bf16.vlgmr.msrb.gmra.mxu2 %v2673_v46 }
 0xeb5   : > { %2921 = vmatmul.bf16.vlgmr.msrb.gmra.mxu3 %v2674_v47 }
 0xf29   : > { %v2880_v62 = vpop.f32.mrf.mxu0 }
 0xf2a   : > { %v2881_v1 = vadd.f32 %v3847_v48, %v2880_v62  ;;  %v2894_v49 = vpop.f32.mrf.mxu1 }
 0xf2c   : > { %v2895_v5 = vadd.f32 %v2894_v49, %v2881_v1 }
 0xf31   : > { %v2882_v50 = vpop.f32.mrf.mxu0 }
 0xf32   : > { %v2883_v38 = vadd.f32 %v3847_v48, %v2882_v50  ;;  %v2896_v54 = vpop.f32.mrf.mxu1 }
 0xf34   : > { %v2897_v55 = vadd.f32 %v2896_v54, %v2883_v38 }
 0xf37   : > { %v2908_v51 = vpop.f32.mrf.mxu2 }
 0xf38   : > { %v2909_v52 = vadd.f32 %v2908_v51, %v2895_v5  ;;  %v2922_v53 = vpop.f32.mrf.mxu3 }
 0xf3a   : > { %v2923_v36 = vadd.f32 %v2922_v53, %v2909_v52 }
 0xf3c   : > { %2927 = vst [vmem:[%s4131_s20] sm:$0xff] %v2923_v36 }
 0xf3f   : > { %v2910_v56 = vpop.f32.mrf.mxu2 }
 0xf40   : > { %v2911_v57 = vadd.f32 %v2910_v56, %v2897_v55  ;;  %v2924_v40 = vpop.f32.mrf.mxu3 }
 0xf42   : > { %v2925_v58 = vadd.f32 %v2924_v40, %v2911_v57 }
 0xf44   : > { %2928 = vst [vmem:[%s4131_s20 + $0x8] sm:$0xff] %v2925_v58 }
 0xf45 PF: > { %s4721_s6 = sld [smem:[#allocation6_spill]] }
 0xf46   : > { %s4722_s4 = sld [smem:[#allocation4_spill]] }
 0xf47   : > { %s4723_s30 = sld [smem:[#allocation5_spill]] }
 0xf48   : > { %s4724_s24 = sld [smem:[#allocation7_spill]] }
 0xf49   : > { %s4725_s25 = sld [smem:[#allocation8_spill]] }
 0xf4b   : > { %s33_s5 = sadd.s32 1, %s4721_s6  }
 0xf4c   : > { %p30_p9 = scmp.ge.s32.totalorder %s33_s5, 6  }
 0xf4e   :  { %32 = sbr.rel (!%p30_p9) target bundleno = 16 (0x10), region = 219 }

</bundles_post_ra>
